<compile_context>
chip_gen: v7x
topology: tpu7x:2x2x1
jax: 0.10.0
libtpu: 0.0.40
codegen_flags: <defaults>
</compile_context>

<pallas_src>
import math
from functools import partial

import jax
import jax.numpy as jnp
from jax import lax
from jax.experimental import pallas as pl
from jax.experimental.pallas import tpu as pltpu

EPS = 1e-6


def _round_up(x, m):
    return ((x + m - 1) // m) * m


def _conv_rows(x_ref, w_ref, *, KH, KW, Ho, Wo):
    """Direct conv for one image block.

    x_ref: (1, Hp, Wp, Cin) padded input block (bf16 or f32).
    w_ref: (KH*KW, Cin, Cpad) weight, tap-major so each tap is a leading index.
    Returns y: (Ho*Wo, Cpad) f32 (MXU accumulates in f32 regardless of operands).
    """
    Cin = w_ref.shape[1]
    Cpad = w_ref.shape[2]
    acc = jnp.zeros((Ho * Wo, Cpad), jnp.float32)
    for kh in range(KH):
        for kw in range(KW):
            # Static slice of the VMEM block; (Ho, Wo, Cin) -> (Ho*Wo, Cin) is a
            # layout-free collapse because Wo % 8 == 0 (checked in the wrapper).
            xs = x_ref[0, kh:kh + Ho, kw:kw + Wo, :]
            xs = xs.reshape(Ho * Wo, Cin)
            acc = acc + jnp.dot(xs, w_ref[kh * KW + kw],
                                preferred_element_type=jnp.float32)
    return acc


def _make_stats_kernel(KH, KW, Ho, Wo):
    def kernel(x_ref, w_ref, sum_ref, sq_ref):
        y = _conv_rows(x_ref, w_ref, KH=KH, KW=KW, Ho=Ho, Wo=Wo)
        # Keep sublane-partial (8, Cpad) sums: no per-tile XLU 8->1 reduce; the
        # final reduction happens on a tiny (N*8, Cpad) array in XLA.
        yr = y.reshape(-1, 8, y.shape[-1])
        sum_ref[...] = jnp.sum(yr, axis=0)
        sq_ref[...] = jnp.sum(yr * yr, axis=0)
    return kernel


def _make_apply_kernel(KH, KW, Ho, Wo):
    def kernel(x_ref, w_ref, scale_ref, shift_ref, o_ref):
        # Recompute y (cheap: re-reads only x, not a 9x patch matrix) and apply
        # the folded BN affine + ReLU.  Lane-dense (Cpad multiple of 128) store.
        y = _conv_rows(x_ref, w_ref, KH=KH, KW=KW, Ho=Ho, Wo=Wo)
        o_ref[0] = jnp.maximum(y * scale_ref[...] + shift_ref[...], 0.0
                               ).astype(o_ref.dtype)
    return kernel


@partial(jax.jit, static_argnames=("stride", "mxu_dtype"))
def conv_norm_act(x, weight, gamma, beta, *, stride=1, mxu_dtype=jnp.bfloat16):
    """x: (N, Cin, H, W) f32; weight: (Cout, Cin, KH, KW); gamma/beta: (Cout,)."""
    N, Cin, H, W = x.shape
    Cout, Cin_w, KH, KW = weight.shape
    if stride != 1 or Cin_w != Cin:
        # TODO(synk): stride > 1 / grouped / dilated conv not implemented.
        raise NotImplementedError("only stride=1, groups=1, dilation=1 supported")
    pad = math.ceil((KH - stride) / 2)
    Hp, Wp = H + 2 * pad, W + 2 * pad
    Ho, Wo = Hp - KH + 1, Wp - KW + 1
    if Wo % 8 != 0:
        # TODO(synk): pad Wo to a sublane multiple (masking the extra columns out
        # of the BN sums) to support arbitrary widths; the in-kernel
        # (Ho,Wo,Cin)->(Ho*Wo,Cin) collapse relies on Wo % 8 == 0.
        raise NotImplementedError("output width must be a multiple of 8")

    M = N * Ho * Wo
    Cpad = _round_up(Cout, 128)                 # lane-dense MXU N dim & stores
    itemsize = jnp.dtype(mxu_dtype).itemsize

    # NHWC + materialized spatial padding, cast once to the MXU operand dtype.
    # TODO(synk): keep NHWC end-to-end if downstream allows; the NCHW<->NHWC
    # transposes exist only for PyTorch interface parity.
    x_pad = jnp.transpose(x, (0, 2, 3, 1))
    x_pad = jnp.pad(x_pad, ((0, 0), (pad, pad), (pad, pad), (0, 0))).astype(mxu_dtype)
    # Weight as (KH*KW, Cin, Cpad): each conv tap is a leading index (clean
    # in-kernel w_ref[tap] loads, no sublane-unaligned weight slicing).
    w3 = jnp.transpose(weight, (2, 3, 1, 0)).reshape(KH * KW, Cin, Cout)
    w3 = jnp.pad(w3, ((0, 0), (0, 0), (0, Cpad - Cout))).astype(mxu_dtype)

    x_spec = pl.BlockSpec((1, Hp, Wp, Cin), lambda n: (n, 0, 0, 0))
    w_spec = pl.BlockSpec((KH * KW, Cin, Cpad), lambda n: (0, 0, 0))  # resident
    cparams = pltpu.CompilerParams(
        # Both grids are fully parallel over images -> v7x megacore can split
        # the batch across its 2 TensorCores; no-op on v5e/v6e.
        dimension_semantics=("parallel",),
        # 48 MiB: below v7x's 64 MiB physical VMEM, ample headroom on v5e/v6e.
        vmem_limit_bytes=48 * 1024 * 1024,
    )
    conv_flops = int(2 * M * (Cin * KH * KW) * Cpad)
    in_bytes = int(N * Hp * Wp * Cin * itemsize + KH * KW * Cin * Cpad * itemsize)

    # ---- Pass 1: per-image sublane-partial BN statistics --------------------
    sums, sqs = pl.pallas_call(
        _make_stats_kernel(KH, KW, Ho, Wo),
        out_shape=(jax.ShapeDtypeStruct((N * 8, Cpad), jnp.float32),
                   jax.ShapeDtypeStruct((N * 8, Cpad), jnp.float32)),
        grid_spec=pltpu.PrefetchScalarGridSpec(
            num_scalar_prefetch=0,
            grid=(N,),
            in_specs=[x_spec, w_spec],
            out_specs=[pl.BlockSpec((8, Cpad), lambda n: (n, 0)),
                       pl.BlockSpec((8, Cpad), lambda n: (n, 0))],
        ),
        compiler_params=cparams,
        cost_estimate=pl.CostEstimate(
            flops=conv_flops, transcendentals=0,
            bytes_accessed=in_bytes + 2 * N * 8 * Cpad * 4),
    )(x_pad, w3)

    # ---- Tiny XLA finalize: fold BN into per-channel scale / shift ----------
    mean = jnp.sum(sums, axis=0) / M
    var = jnp.maximum(jnp.sum(sqs, axis=0) / M - mean * mean, 0.0)  # biased (BN train)
    # TODO(synk): E[y^2]-E[y]^2 in f32 can cancel for very large M; switch to a
    # compensated / centered sum if that ever limits accuracy.
    inv_std = lax.rsqrt(var + EPS)
    gamma_p = jnp.pad(gamma.astype(jnp.float32), (0, Cpad - Cout))
    beta_p = jnp.pad(beta.astype(jnp.float32), (0, Cpad - Cout))
    scale_vec = gamma_p * inv_std
    shift_vec = beta_p - mean * scale_vec
    scale = scale_vec.reshape(1, Cpad)
    shift = shift_vec.reshape(1, Cpad)

    # ---- Pass 2: recompute conv, apply BN affine + ReLU ----------------------
    out = pl.pallas_call(
        _make_apply_kernel(KH, KW, Ho, Wo),
        out_shape=jax.ShapeDtypeStruct((N, Ho * Wo, Cpad), jnp.float32),
        grid_spec=pltpu.PrefetchScalarGridSpec(
            num_scalar_prefetch=0,
            grid=(N,),
            in_specs=[x_spec, w_spec,
                      pl.BlockSpec((1, Cpad), lambda n: (0, 0)),
                      pl.BlockSpec((1, Cpad), lambda n: (0, 0))],
            out_specs=pl.BlockSpec((1, Ho * Wo, Cpad), lambda n: (n, 0, 0)),
        ),
        compiler_params=cparams,
        cost_estimate=pl.CostEstimate(
            flops=conv_flops, transcendentals=0,
            bytes_accessed=in_bytes + M * Cpad * 4),
    )(x_pad, w3, scale, shift)

    out = out[:, :, :Cout].reshape(N, Ho, Wo, Cout)
    # TODO(synk): emit bf16 NHWC directly when the consumer allows; this f32
    # NCHW transpose is kept only for PyTorch interface parity.
    return jnp.transpose(out, (0, 3, 1, 2))


def _reference(x, weight, gamma, beta, stride=1):
    """Pure-JAX reference reproducing PyTorch Conv2d + BatchNorm2d(train) + ReLU."""
    pad = math.ceil((weight.shape[2] - stride) / 2)
    y = lax.conv_general_dilated(
        x, weight, window_strides=(stride, stride),
        padding=((pad, pad), (pad, pad)),
        dimension_numbers=("NCHW", "OIHW", "NCHW"),
    )
    mean = jnp.mean(y, axis=(0, 2, 3), keepdims=True)
    var = jnp.mean((y - mean) ** 2, axis=(0, 2, 3), keepdims=True)
    y = (y - mean) * lax.rsqrt(var + EPS)
    y = y * gamma.reshape(1, -1, 1, 1) + beta.reshape(1, -1, 1, 1)
    return jnp.maximum(y, 0.0)


if __name__ == "__main__":
    # ConvNormAct(dim_in=4, dim_out=8, kernel_size=3): no skip, no drop_path.
    N, Cin, H, W = 2, 4, 16, 16
    Cout, KH, KW = 8, 3, 3

    key = jax.random.PRNGKey(0)
    kx, kw_, kg, kb = jax.random.split(key, 4)
    x = jax.random.normal(kx, (N, Cin, H, W), dtype=jnp.float32)
    fan_in = Cin * KH * KW
    weight = jax.random.uniform(
        kw_, (Cout, Cin, KH, KW), minval=-1.0, maxval=1.0, dtype=jnp.float32
    ) / math.sqrt(fan_in)
    gamma = 1.0 + 0.1 * jax.random.normal(kg, (Cout,), dtype=jnp.float32)
    beta = 0.1 * jax.random.normal(kb, (Cout,), dtype=jnp.float32)

    ref = _reference(x, weight, gamma, beta)

    # f32-operand path: tight tolerance check of the full fused pipeline.
    out_f32 = jax.block_until_ready(
        conv_norm_act(x, weight, gamma, beta, mxu_dtype=jnp.float32))
    assert out_f32.shape == (N, Cout, H, W)
    err_f32 = float(jnp.max(jnp.abs(out_f32 - ref)))
    assert jnp.allclose(out_f32, ref, atol=2e-4, rtol=2e-4), err_f32

    # Default bf16-operand path (all generations): bf16 MXU operands, f32
    # accumulation and f32 BN/ReLU epilogue; looser tolerance for the input
    # quantization.
    out_bf16 = jax.block_until_ready(
        conv_norm_act(x, weight, gamma, beta, mxu_dtype=jnp.bfloat16))
    err_bf16 = float(jnp.max(jnp.abs(out_bf16 - ref)))
    assert jnp.allclose(out_bf16, ref, atol=5e-2, rtol=5e-2), err_bf16

    print("KERNEL_OK")
</pallas_src>

<mosaic_0001>
module attributes {stable_mosaic.version = 11 : i64} {
  func.func @kernel(%arg0: i32, %arg1: memref<1x18x18x4xf32, #tpu.memory_space<vmem>>, %arg2: memref<9x4x128xf32, #tpu.memory_space<vmem>>, %arg3: memref<8x128xf32, #tpu.memory_space<vmem>>, %arg4: memref<8x128xf32, #tpu.memory_space<vmem>>) attributes {dimension_semantics = [#tpu.dimension_semantics<parallel>], iteration_bounds = array<i64: 2>, scalar_prefetch = 0 : i64, scratch_operands = 0 : i64, tpu.core_type = #tpu.core_type<tc>, window_params = [{transform_indices = @transform_0, window_bounds = array<i64: 1, 18, 18, 4>}, {pipeline_mode = #tpu.pipeline_mode<synchronous>, transform_indices = @transform_1, window_bounds = array<i64: 9, 4, 128>}, {transform_indices = @transform_2, window_bounds = array<i64: 8, 128>}, {transform_indices = @transform_3, window_bounds = array<i64: 8, 128>}]} {
    %cst = arith.constant 0.000000e+00 : f32
    %0 = vector.broadcast %cst : f32 to vector<256x128xf32>
    %c0 = arith.constant 0 : index
    %c0_0 = arith.constant 0 : index
    %c0_1 = arith.constant 0 : index
    %c0_2 = arith.constant 0 : index
    %1 = vector.load %arg1[%c0, %c0_0, %c0_1, %c0_2] : memref<1x18x18x4xf32, #tpu.memory_space<vmem>>, vector<1x16x16x4xf32>
    %2 = vector.shape_cast %1 : vector<1x16x16x4xf32> to vector<16x16x4xf32>
    %3 = vector.shape_cast %2 : vector<16x16x4xf32> to vector<256x4xf32>
    %c0_3 = arith.constant 0 : index
    %c0_4 = arith.constant 0 : index
    %c0_5 = arith.constant 0 : index
    %4 = vector.load %arg2[%c0_3, %c0_4, %c0_5] : memref<9x4x128xf32, #tpu.memory_space<vmem>>, vector<1x4x128xf32>
    %5 = vector.shape_cast %4 : vector<1x4x128xf32> to vector<4x128xf32>
    %cst_6 = arith.constant dense<0.000000e+00> : vector<256x128xf32>
    %6 = tpu.matmul %3, %5, %cst_6 {dimension_numbers = #tpu.dot_dimension_numbers<[1], [0], [0], [1], [0, 0, 1, 1], [], []>} : vector<256x4xf32>, vector<4x128xf32>, vector<256x128xf32> -> vector<256x128xf32>
    %7 = arith.addf %0, %6 : vector<256x128xf32>
    %c0_7 = arith.constant 0 : index
    %c0_8 = arith.constant 0 : index
    %c1 = arith.constant 1 : index
    %c0_9 = arith.constant 0 : index
    %8 = vector.load %arg1[%c0_7, %c0_8, %c1, %c0_9] : memref<1x18x18x4xf32, #tpu.memory_space<vmem>>, vector<1x16x16x4xf32>
    %9 = vector.shape_cast %8 : vector<1x16x16x4xf32> to vector<16x16x4xf32>
    %10 = vector.shape_cast %9 : vector<16x16x4xf32> to vector<256x4xf32>
    %c1_10 = arith.constant 1 : index
    %c0_11 = arith.constant 0 : index
    %c0_12 = arith.constant 0 : index
    %11 = vector.load %arg2[%c1_10, %c0_11, %c0_12] : memref<9x4x128xf32, #tpu.memory_space<vmem>>, vector<1x4x128xf32>
    %12 = vector.shape_cast %11 : vector<1x4x128xf32> to vector<4x128xf32>
    %cst_13 = arith.constant dense<0.000000e+00> : vector<256x128xf32>
    %13 = tpu.matmul %10, %12, %cst_13 {dimension_numbers = #tpu.dot_dimension_numbers<[1], [0], [0], [1], [0, 0, 1, 1], [], []>} : vector<256x4xf32>, vector<4x128xf32>, vector<256x128xf32> -> vector<256x128xf32>
    %14 = arith.addf %7, %13 : vector<256x128xf32>
    %c0_14 = arith.constant 0 : index
    %c0_15 = arith.constant 0 : index
    %c2 = arith.constant 2 : index
    %c0_16 = arith.constant 0 : index
    %15 = vector.load %arg1[%c0_14, %c0_15, %c2, %c0_16] : memref<1x18x18x4xf32, #tpu.memory_space<vmem>>, vector<1x16x16x4xf32>
    %16 = vector.shape_cast %15 : vector<1x16x16x4xf32> to vector<16x16x4xf32>
    %17 = vector.shape_cast %16 : vector<16x16x4xf32> to vector<256x4xf32>
    %c2_17 = arith.constant 2 : index
    %c0_18 = arith.constant 0 : index
    %c0_19 = arith.constant 0 : index
    %18 = vector.load %arg2[%c2_17, %c0_18, %c0_19] : memref<9x4x128xf32, #tpu.memory_space<vmem>>, vector<1x4x128xf32>
    %19 = vector.shape_cast %18 : vector<1x4x128xf32> to vector<4x128xf32>
    %cst_20 = arith.constant dense<0.000000e+00> : vector<256x128xf32>
    %20 = tpu.matmul %17, %19, %cst_20 {dimension_numbers = #tpu.dot_dimension_numbers<[1], [0], [0], [1], [0, 0, 1, 1], [], []>} : vector<256x4xf32>, vector<4x128xf32>, vector<256x128xf32> -> vector<256x128xf32>
    %21 = arith.addf %14, %20 : vector<256x128xf32>
    %c0_21 = arith.constant 0 : index
    %c1_22 = arith.constant 1 : index
    %c0_23 = arith.constant 0 : index
    %c0_24 = arith.constant 0 : index
    %22 = vector.load %arg1[%c0_21, %c1_22, %c0_23, %c0_24] : memref<1x18x18x4xf32, #tpu.memory_space<vmem>>, vector<1x16x16x4xf32>
    %23 = vector.shape_cast %22 : vector<1x16x16x4xf32> to vector<16x16x4xf32>
    %24 = vector.shape_cast %23 : vector<16x16x4xf32> to vector<256x4xf32>
    %c3 = arith.constant 3 : index
    %c0_25 = arith.constant 0 : index
    %c0_26 = arith.constant 0 : index
    %25 = vector.load %arg2[%c3, %c0_25, %c0_26] : memref<9x4x128xf32, #tpu.memory_space<vmem>>, vector<1x4x128xf32>
    %26 = vector.shape_cast %25 : vector<1x4x128xf32> to vector<4x128xf32>
    %cst_27 = arith.constant dense<0.000000e+00> : vector<256x128xf32>
    %27 = tpu.matmul %24, %26, %cst_27 {dimension_numbers = #tpu.dot_dimension_numbers<[1], [0], [0], [1], [0, 0, 1, 1], [], []>} : vector<256x4xf32>, vector<4x128xf32>, vector<256x128xf32> -> vector<256x128xf32>
    %28 = arith.addf %21, %27 : vector<256x128xf32>
    %c0_28 = arith.constant 0 : index
    %c1_29 = arith.constant 1 : index
    %c1_30 = arith.constant 1 : index
    %c0_31 = arith.constant 0 : index
    %29 = vector.load %arg1[%c0_28, %c1_29, %c1_30, %c0_31] : memref<1x18x18x4xf32, #tpu.memory_space<vmem>>, vector<1x16x16x4xf32>
    %30 = vector.shape_cast %29 : vector<1x16x16x4xf32> to vector<16x16x4xf32>
    %31 = vector.shape_cast %30 : vector<16x16x4xf32> to vector<256x4xf32>
    %c4 = arith.constant 4 : index
    %c0_32 = arith.constant 0 : index
    %c0_33 = arith.constant 0 : index
    %32 = vector.load %arg2[%c4, %c0_32, %c0_33] : memref<9x4x128xf32, #tpu.memory_space<vmem>>, vector<1x4x128xf32>
    %33 = vector.shape_cast %32 : vector<1x4x128xf32> to vector<4x128xf32>
    %cst_34 = arith.constant dense<0.000000e+00> : vector<256x128xf32>
    %34 = tpu.matmul %31, %33, %cst_34 {dimension_numbers = #tpu.dot_dimension_numbers<[1], [0], [0], [1], [0, 0, 1, 1], [], []>} : vector<256x4xf32>, vector<4x128xf32>, vector<256x128xf32> -> vector<256x128xf32>
    %35 = arith.addf %28, %34 : vector<256x128xf32>
    %c0_35 = arith.constant 0 : index
    %c1_36 = arith.constant 1 : index
    %c2_37 = arith.constant 2 : index
    %c0_38 = arith.constant 0 : index
    %36 = vector.load %arg1[%c0_35, %c1_36, %c2_37, %c0_38] : memref<1x18x18x4xf32, #tpu.memory_space<vmem>>, vector<1x16x16x4xf32>
    %37 = vector.shape_cast %36 : vector<1x16x16x4xf32> to vector<16x16x4xf32>
    %38 = vector.shape_cast %37 : vector<16x16x4xf32> to vector<256x4xf32>
    %c5 = arith.constant 5 : index
    %c0_39 = arith.constant 0 : index
    %c0_40 = arith.constant 0 : index
    %39 = vector.load %arg2[%c5, %c0_39, %c0_40] : memref<9x4x128xf32, #tpu.memory_space<vmem>>, vector<1x4x128xf32>
    %40 = vector.shape_cast %39 : vector<1x4x128xf32> to vector<4x128xf32>
    %cst_41 = arith.constant dense<0.000000e+00> : vector<256x128xf32>
    %41 = tpu.matmul %38, %40, %cst_41 {dimension_numbers = #tpu.dot_dimension_numbers<[1], [0], [0], [1], [0, 0, 1, 1], [], []>} : vector<256x4xf32>, vector<4x128xf32>, vector<256x128xf32> -> vector<256x128xf32>
    %42 = arith.addf %35, %41 : vector<256x128xf32>
    %c0_42 = arith.constant 0 : index
    %c2_43 = arith.constant 2 : index
    %c0_44 = arith.constant 0 : index
    %c0_45 = arith.constant 0 : index
    %43 = vector.load %arg1[%c0_42, %c2_43, %c0_44, %c0_45] : memref<1x18x18x4xf32, #tpu.memory_space<vmem>>, vector<1x16x16x4xf32>
    %44 = vector.shape_cast %43 : vector<1x16x16x4xf32> to vector<16x16x4xf32>
    %45 = vector.shape_cast %44 : vector<16x16x4xf32> to vector<256x4xf32>
    %c6 = arith.constant 6 : index
    %c0_46 = arith.constant 0 : index
    %c0_47 = arith.constant 0 : index
    %46 = vector.load %arg2[%c6, %c0_46, %c0_47] : memref<9x4x128xf32, #tpu.memory_space<vmem>>, vector<1x4x128xf32>
    %47 = vector.shape_cast %46 : vector<1x4x128xf32> to vector<4x128xf32>
    %cst_48 = arith.constant dense<0.000000e+00> : vector<256x128xf32>
    %48 = tpu.matmul %45, %47, %cst_48 {dimension_numbers = #tpu.dot_dimension_numbers<[1], [0], [0], [1], [0, 0, 1, 1], [], []>} : vector<256x4xf32>, vector<4x128xf32>, vector<256x128xf32> -> vector<256x128xf32>
    %49 = arith.addf %42, %48 : vector<256x128xf32>
    %c0_49 = arith.constant 0 : index
    %c2_50 = arith.constant 2 : index
    %c1_51 = arith.constant 1 : index
    %c0_52 = arith.constant 0 : index
    %50 = vector.load %arg1[%c0_49, %c2_50, %c1_51, %c0_52] : memref<1x18x18x4xf32, #tpu.memory_space<vmem>>, vector<1x16x16x4xf32>
    %51 = vector.shape_cast %50 : vector<1x16x16x4xf32> to vector<16x16x4xf32>
    %52 = vector.shape_cast %51 : vector<16x16x4xf32> to vector<256x4xf32>
    %c7 = arith.constant 7 : index
    %c0_53 = arith.constant 0 : index
    %c0_54 = arith.constant 0 : index
    %53 = vector.load %arg2[%c7, %c0_53, %c0_54] : memref<9x4x128xf32, #tpu.memory_space<vmem>>, vector<1x4x128xf32>
    %54 = vector.shape_cast %53 : vector<1x4x128xf32> to vector<4x128xf32>
    %cst_55 = arith.constant dense<0.000000e+00> : vector<256x128xf32>
    %55 = tpu.matmul %52, %54, %cst_55 {dimension_numbers = #tpu.dot_dimension_numbers<[1], [0], [0], [1], [0, 0, 1, 1], [], []>} : vector<256x4xf32>, vector<4x128xf32>, vector<256x128xf32> -> vector<256x128xf32>
    %56 = arith.addf %49, %55 : vector<256x128xf32>
    %c0_56 = arith.constant 0 : index
    %c2_57 = arith.constant 2 : index
    %c2_58 = arith.constant 2 : index
    %c0_59 = arith.constant 0 : index
    %57 = vector.load %arg1[%c0_56, %c2_57, %c2_58, %c0_59] : memref<1x18x18x4xf32, #tpu.memory_space<vmem>>, vector<1x16x16x4xf32>
    %58 = vector.shape_cast %57 : vector<1x16x16x4xf32> to vector<16x16x4xf32>
    %59 = vector.shape_cast %58 : vector<16x16x4xf32> to vector<256x4xf32>
    %c8 = arith.constant 8 : index
    %c0_60 = arith.constant 0 : index
    %c0_61 = arith.constant 0 : index
    %60 = vector.load %arg2[%c8, %c0_60, %c0_61] : memref<9x4x128xf32, #tpu.memory_space<vmem>>, vector<1x4x128xf32>
    %61 = vector.shape_cast %60 : vector<1x4x128xf32> to vector<4x128xf32>
    %cst_62 = arith.constant dense<0.000000e+00> : vector<256x128xf32>
    %62 = tpu.matmul %59, %61, %cst_62 {dimension_numbers = #tpu.dot_dimension_numbers<[1], [0], [0], [1], [0, 0, 1, 1], [], []>} : vector<256x4xf32>, vector<4x128xf32>, vector<256x128xf32> -> vector<256x128xf32>
    %63 = arith.addf %56, %62 : vector<256x128xf32>
    %64 = vector.shape_cast %63 : vector<256x128xf32> to vector<32x8x128xf32>
    %cst_63 = arith.constant dense<0.000000e+00> : vector<8x128xf32>
    %65 = vector.multi_reduction <add>, %64, %cst_63 [0] : vector<32x8x128xf32> to vector<8x128xf32>
    %c0_64 = arith.constant 0 : index
    %c0_65 = arith.constant 0 : index
    %66 = vector.load %arg3[%c0_64, %c0_65] : memref<8x128xf32, #tpu.memory_space<vmem>>, vector<8x128xf32>
    tpu.vector_store %arg3[%c0_64, %c0_65], %65 {strides = array<i32>} : memref<8x128xf32, #tpu.memory_space<vmem>>, vector<8x128xf32>,
    %67 = arith.mulf %64, %64 : vector<32x8x128xf32>
    %cst_66 = arith.constant dense<0.000000e+00> : vector<8x128xf32>
    %68 = vector.multi_reduction <add>, %67, %cst_66 [0] : vector<32x8x128xf32> to vector<8x128xf32>
    %c0_67 = arith.constant 0 : index
    %c0_68 = arith.constant 0 : index
    %69 = vector.load %arg4[%c0_67, %c0_68] : memref<8x128xf32, #tpu.memory_space<vmem>>, vector<8x128xf32>
    tpu.vector_store %arg4[%c0_67, %c0_68], %68 {strides = array<i32>} : memref<8x128xf32, #tpu.memory_space<vmem>>, vector<8x128xf32>,
    return
  }
  func.func @transform_0(%arg0: i32) -> (i32, i32, i32, i32) {
    %c0_i32 = arith.constant 0 : i32
    %c0_i32_0 = arith.constant 0 : i32
    %c0_i32_1 = arith.constant 0 : i32
    %c0_i32_2 = arith.constant 0 : i32
    return %arg0, %c0_i32, %c0_i32_0, %c0_i32_1 : i32, i32, i32, i32
  }
  func.func @transform_1(%arg0: i32) -> (i32, i32, i32) {
    %c0_i32 = arith.constant 0 : i32
    %c0_i32_0 = arith.constant 0 : i32
    %c0_i32_1 = arith.constant 0 : i32
    %c0_i32_2 = arith.constant 0 : i32
    return %c0_i32, %c0_i32_0, %c0_i32_1 : i32, i32, i32
  }
  func.func @transform_2(%arg0: i32) -> (i32, i32) {
    %c0_i32 = arith.constant 0 : i32
    %c0_i32_0 = arith.constant 0 : i32
    return %arg0, %c0_i32 : i32, i32
  }
  func.func @transform_3(%arg0: i32) -> (i32, i32) {
    %c0_i32 = arith.constant 0 : i32
    %c0_i32_0 = arith.constant 0 : i32
    return %arg0, %c0_i32 : i32, i32
  }
}

module attributes {stable_mosaic.version = 11 : i64} {
  func.func @kernel(%arg0: i32, %arg1: memref<1x18x18x4xf32, #tpu.memory_space<vmem>>, %arg2: memref<9x4x128xf32, #tpu.memory_space<vmem>>, %arg3: memref<1x128xf32, #tpu.memory_space<vmem>>, %arg4: memref<1x128xf32, #tpu.memory_space<vmem>>, %arg5: memref<1x256x128xf32, #tpu.memory_space<vmem>>) attributes {dimension_semantics = [#tpu.dimension_semantics<parallel>], iteration_bounds = array<i64: 2>, scalar_prefetch = 0 : i64, scratch_operands = 0 : i64, tpu.core_type = #tpu.core_type<tc>, window_params = [{transform_indices = @transform_0, window_bounds = array<i64: 1, 18, 18, 4>}, {pipeline_mode = #tpu.pipeline_mode<synchronous>, transform_indices = @transform_1, window_bounds = array<i64: 9, 4, 128>}, {pipeline_mode = #tpu.pipeline_mode<synchronous>, transform_indices = @transform_2, window_bounds = array<i64: 1, 128>}, {pipeline_mode = #tpu.pipeline_mode<synchronous>, transform_indices = @transform_3, window_bounds = array<i64: 1, 128>}, {transform_indices = @transform_4, window_bounds = array<i64: 1, 256, 128>}]} {
    %cst = arith.constant 0.000000e+00 : f32
    %0 = vector.broadcast %cst : f32 to vector<256x128xf32>
    %c0 = arith.constant 0 : index
    %c0_0 = arith.constant 0 : index
    %c0_1 = arith.constant 0 : index
    %c0_2 = arith.constant 0 : index
    %1 = vector.load %arg1[%c0, %c0_0, %c0_1, %c0_2] : memref<1x18x18x4xf32, #tpu.memory_space<vmem>>, vector<1x16x16x4xf32>
    %2 = vector.shape_cast %1 : vector<1x16x16x4xf32> to vector<16x16x4xf32>
    %3 = vector.shape_cast %2 : vector<16x16x4xf32> to vector<256x4xf32>
    %c0_3 = arith.constant 0 : index
    %c0_4 = arith.constant 0 : index
    %c0_5 = arith.constant 0 : index
    %4 = vector.load %arg2[%c0_3, %c0_4, %c0_5] : memref<9x4x128xf32, #tpu.memory_space<vmem>>, vector<1x4x128xf32>
    %5 = vector.shape_cast %4 : vector<1x4x128xf32> to vector<4x128xf32>
    %cst_6 = arith.constant dense<0.000000e+00> : vector<256x128xf32>
    %6 = tpu.matmul %3, %5, %cst_6 {dimension_numbers = #tpu.dot_dimension_numbers<[1], [0], [0], [1], [0, 0, 1, 1], [], []>} : vector<256x4xf32>, vector<4x128xf32>, vector<256x128xf32> -> vector<256x128xf32>
    %7 = arith.addf %0, %6 : vector<256x128xf32>
    %c0_7 = arith.constant 0 : index
    %c0_8 = arith.constant 0 : index
    %c1 = arith.constant 1 : index
    %c0_9 = arith.constant 0 : index
    %8 = vector.load %arg1[%c0_7, %c0_8, %c1, %c0_9] : memref<1x18x18x4xf32, #tpu.memory_space<vmem>>, vector<1x16x16x4xf32>
    %9 = vector.shape_cast %8 : vector<1x16x16x4xf32> to vector<16x16x4xf32>
    %10 = vector.shape_cast %9 : vector<16x16x4xf32> to vector<256x4xf32>
    %c1_10 = arith.constant 1 : index
    %c0_11 = arith.constant 0 : index
    %c0_12 = arith.constant 0 : index
    %11 = vector.load %arg2[%c1_10, %c0_11, %c0_12] : memref<9x4x128xf32, #tpu.memory_space<vmem>>, vector<1x4x128xf32>
    %12 = vector.shape_cast %11 : vector<1x4x128xf32> to vector<4x128xf32>
    %cst_13 = arith.constant dense<0.000000e+00> : vector<256x128xf32>
    %13 = tpu.matmul %10, %12, %cst_13 {dimension_numbers = #tpu.dot_dimension_numbers<[1], [0], [0], [1], [0, 0, 1, 1], [], []>} : vector<256x4xf32>, vector<4x128xf32>, vector<256x128xf32> -> vector<256x128xf32>
    %14 = arith.addf %7, %13 : vector<256x128xf32>
    %c0_14 = arith.constant 0 : index
    %c0_15 = arith.constant 0 : index
    %c2 = arith.constant 2 : index
    %c0_16 = arith.constant 0 : index
    %15 = vector.load %arg1[%c0_14, %c0_15, %c2, %c0_16] : memref<1x18x18x4xf32, #tpu.memory_space<vmem>>, vector<1x16x16x4xf32>
    %16 = vector.shape_cast %15 : vector<1x16x16x4xf32> to vector<16x16x4xf32>
    %17 = vector.shape_cast %16 : vector<16x16x4xf32> to vector<256x4xf32>
    %c2_17 = arith.constant 2 : index
    %c0_18 = arith.constant 0 : index
    %c0_19 = arith.constant 0 : index
    %18 = vector.load %arg2[%c2_17, %c0_18, %c0_19] : memref<9x4x128xf32, #tpu.memory_space<vmem>>, vector<1x4x128xf32>
    %19 = vector.shape_cast %18 : vector<1x4x128xf32> to vector<4x128xf32>
    %cst_20 = arith.constant dense<0.000000e+00> : vector<256x128xf32>
    %20 = tpu.matmul %17, %19, %cst_20 {dimension_numbers = #tpu.dot_dimension_numbers<[1], [0], [0], [1], [0, 0, 1, 1], [], []>} : vector<256x4xf32>, vector<4x128xf32>, vector<256x128xf32> -> vector<256x128xf32>
    %21 = arith.addf %14, %20 : vector<256x128xf32>
    %c0_21 = arith.constant 0 : index
    %c1_22 = arith.constant 1 : index
    %c0_23 = arith.constant 0 : index
    %c0_24 = arith.constant 0 : index
    %22 = vector.load %arg1[%c0_21, %c1_22, %c0_23, %c0_24] : memref<1x18x18x4xf32, #tpu.memory_space<vmem>>, vector<1x16x16x4xf32>
    %23 = vector.shape_cast %22 : vector<1x16x16x4xf32> to vector<16x16x4xf32>
    %24 = vector.shape_cast %23 : vector<16x16x4xf32> to vector<256x4xf32>
    %c3 = arith.constant 3 : index
    %c0_25 = arith.constant 0 : index
    %c0_26 = arith.constant 0 : index
    %25 = vector.load %arg2[%c3, %c0_25, %c0_26] : memref<9x4x128xf32, #tpu.memory_space<vmem>>, vector<1x4x128xf32>
    %26 = vector.shape_cast %25 : vector<1x4x128xf32> to vector<4x128xf32>
    %cst_27 = arith.constant dense<0.000000e+00> : vector<256x128xf32>
    %27 = tpu.matmul %24, %26, %cst_27 {dimension_numbers = #tpu.dot_dimension_numbers<[1], [0], [0], [1], [0, 0, 1, 1], [], []>} : vector<256x4xf32>, vector<4x128xf32>, vector<256x128xf32> -> vector<256x128xf32>
    %28 = arith.addf %21, %27 : vector<256x128xf32>
    %c0_28 = arith.constant 0 : index
    %c1_29 = arith.constant 1 : index
    %c1_30 = arith.constant 1 : index
    %c0_31 = arith.constant 0 : index
    %29 = vector.load %arg1[%c0_28, %c1_29, %c1_30, %c0_31] : memref<1x18x18x4xf32, #tpu.memory_space<vmem>>, vector<1x16x16x4xf32>
    %30 = vector.shape_cast %29 : vector<1x16x16x4xf32> to vector<16x16x4xf32>
    %31 = vector.shape_cast %30 : vector<16x16x4xf32> to vector<256x4xf32>
    %c4 = arith.constant 4 : index
    %c0_32 = arith.constant 0 : index
    %c0_33 = arith.constant 0 : index
    %32 = vector.load %arg2[%c4, %c0_32, %c0_33] : memref<9x4x128xf32, #tpu.memory_space<vmem>>, vector<1x4x128xf32>
    %33 = vector.shape_cast %32 : vector<1x4x128xf32> to vector<4x128xf32>
    %cst_34 = arith.constant dense<0.000000e+00> : vector<256x128xf32>
    %34 = tpu.matmul %31, %33, %cst_34 {dimension_numbers = #tpu.dot_dimension_numbers<[1], [0], [0], [1], [0, 0, 1, 1], [], []>} : vector<256x4xf32>, vector<4x128xf32>, vector<256x128xf32> -> vector<256x128xf32>
    %35 = arith.addf %28, %34 : vector<256x128xf32>
    %c0_35 = arith.constant 0 : index
    %c1_36 = arith.constant 1 : index
    %c2_37 = arith.constant 2 : index
    %c0_38 = arith.constant 0 : index
    %36 = vector.load %arg1[%c0_35, %c1_36, %c2_37, %c0_38] : memref<1x18x18x4xf32, #tpu.memory_space<vmem>>, vector<1x16x16x4xf32>
    %37 = vector.shape_cast %36 : vector<1x16x16x4xf32> to vector<16x16x4xf32>
    %38 = vector.shape_cast %37 : vector<16x16x4xf32> to vector<256x4xf32>
    %c5 = arith.constant 5 : index
    %c0_39 = arith.constant 0 : index
    %c0_40 = arith.constant 0 : index
    %39 = vector.load %arg2[%c5, %c0_39, %c0_40] : memref<9x4x128xf32, #tpu.memory_space<vmem>>, vector<1x4x128xf32>
    %40 = vector.shape_cast %39 : vector<1x4x128xf32> to vector<4x128xf32>
    %cst_41 = arith.constant dense<0.000000e+00> : vector<256x128xf32>
    %41 = tpu.matmul %38, %40, %cst_41 {dimension_numbers = #tpu.dot_dimension_numbers<[1], [0], [0], [1], [0, 0, 1, 1], [], []>} : vector<256x4xf32>, vector<4x128xf32>, vector<256x128xf32> -> vector<256x128xf32>
    %42 = arith.addf %35, %41 : vector<256x128xf32>
    %c0_42 = arith.constant 0 : index
    %c2_43 = arith.constant 2 : index
    %c0_44 = arith.constant 0 : index
    %c0_45 = arith.constant 0 : index
    %43 = vector.load %arg1[%c0_42, %c2_43, %c0_44, %c0_45] : memref<1x18x18x4xf32, #tpu.memory_space<vmem>>, vector<1x16x16x4xf32>
    %44 = vector.shape_cast %43 : vector<1x16x16x4xf32> to vector<16x16x4xf32>
    %45 = vector.shape_cast %44 : vector<16x16x4xf32> to vector<256x4xf32>
    %c6 = arith.constant 6 : index
    %c0_46 = arith.constant 0 : index
    %c0_47 = arith.constant 0 : index
    %46 = vector.load %arg2[%c6, %c0_46, %c0_47] : memref<9x4x128xf32, #tpu.memory_space<vmem>>, vector<1x4x128xf32>
    %47 = vector.shape_cast %46 : vector<1x4x128xf32> to vector<4x128xf32>
    %cst_48 = arith.constant dense<0.000000e+00> : vector<256x128xf32>
    %48 = tpu.matmul %45, %47, %cst_48 {dimension_numbers = #tpu.dot_dimension_numbers<[1], [0], [0], [1], [0, 0, 1, 1], [], []>} : vector<256x4xf32>, vector<4x128xf32>, vector<256x128xf32> -> vector<256x128xf32>
    %49 = arith.addf %42, %48 : vector<256x128xf32>
    %c0_49 = arith.constant 0 : index
    %c2_50 = arith.constant 2 : index
    %c1_51 = arith.constant 1 : index
    %c0_52 = arith.constant 0 : index
    %50 = vector.load %arg1[%c0_49, %c2_50, %c1_51, %c0_52] : memref<1x18x18x4xf32, #tpu.memory_space<vmem>>, vector<1x16x16x4xf32>
    %51 = vector.shape_cast %50 : vector<1x16x16x4xf32> to vector<16x16x4xf32>
    %52 = vector.shape_cast %51 : vector<16x16x4xf32> to vector<256x4xf32>
    %c7 = arith.constant 7 : index
    %c0_53 = arith.constant 0 : index
    %c0_54 = arith.constant 0 : index
    %53 = vector.load %arg2[%c7, %c0_53, %c0_54] : memref<9x4x128xf32, #tpu.memory_space<vmem>>, vector<1x4x128xf32>
    %54 = vector.shape_cast %53 : vector<1x4x128xf32> to vector<4x128xf32>
    %cst_55 = arith.constant dense<0.000000e+00> : vector<256x128xf32>
    %55 = tpu.matmul %52, %54, %cst_55 {dimension_numbers = #tpu.dot_dimension_numbers<[1], [0], [0], [1], [0, 0, 1, 1], [], []>} : vector<256x4xf32>, vector<4x128xf32>, vector<256x128xf32> -> vector<256x128xf32>
    %56 = arith.addf %49, %55 : vector<256x128xf32>
    %c0_56 = arith.constant 0 : index
    %c2_57 = arith.constant 2 : index
    %c2_58 = arith.constant 2 : index
    %c0_59 = arith.constant 0 : index
    %57 = vector.load %arg1[%c0_56, %c2_57, %c2_58, %c0_59] : memref<1x18x18x4xf32, #tpu.memory_space<vmem>>, vector<1x16x16x4xf32>
    %58 = vector.shape_cast %57 : vector<1x16x16x4xf32> to vector<16x16x4xf32>
    %59 = vector.shape_cast %58 : vector<16x16x4xf32> to vector<256x4xf32>
    %c8 = arith.constant 8 : index
    %c0_60 = arith.constant 0 : index
    %c0_61 = arith.constant 0 : index
    %60 = vector.load %arg2[%c8, %c0_60, %c0_61] : memref<9x4x128xf32, #tpu.memory_space<vmem>>, vector<1x4x128xf32>
    %61 = vector.shape_cast %60 : vector<1x4x128xf32> to vector<4x128xf32>
    %cst_62 = arith.constant dense<0.000000e+00> : vector<256x128xf32>
    %62 = tpu.matmul %59, %61, %cst_62 {dimension_numbers = #tpu.dot_dimension_numbers<[1], [0], [0], [1], [0, 0, 1, 1], [], []>} : vector<256x4xf32>, vector<4x128xf32>, vector<256x128xf32> -> vector<256x128xf32>
    %63 = arith.addf %56, %62 : vector<256x128xf32>
    %c0_63 = arith.constant 0 : index
    %c0_64 = arith.constant 0 : index
    %64 = vector.load %arg3[%c0_63, %c0_64] : memref<1x128xf32, #tpu.memory_space<vmem>>, vector<1x128xf32>
    %65 = vector.broadcast %64 : vector<1x128xf32> to vector<256x128xf32>
    %66 = arith.mulf %63, %65 : vector<256x128xf32>
    %c0_65 = arith.constant 0 : index
    %c0_66 = arith.constant 0 : index
    %67 = vector.load %arg4[%c0_65, %c0_66] : memref<1x128xf32, #tpu.memory_space<vmem>>, vector<1x128xf32>
    %68 = vector.broadcast %67 : vector<1x128xf32> to vector<256x128xf32>
    %69 = arith.addf %66, %68 : vector<256x128xf32>
    %cst_67 = arith.constant 0.000000e+00 : f32
    %70 = vector.broadcast %cst_67 : f32 to vector<256x128xf32>
    %71 = arith.maximumf %69, %70 : vector<256x128xf32>
    %c0_68 = arith.constant 0 : index
    %c0_69 = arith.constant 0 : index
    %c0_70 = arith.constant 0 : index
    %72 = vector.load %arg5[%c0_68, %c0_69, %c0_70] : memref<1x256x128xf32, #tpu.memory_space<vmem>>, vector<1x256x128xf32>
    %73 = vector.shape_cast %72 : vector<1x256x128xf32> to vector<256x128xf32>
    %74 = vector.shape_cast %71 : vector<256x128xf32> to vector<1x256x128xf32>
    tpu.vector_store %arg5[%c0_68, %c0_69, %c0_70], %74 {strides = array<i32>} : memref<1x256x128xf32, #tpu.memory_space<vmem>>, vector<1x256x128xf32>,
    return
  }
  func.func @transform_0(%arg0: i32) -> (i32, i32, i32, i32) {
    %c0_i32 = arith.constant 0 : i32
    %c0_i32_0 = arith.constant 0 : i32
    %c0_i32_1 = arith.constant 0 : i32
    %c0_i32_2 = arith.constant 0 : i32
    return %arg0, %c0_i32, %c0_i32_0, %c0_i32_1 : i32, i32, i32, i32
  }
  func.func @transform_1(%arg0: i32) -> (i32, i32, i32) {
    %c0_i32 = arith.constant 0 : i32
    %c0_i32_0 = arith.constant 0 : i32
    %c0_i32_1 = arith.constant 0 : i32
    %c0_i32_2 = arith.constant 0 : i32
    return %c0_i32, %c0_i32_0, %c0_i32_1 : i32, i32, i32
  }
  func.func @transform_2(%arg0: i32) -> (i32, i32) {
    %c0_i32 = arith.constant 0 : i32
    %c0_i32_0 = arith.constant 0 : i32
    %c0_i32_1 = arith.constant 0 : i32
    return %c0_i32, %c0_i32_0 : i32, i32
  }
  func.func @transform_3(%arg0: i32) -> (i32, i32) {
    %c0_i32 = arith.constant 0 : i32
    %c0_i32_0 = arith.constant 0 : i32
    %c0_i32_1 = arith.constant 0 : i32
    return %c0_i32, %c0_i32_0 : i32, i32
  }
  func.func @transform_4(%arg0: i32) -> (i32, i32, i32) {
    %c0_i32 = arith.constant 0 : i32
    %c0_i32_0 = arith.constant 0 : i32
    %c0_i32_1 = arith.constant 0 : i32
    return %arg0, %c0_i32, %c0_i32_0 : i32, i32, i32
  }
}

</mosaic_0001>

<bundles_post_ra>
// kernel: conv_norm_act.2
= control target key start
LH: loop header
LB: loop body
LE: loop exit
PB: predicated region body
PF: predicated region fallthrough
CT: control target
= control target key end

     0   :  { %s5358_s12 = smov 0   ;;  %s6315_s0 = inlined_call_operand.vmem [shape: f32[2,18,18,4], index: 0, kind: input, shape index: {}]   ;;  %s6316_s1 = inlined_call_operand.vmem [shape: f32[9,4,128], index: 1, kind: input, shape index: {}]   ;;  %s6317_s2 = inlined_call_operand.vmem [shape: f32[16,128], index: 2, kind: output, shape index: {0}]   ;;  %s6318_s3 = inlined_call_operand.vmem [shape: f32[16,128], index: 3, kind: output, shape index: {1}]  }
   0x1 LB: > { %s3809_s13 = sadd.s32 4294967295, %s5336_s12   ;;  %p3813_p0 = scmp.ge.s32.totalorder %s5336_s12, 1  ;;  %s5336_s12 = sphi %s5358_s12, %s14_s12  }
   0x2   : > { %p140_p1 = scmp.lt.s32.totalorder %s5336_s12, 3 }
   0x4   : > { %p141_p2 = pnand %p3813_p0, %p140_p1 }
   0x6   : > { %144 = sbr.rel (%p141_p2) target bundleno = 527 (0x20f), region = 28 }
   0xd   : > { %v3817_v0 = vld [vmem:[%s6316_s1 + $0x4] sm:$0xf]  ;;  %vm344_vm0 = vcmask 1043456   ;;  %v5372_v1 = vld [vmem:[%s6316_s1 + $0x10] sm:$0xf]  ;;  %p167_p3 = scmp.lt.s32.totalorder %s3809_s13, 1 }
   0xe   : > { %4613 = vmatprep.subr.msk.mxu1 %vm344_vm0, %v3817_v0  ;;  %4813 = vmatprep.subr.msk.mxu0 %vm344_vm0, %v5372_v1  ;;  %v212_v2 = vld [vmem:[%s6316_s1] sm:$0xf]  ;;  %v4082_v3 = vld [vmem:[%s6316_s1 + $0x14] sm:$0xf]  ;;  %vm247_vm1 = vcmask 31744  }
   0xf   : > { %4614 = vmatpush3.msk.msra.mxu1 %vm344_vm0, %v3817_v0  ;;  %4814 = vmatpush3.msk.msra.mxu0 %vm344_vm0, %v5372_v1  ;;  %s6429_s13 = smov (!%p167_p3, %s3809_s13), 1  ;;  %v4148_v9 = vld [vmem:[%s6316_s1 + $0x18] sm:$0xf]  ;;  %v5413_v10 = vld [vmem:[%s6316_s1 + $0x8] sm:$0xf] }
  0x10   : > { %4663 = vmatprep.subr.msk.mxu1 %vm344_vm0, %v212_v2  ;;  %4863 = vmatprep.subr.msk.mxu0 %vm344_vm0, %v4082_v3  ;;  %s5321_s22 = smul.u32 432, %s6429_s13  ;;  %v5532_v28 = vld [vmem:[%s6316_s1 + $0x1c] sm:$0xf]  ;;  %v5695_v61 = vld [vmem:[%s6316_s1 + $0xc] sm:$0xf]  ;;  %s3815_s9 = sshll.u32 %s6429_s13, 3 }
  0x11   : > { %s175_s14 = scalar_lea.vmem %s6317_s2, %s3815_s9  ;;  %s179_s17 = scalar_lea.vmem %s6318_s3, %s3815_s9 }
  0x12   : > { %s5394_s25 = scalar_lea.vmem %s6315_s0, %s5321_s22 }
  0x13   : > { %v213_v4 = vld [vmem:[%s5394_s25 + $0x1] sm:$0xff]  ;;  %v3984_v5 = vld [vmem:[%s5394_s25 + $0x19] sm:$0xff]  ;;  %v214_v6 = vld [vmem:[%s5394_s25 + $0x9] sm:$0xff] }
  0x14   : > { %4615 = vmatprep.mubr.msk.f32.mxu1 %vm247_vm1, %v213_v4  ;;  %4815 = vmatprep.mubr.msk.f32.mxu0 %vm247_vm1, %v3984_v5  ;;  %v3985_v7 = vld [vmem:[%s5394_s25 + $0x21] sm:$0xff]  ;;  %v5403_v8 = vld [vmem:[%s5394_s25 + $0x31] sm:$0xff]  ;;  %v5418_v11 = vld [vmem:[%s5394_s25 + $0x39] sm:$0xff] }
  0x15   : > { %4616 = vmatmul.mubr.msk.f32.vlgmr.msra.gmra.mrb[0].mxu1 %vm247_vm1, %v214_v6  ;;  %4816 = vmatmul.mubr.msk.f32.vlgmr.msra.gmra.mrb[0].mxu0 %vm247_vm1, %v3985_v7  ;;  %v5424_v12 = vld [vmem:[%s5394_s25 + $0x49] sm:$0xff]  ;;  %v5437_v13 = vld [vmem:[%s5394_s25 + $0x51] sm:$0xff]  ;;  %v5440_v14 = vld [vmem:[%s5394_s25 + $0x61] sm:$0xff] }
  0x16   : > { %4664 = vmatpush3.msk.msra.mxu1 %vm344_vm0, %v212_v2  ;;  %4864 = vmatpush3.msk.msra.mxu0 %vm344_vm0, %v4082_v3  ;;  %v5451_v15 = vld [vmem:[%s5394_s25 + $0x69] sm:$0xff]  ;;  %v5454_v16 = vld [vmem:[%s5394_s25 + $0x79] sm:$0xff]  ;;  %v5465_v17 = vld [vmem:[%s5394_s25 + $0x81] sm:$0xff] }
  0x17   : > { %4618 = vmatprep.mubr.msk.f32.mxu1 %vm247_vm1, %v3984_v5  ;;  %4818 = vmatprep.mubr.msk.f32.mxu0 %vm247_vm1, %v5403_v8  ;;  %v5468_v18 = vld [vmem:[%s5394_s25 + $0x91] sm:$0xff]  ;;  %v5479_v19 = vld [vmem:[%s5394_s25 + $0x99] sm:$0xff]  ;;  %v5482_v20 = vld [vmem:[%s5394_s25 + $0xa9] sm:$0xff] }
  0x18   : > { %4913 = vmatprep.subr.msk.mxu0 %vm344_vm0, %v4148_v9  ;;  %4713 = vmatprep.subr.msk.mxu1 %vm344_vm0, %v5413_v10  ;;  %v5493_v21 = vld [vmem:[%s5394_s25 + $0xb1] sm:$0xff]  ;;  %v5496_v22 = vld [vmem:[%s5394_s25 + $0xc1] sm:$0xff]  ;;  %v5507_v23 = vld [vmem:[%s5394_s25 + $0xc9] sm:$0xff] }
  0x19   : > { %4619 = vmatmul.mubr.msk.f32.gmra.mrb[2].mxu1 %vm247_vm1, %v3985_v7  ;;  %4819 = vmatmul.mubr.msk.f32.gmra.mrb[2].mxu0 %vm247_vm1, %v5418_v11  ;;  %v5510_v24 = vld [vmem:[%s5394_s25 + $0x1a] sm:$0xff]  ;;  %v5521_v25 = vld [vmem:[%s5394_s25 + $0x22] sm:$0xff]  ;;  %v5527_v27 = vld [vmem:[%s5394_s25 + $0x32] sm:$0xff] }
  0x1a   : > { %4621 = vmatprep.mubr.msk.f32.mxu1 %vm247_vm1, %v5403_v8  ;;  %4821 = vmatprep.mubr.msk.f32.mxu0 %vm247_vm1, %v5424_v12  ;;  %v5524_v26 = vld [vmem:[%s5394_s25 + $0xd9] sm:$0xff]  ;;  %v5542_v29 = vld [vmem:[%s5394_s25 + $0xe1] sm:$0xff]  ;;  %v5550_v31 = vld [vmem:[%s5394_s25 + $0xf1] sm:$0xff] }
  0x1b   : > { %6364 = vst [vmem:[#allocation2_spill] sm:$0xff] %v5542_v29  ;;  %v5545_v30 = vld [vmem:[%s5394_s25 + $0x3a] sm:$0xff]  ;;  %6365 = vst [vmem:[#allocation3_spill] sm:$0xff] %v5550_v31  ;;  %v5553_v32 = vld [vmem:[%s5394_s25 + $0x4a] sm:$0xff] }
  0x1c   : > { %v5566_v33 = vld [vmem:[%s5394_s25 + $0xf9] sm:$0xff]  ;;  %v5572_v35 = vld [vmem:[%s5394_s25 + $0x109] sm:$0xff]  ;;  %v5586_v37 = vld [vmem:[%s5394_s25 + $0x111] sm:$0xff] }
  0x1d   : > { %4622 = vmatmul.mubr.msk.f32.gmra.mrb[4].mxu1 %vm247_vm1, %v5418_v11  ;;  %4822 = vmatmul.mubr.msk.f32.gmra.mrb[4].mxu0 %vm247_vm1, %v5437_v13  ;;  %6366 = vst [vmem:[#allocation4_spill] sm:$0xff] %v5566_v33  ;;  %v5569_v34 = vld [vmem:[%s5394_s25 + $0x52] sm:$0xff]  ;;  %6367 = vst [vmem:[#allocation5_spill] sm:$0xff] %v5572_v35  ;;  %v5575_v36 = vld [vmem:[%s5394_s25 + $0x62] sm:$0xff] }
  0x1e   : > { %4624 = vmatprep.mubr.msk.f32.mxu1 %vm247_vm1, %v5424_v12  ;;  %4824 = vmatprep.mubr.msk.f32.mxu0 %vm247_vm1, %v5440_v14  ;;  %6368 = vst [vmem:[#allocation6_spill] sm:$0xff] %v5586_v37  ;;  %v5589_v38 = vld [vmem:[%s5394_s25 + $0x6a] sm:$0xff]  ;;  %v5592_v39 = vld [vmem:[%s5394_s25 + $0x121] sm:$0xff]  ;;  %v5612_v43 = vld [vmem:[%s5394_s25 + $0x139] sm:$0xff] }
  0x1f   : > { %6369 = vst [vmem:[#allocation7_spill] sm:$0xff] %v5592_v39  ;;  %v5595_v40 = vld [vmem:[%s5394_s25 + $0x7a] sm:$0xff]  ;;  %v5606_v41 = vld [vmem:[%s5394_s25 + $0x129] sm:$0xff]  ;;  %6371 = vst [vmem:[#allocation9_spill] sm:$0xff] %v5612_v43 }
  0x20   : > { %6370 = vst [vmem:[#allocation8_spill] sm:$0xff] %v5606_v41  ;;  %v5609_v42 = vld [vmem:[%s5394_s25 + $0x82] sm:$0xff]  ;;  %v5615_v44 = vld [vmem:[%s5394_s25 + $0x92] sm:$0xff]  ;;  %v5629_v46 = vld [vmem:[%s5394_s25 + $0x9a] sm:$0xff] }
  0x21   : > { %4625 = vmatmul.mubr.msk.f32.gmra.mrb[6].mxu1 %vm247_vm1, %v5437_v13  ;;  %4825 = vmatmul.mubr.msk.f32.gmra.mrb[6].mxu0 %vm247_vm1, %v5451_v15  ;;  %v5626_v45 = vld [vmem:[%s5394_s25 + $0x141] sm:$0xff]  ;;  %v5632_v47 = vld [vmem:[%s5394_s25 + $0x151] sm:$0xff]  ;;  %v5646_v49 = vld [vmem:[%s5394_s25 + $0x159] sm:$0xff] }
  0x22   : > { %4627 = vmatprep.mubr.msk.f32.mxu1 %vm247_vm1, %v5440_v14  ;;  %4827 = vmatprep.mubr.msk.f32.mxu0 %vm247_vm1, %v5454_v16  ;;  %6372 = vst [vmem:[#allocation10_spill] sm:$0xff] %v5626_v45  ;;  %6373 = vst [vmem:[#allocation11_spill] sm:$0xff] %v5632_v47  ;;  %v5635_v48 = vld [vmem:[%s5394_s25 + $0xaa] sm:$0xff]  ;;  %v5649_v50 = vld [vmem:[%s5394_s25 + $0xb2] sm:$0xff] }
  0x23   : > { %6374 = vst [vmem:[#allocation12_spill] sm:$0xff] %v5646_v49  ;;  %v5652_v51 = vld [vmem:[%s5394_s25 + $0x169] sm:$0xff]  ;;  %v5666_v53 = vld [vmem:[%s5394_s25 + $0x171] sm:$0xff]  ;;  %v180_v55 = vld [vmem:[%s5394_s25] sm:$0xff] }
  0x24   : > { %6375 = vst [vmem:[#allocation13_spill] sm:$0xff] %v5652_v51  ;;  %v5655_v52 = vld [vmem:[%s5394_s25 + $0xc2] sm:$0xff]  ;;  %6376 = vst [vmem:[#allocation14_spill] sm:$0xff] %v5666_v53  ;;  %v5669_v54 = vld [vmem:[%s5394_s25 + $0xca] sm:$0xff] }
  0x25   : > { %4628 = vmatmul.mubr.msk.f32.gmra.mrb[8].mxu1 %vm247_vm1, %v5451_v15  ;;  %4828 = vmatmul.mubr.msk.f32.gmra.mrb[8].mxu0 %vm247_vm1, %v5465_v17  ;;  %v5673_v56 = vld [vmem:[%s5394_s25 + $0xda] sm:$0xff]  ;;  %v181_v57 = vld [vmem:[%s5394_s25 + $0x8] sm:$0xff]  ;;  %v5690_v60 = vld [vmem:[%s5394_s25 + $0xf2] sm:$0xff] }
  0x26   : > { %4630 = vmatprep.mubr.msk.f32.mxu1 %vm247_vm1, %v5454_v16  ;;  %4830 = vmatprep.mubr.msk.f32.mxu0 %vm247_vm1, %v5468_v18  ;;  %v5684_v58 = vld [vmem:[%s5394_s25 + $0xe2] sm:$0xff]  ;;  %v5687_v59 = vld [vmem:[%s5394_s25 + $0x18] sm:$0xff]  ;;  %v5713_v0 = vld [vmem:[%s5394_s25 + $0x30] sm:$0xff] }
  0x27   : > { %6377 = vst [vmem:[#allocation15_spill] sm:$0xff] %v5687_v59  ;;  %v5705_v62 = vld [vmem:[%s5394_s25 + $0x20] sm:$0xff]  ;;  %6379 = vst [vmem:[#allocation17_spill] sm:$0xff] %v5713_v0  ;;  %v5716_v2 = vld [vmem:[%s5394_s25 + $0x10a] sm:$0xff] }
  0x28   : > { %6378 = vst [vmem:[#allocation16_spill] sm:$0xff] %v5705_v62  ;;  %v5708_v63 = vld [vmem:[%s5394_s25 + $0xfa] sm:$0xff]  ;;  %v5732_v4 = vld [vmem:[%s5394_s25 + $0x112] sm:$0xff]  ;;  %v5735_v5 = vld [vmem:[%s5394_s25 + $0x48] sm:$0xff] }
  0x29   : > { %4631 = vmatmul.mubr.msk.f32.gmra.mrb[10].mxu1 %vm247_vm1, %v5465_v17  ;;  %4831 = vmatmul.mubr.msk.f32.gmra.mrb[10].mxu0 %vm247_vm1, %v5479_v19  ;;  %v5729_v3 = vld [vmem:[%s5394_s25 + $0x38] sm:$0xff]  ;;  %6381 = vst [vmem:[#allocation19_spill] sm:$0xff] %v5735_v5  ;;  %v5738_v6 = vld [vmem:[%s5394_s25 + $0x122] sm:$0xff]  ;;  %v5749_v7 = vld [vmem:[%s5394_s25 + $0x50] sm:$0xff] }
  0x2a   : > { %4633 = vmatprep.mubr.msk.f32.mxu1 %vm247_vm1, %v5468_v18  ;;  %4833 = vmatprep.mubr.msk.f32.mxu0 %vm247_vm1, %v5482_v20  ;;  %6380 = vst [vmem:[#allocation18_spill] sm:$0xff] %v5729_v3  ;;  %6382 = vst [vmem:[#allocation20_spill] sm:$0xff] %v5749_v7 }
  0x2d   : > { %4634 = vmatmul.mubr.msk.f32.gmra.mrb[12].mxu1 %vm247_vm1, %v5479_v19  ;;  %4834 = vmatmul.mubr.msk.f32.gmra.mrb[12].mxu0 %vm247_vm1, %v5493_v21 }
  0x2e   : > { %4636 = vmatprep.mubr.msk.f32.mxu1 %vm247_vm1, %v5482_v20  ;;  %4836 = vmatprep.mubr.msk.f32.mxu0 %vm247_vm1, %v5496_v22 }
  0x31   : > { %4637 = vmatmul.mubr.msk.f32.gmra.mrb[14].mxu1 %vm247_vm1, %v5493_v21  ;;  %4837 = vmatmul.mubr.msk.f32.gmra.mrb[14].mxu0 %vm247_vm1, %v5507_v23 }
  0x32   : > { %4639 = vmatprep.mubr.msk.f32.mxu1 %vm247_vm1, %v5496_v22  ;;  %4865 = vmatprep.mubr.msk.f32.mxu0 %vm247_vm1, %v5510_v24 }
  0x35   : > { %4640 = vmatmul.mubr.msk.f32.gmra.mrb[16].mxu1 %vm247_vm1, %v5507_v23  ;;  %4866 = vmatmul.mubr.msk.f32.vlgmr.msra.gmra.mrb[0].mxu0 %vm247_vm1, %v5521_v25 }
  0x36   : > { %4914 = vmatpush3.msk.msra.mxu0 %vm344_vm0, %v4148_v9  ;;  %4642 = vmatprep.mubr.msk.f32.mxu1 %vm247_vm1, %v5524_v26  ;;  %v5752_v9 = vld [vmem:[%s5394_s25 + $0x12a] sm:$0xff] }
  0x37   : > { %4868 = vmatprep.mubr.msk.f32.mxu0 %vm247_vm1, %v5527_v27  ;;  %4963 = vmatprep.subr.msk.mxu0 %vm344_vm0, %v5532_v28 }
  0x39   : > { %4643 = vmatmul.mubr.msk.f32.gmra.mrb[18].mxu1 %vm247_vm1, %v5542_v29  ;;  %4869 = vmatmul.mubr.msk.f32.gmra.mrb[2].mxu0 %vm247_vm1, %v5545_v30  ;;  %v5849_v29 = vld [vmem:[%s5394_s25 + $0xd8] sm:$0xff] }
  0x3a   : > { %4645 = vmatprep.mubr.msk.f32.mxu1 %vm247_vm1, %v5550_v31  ;;  %4871 = vmatprep.mubr.msk.f32.mxu0 %vm247_vm1, %v5553_v32  ;;  %v5832_v31 = vld [vmem:[%s5394_s25 + $0x18a] sm:$0xff] }
  0x3b   : > { %6393 = vst [vmem:[#allocation31_spill] sm:$0xff] %v5832_v31 }
  0x3d   : > { %4646 = vmatmul.mubr.msk.f32.gmra.mrb[20].mxu1 %vm247_vm1, %v5566_v33  ;;  %4872 = vmatmul.mubr.msk.f32.gmra.mrb[4].mxu0 %vm247_vm1, %v5569_v34  ;;  %v5818_v33 = vld [vmem:[%s5394_s25 + $0x182] sm:$0xff] }
  0x3e   : > { %4648 = vmatprep.mubr.msk.f32.mxu1 %vm247_vm1, %v5572_v35  ;;  %4874 = vmatprep.mubr.msk.f32.mxu0 %vm247_vm1, %v5575_v36  ;;  %v5815_v35 = vld [vmem:[%s5394_s25 + $0xa8] sm:$0xff]  ;;  %6391 = vst [vmem:[#allocation29_spill] sm:$0xff] %v5818_v33 }
  0x3f   : > { %6390 = vst [vmem:[#allocation28_spill] sm:$0xff] %v5815_v35 }
  0x41   : > { %4649 = vmatmul.mubr.msk.f32.gmra.mrb[22].mxu1 %vm247_vm1, %v5586_v37  ;;  %4875 = vmatmul.mubr.msk.f32.gmra.mrb[6].mxu0 %vm247_vm1, %v5589_v38  ;;  %v5812_v37 = vld [vmem:[%s5394_s25 + $0x172] sm:$0xff] }
  0x42   : > { %4651 = vmatprep.mubr.msk.f32.mxu1 %vm247_vm1, %v5592_v39  ;;  %4877 = vmatprep.mubr.msk.f32.mxu0 %vm247_vm1, %v5595_v40  ;;  %v5809_v39 = vld [vmem:[%s5394_s25 + $0x98] sm:$0xff]  ;;  %6389 = vst [vmem:[#allocation27_spill] sm:$0xff] %v5812_v37 }
  0x43   : > { %6388 = vst [vmem:[#allocation26_spill] sm:$0xff] %v5809_v39 }
  0x45   : > { %4652 = vmatmul.mubr.msk.f32.gmra.mrb[24].mxu1 %vm247_vm1, %v5606_v41  ;;  %4878 = vmatmul.mubr.msk.f32.gmra.mrb[8].mxu0 %vm247_vm1, %v5609_v42  ;;  %v5798_v41 = vld [vmem:[%s5394_s25 + $0x16a] sm:$0xff] }
  0x46   : > { %4654 = vmatprep.mubr.msk.f32.mxu1 %vm247_vm1, %v5612_v43  ;;  %4880 = vmatprep.mubr.msk.f32.mxu0 %vm247_vm1, %v5615_v44  ;;  %v5795_v43 = vld [vmem:[%s5394_s25 + $0x90] sm:$0xff] }
  0x47   : > { %6387 = vst [vmem:[#allocation25_spill] sm:$0xff] %v5795_v43 }
  0x49   : > { %4655 = vmatmul.mubr.msk.f32.gmra.mrb[26].mxu1 %vm247_vm1, %v5626_v45  ;;  %4881 = vmatmul.mubr.msk.f32.gmra.mrb[10].mxu0 %vm247_vm1, %v5629_v46  ;;  %v5792_v45 = vld [vmem:[%s5394_s25 + $0x15a] sm:$0xff] }
  0x4a   : > { %4657 = vmatprep.mubr.msk.f32.mxu1 %vm247_vm1, %v5632_v47  ;;  %4883 = vmatprep.mubr.msk.f32.mxu0 %vm247_vm1, %v5635_v48  ;;  %v5789_v47 = vld [vmem:[%s5394_s25 + $0x80] sm:$0xff] }
  0x4b   : > { %6386 = vst [vmem:[#allocation24_spill] sm:$0xff] %v5789_v47 }
  0x4d   : > { %4658 = vmatmul.mubr.msk.f32.gmra.mrb[28].mxu1 %vm247_vm1, %v5646_v49  ;;  %4884 = vmatmul.mubr.msk.f32.gmra.mrb[12].mxu0 %vm247_vm1, %v5649_v50  ;;  %v5778_v49 = vld [vmem:[%s5394_s25 + $0x152] sm:$0xff] }
  0x4e   : > { %4660 = vmatprep.mubr.msk.f32.mxu1 %vm247_vm1, %v5652_v51  ;;  %4886 = vmatprep.mubr.msk.f32.mxu0 %vm247_vm1, %v5655_v52  ;;  %v5775_v51 = vld [vmem:[%s5394_s25 + $0x78] sm:$0xff] }
  0x4f   : > { %6385 = vst [vmem:[#allocation23_spill] sm:$0xff] %v5775_v51 }
  0x51   : > { %4661 = vmatmul.mubr.msk.f32.gmra.mrb[30].mxu1 %vm247_vm1, %v5666_v53  ;;  %4887 = vmatmul.mubr.msk.f32.gmra.mrb[14].mxu0 %vm247_vm1, %v5669_v54  ;;  %v5772_v53 = vld [vmem:[%s5394_s25 + $0x142] sm:$0xff] }
  0x52   : > { %4665 = vmatprep.mubr.msk.f32.mxu1 %vm247_vm1, %v180_v55  ;;  %4889 = vmatprep.mubr.msk.f32.mxu0 %vm247_vm1, %v5673_v56  ;;  %v5758_v55 = vld [vmem:[%s5394_s25 + $0x13a] sm:$0xff] }
  0x55   : > { %4666 = vmatmul.mubr.msk.f32.vlgmr.msra.gmra.mrb[0].mxu1 %vm247_vm1, %v181_v57  ;;  %4890 = vmatmul.mubr.msk.f32.gmra.mrb[16].mxu0 %vm247_vm1, %v5684_v58  ;;  %v5769_v57 = vld [vmem:[%s5394_s25 + $0x68] sm:$0xff] }
  0x56   : > { %4714 = vmatpush3.msk.msra.mxu1 %vm344_vm0, %v5413_v10  ;;  %4668 = vmatprep.mubr.msk.f32.mxu1 %vm247_vm1, %v5687_v59  ;;  %v5755_v10 = vld [vmem:[%s5394_s25 + $0x60] sm:$0xff]  ;;  %6384 = vst [vmem:[#allocation22_spill] sm:$0xff] %v5769_v57 }
  0x57   : > { %4892 = vmatprep.mubr.msk.f32.mxu0 %vm247_vm1, %v5690_v60  ;;  %4763 = vmatprep.subr.msk.mxu1 %vm344_vm0, %v5695_v61  ;;  %6383 = vst [vmem:[#allocation21_spill] sm:$0xff] %v5755_v10  ;;  %v5835_v59 = vld [vmem:[%s5394_s25 + $0xc0] sm:$0xff] }
  0x59   : > { %4669 = vmatmul.mubr.msk.f32.gmra.mrb[2].mxu1 %vm247_vm1, %v5705_v62  ;;  %4893 = vmatmul.mubr.msk.f32.gmra.mrb[18].mxu0 %vm247_vm1, %v5708_v63  ;;  %v5829_v62 = vld [vmem:[%s5394_s25 + $0xb0] sm:$0xff] }
  0x5a   : > { %4671 = vmatprep.mubr.msk.f32.mxu1 %vm247_vm1, %v5713_v0  ;;  %4895 = vmatprep.mubr.msk.f32.mxu0 %vm247_vm1, %v5716_v2  ;;  %6392 = vst [vmem:[#allocation30_spill] sm:$0xff] %v5829_v62 }
  0x5d   : > { %4672 = vmatmul.mubr.msk.f32.gmra.mrb[4].mxu1 %vm247_vm1, %v5729_v3  ;;  %4896 = vmatmul.mubr.msk.f32.gmra.mrb[20].mxu0 %vm247_vm1, %v5732_v4 }
  0x5e   : > { %4674 = vmatprep.mubr.msk.f32.mxu1 %vm247_vm1, %v5735_v5  ;;  %4898 = vmatprep.mubr.msk.f32.mxu0 %vm247_vm1, %v5738_v6 }
  0x61   : > { %4675 = vmatmul.mubr.msk.f32.gmra.mrb[6].mxu1 %vm247_vm1, %v5749_v7  ;;  %4899 = vmatmul.mubr.msk.f32.gmra.mrb[22].mxu0 %vm247_vm1, %v5752_v9 }
  0x62   : > { %4677 = vmatprep.mubr.msk.f32.mxu1 %vm247_vm1, %v5755_v10  ;;  %4901 = vmatprep.mubr.msk.f32.mxu0 %vm247_vm1, %v5758_v55 }
  0x65   : > { %4678 = vmatmul.mubr.msk.f32.gmra.mrb[8].mxu1 %vm247_vm1, %v5769_v57  ;;  %4902 = vmatmul.mubr.msk.f32.gmra.mrb[24].mxu0 %vm247_vm1, %v5772_v53 }
  0x66   : > { %4680 = vmatprep.mubr.msk.f32.mxu1 %vm247_vm1, %v5775_v51  ;;  %4904 = vmatprep.mubr.msk.f32.mxu0 %vm247_vm1, %v5778_v49 }
  0x69   : > { %4681 = vmatmul.mubr.msk.f32.gmra.mrb[10].mxu1 %vm247_vm1, %v5789_v47  ;;  %4905 = vmatmul.mubr.msk.f32.gmra.mrb[26].mxu0 %vm247_vm1, %v5792_v45 }
  0x6a   : > { %4683 = vmatprep.mubr.msk.f32.mxu1 %vm247_vm1, %v5795_v43  ;;  %4907 = vmatprep.mubr.msk.f32.mxu0 %vm247_vm1, %v5798_v41 }
  0x6d   : > { %4684 = vmatmul.mubr.msk.f32.gmra.mrb[12].mxu1 %vm247_vm1, %v5809_v39  ;;  %4908 = vmatmul.mubr.msk.f32.gmra.mrb[28].mxu0 %vm247_vm1, %v5812_v37  ;;  %v5854_v37 = vld [vmem:[%s6316_s1 + $0x20] sm:$0xf] }
  0x6e   : > { %4686 = vmatprep.mubr.msk.f32.mxu1 %vm247_vm1, %v5815_v35  ;;  %4910 = vmatprep.mubr.msk.f32.mxu0 %vm247_vm1, %v5818_v33  ;;  %v5846_v33 = vld [vmem:[%s5394_s25 + $0xc8] sm:$0xff] }
  0x6f   : > { %6394 = vst [vmem:[#allocation32_spill] sm:$0xff] %v5846_v33 }
  0x71   : > { %4687 = vmatmul.mubr.msk.f32.gmra.mrb[14].mxu1 %vm247_vm1, %v5829_v62  ;;  %4911 = vmatmul.mubr.msk.f32.gmra.mrb[30].mxu0 %vm247_vm1, %v5832_v31  ;;  %v5865_v31 = vld [vmem:[%s5394_s25 + $0xe0] sm:$0xff] }
  0x72   : > { %4689 = vmatprep.mubr.msk.f32.mxu1 %vm247_vm1, %v5835_v59  ;;  %4915 = vmatprep.mubr.msk.f32.mxu0 %vm247_vm1, %v5713_v0  ;;  %v5870_v0 = vld [vmem:[%s5394_s25 + $0xf0] sm:$0xff] }
  0x75   : > { %4690 = vmatmul.mubr.msk.f32.gmra.mrb[16].mxu1 %vm247_vm1, %v5846_v33  ;;  %4916 = vmatmul.mubr.msk.f32.vlgmr.msra.gmra.mrb[0].mxu0 %vm247_vm1, %v5729_v3  ;;  %v897_v3 = vld [vmem:[%s5394_s25 + $0x2] sm:$0xff] }
  0x76   : > { %4964 = vmatpush3.msk.msra.mxu0 %vm344_vm0, %v5532_v28  ;;  %4692 = vmatprep.mubr.msk.f32.mxu1 %vm247_vm1, %v5849_v29  ;;  %v5883_v28 = vld [vmem:[%s5394_s25 + $0xf8] sm:$0xff] }
  0x77   : > { %4918 = vmatprep.mubr.msk.f32.mxu0 %vm247_vm1, %v5735_v5  ;;  %5013 = vmatprep.subr.msk.mxu0 %vm344_vm0, %v5854_v37  ;;  %v5886_v5 = vld [vmem:[%s5394_s25 + $0x108] sm:$0xff] }
  0x79   : > { %4693 = vmatmul.mubr.msk.f32.gmra.mrb[18].mxu1 %vm247_vm1, %v5865_v31  ;;  %4919 = vmatmul.mubr.msk.f32.gmra.mrb[2].mxu0 %vm247_vm1, %v5749_v7  ;;  %v5897_v7 = vld [vmem:[%s5394_s25 + $0x110] sm:$0xff] }
  0x7a   : > { %4695 = vmatprep.mubr.msk.f32.mxu1 %vm247_vm1, %v5870_v0  ;;  %4921 = vmatprep.mubr.msk.f32.mxu0 %vm247_vm1, %v5755_v10  ;;  %v5900_v10 = vld [vmem:[%s5394_s25 + $0x120] sm:$0xff] }
  0x7d   : > { %4696 = vmatmul.mubr.msk.f32.gmra.mrb[20].mxu1 %vm247_vm1, %v5883_v28  ;;  %4922 = vmatmul.mubr.msk.f32.gmra.mrb[4].mxu0 %vm247_vm1, %v5769_v57  ;;  %v5911_v57 = vld [vmem:[%s5394_s25 + $0x128] sm:$0xff] }
  0x7e   : > { %4698 = vmatprep.mubr.msk.f32.mxu1 %vm247_vm1, %v5886_v5  ;;  %4924 = vmatprep.mubr.msk.f32.mxu0 %vm247_vm1, %v5775_v51  ;;  %v5914_v51 = vld [vmem:[%s5394_s25 + $0x138] sm:$0xff] }
  0x81   : > { %4699 = vmatmul.mubr.msk.f32.gmra.mrb[22].mxu1 %vm247_vm1, %v5897_v7  ;;  %4925 = vmatmul.mubr.msk.f32.gmra.mrb[6].mxu0 %vm247_vm1, %v5789_v47  ;;  %v5925_v47 = vld [vmem:[%s5394_s25 + $0x140] sm:$0xff] }
  0x82   : > { %4701 = vmatprep.mubr.msk.f32.mxu1 %vm247_vm1, %v5900_v10  ;;  %4927 = vmatprep.mubr.msk.f32.mxu0 %vm247_vm1, %v5795_v43  ;;  %v5928_v43 = vld [vmem:[%s5394_s25 + $0x150] sm:$0xff] }
  0x85   : > { %4702 = vmatmul.mubr.msk.f32.gmra.mrb[24].mxu1 %vm247_vm1, %v5911_v57  ;;  %4928 = vmatmul.mubr.msk.f32.gmra.mrb[8].mxu0 %vm247_vm1, %v5809_v39  ;;  %v5939_v39 = vld [vmem:[%s5394_s25 + $0x158] sm:$0xff] }
  0x86   : > { %4704 = vmatprep.mubr.msk.f32.mxu1 %vm247_vm1, %v5914_v51  ;;  %4930 = vmatprep.mubr.msk.f32.mxu0 %vm247_vm1, %v5815_v35  ;;  %v5942_v35 = vld [vmem:[%s5394_s25 + $0x168] sm:$0xff] }
  0x89   : > { %4705 = vmatmul.mubr.msk.f32.gmra.mrb[26].mxu1 %vm247_vm1, %v5925_v47  ;;  %4931 = vmatmul.mubr.msk.f32.gmra.mrb[10].mxu0 %vm247_vm1, %v5829_v62  ;;  %v5953_v62 = vld [vmem:[%s5394_s25 + $0x170] sm:$0xff] }
  0x8a   : > { %4707 = vmatprep.mubr.msk.f32.mxu1 %vm247_vm1, %v5928_v43  ;;  %4933 = vmatprep.mubr.msk.f32.mxu0 %vm247_vm1, %v5835_v59 }
  0x8d   : > { %4708 = vmatmul.mubr.msk.f32.gmra.mrb[28].mxu1 %vm247_vm1, %v5939_v39  ;;  %4934 = vmatmul.mubr.msk.f32.gmra.mrb[12].mxu0 %vm247_vm1, %v5846_v33  ;;  %v898_v33 = vld [vmem:[%s5394_s25 + $0xa] sm:$0xff] }
  0x8e   : > { %4710 = vmatprep.mubr.msk.f32.mxu1 %vm247_vm1, %v5942_v35  ;;  %4936 = vmatprep.mubr.msk.f32.mxu0 %vm247_vm1, %v5849_v29 }
  0x91   : > { %4711 = vmatmul.mubr.msk.f32.gmra.mrb[30].mxu1 %vm247_vm1, %v5953_v62  ;;  %4937 = vmatmul.mubr.msk.f32.gmra.mrb[14].mxu0 %vm247_vm1, %v5865_v31 }
  0x92   : > { %4715 = vmatprep.mubr.msk.f32.mxu1 %vm247_vm1, %v897_v3  ;;  %4939 = vmatprep.mubr.msk.f32.mxu0 %vm247_vm1, %v5870_v0  ;;  %v6411_v3 = vld [vmem:[#allocation22_spill] sm:$0xff] }
  0x95   : > { %4716 = vmatmul.mubr.msk.f32.vlgmr.msra.gmra.mrb[0].mxu1 %vm247_vm1, %v898_v33  ;;  %4940 = vmatmul.mubr.msk.f32.gmra.mrb[16].mxu0 %vm247_vm1, %v5883_v28  ;;  %v4146_v33 = vld [vmem:[%s5394_s25 + $0x198] sm:$0xff] }
  0x96   : > { %4764 = vmatpush3.msk.msra.mxu1 %vm344_vm0, %v5695_v61  ;;  %4718 = vmatprep.mubr.msk.f32.mxu1 %vm247_vm1, %v5510_v24  ;;  %v6008_v24 = vld [vmem:[%s5394_s25 + $0x180] sm:$0xff] }
  0x97   : > { %4942 = vmatprep.mubr.msk.f32.mxu0 %vm247_vm1, %v5886_v5  ;;  %5063 = vmatprep.subr.msk.mxu1 %vm344_vm0, %v5372_v1  ;;  %v4147_v61 = vld [vmem:[%s5394_s25 + $0x1a0] sm:$0xff] }
  0x99   : > { %4719 = vmatmul.mubr.msk.f32.gmra.mrb[2].mxu1 %vm247_vm1, %v5521_v25  ;;  %4943 = vmatmul.mubr.msk.f32.gmra.mrb[18].mxu0 %vm247_vm1, %v5897_v7  ;;  %v6019_v25 = vld [vmem:[%s5394_s25 + $0x188] sm:$0xff] }
  0x9a   : > { %4721 = vmatprep.mubr.msk.f32.mxu1 %vm247_vm1, %v5527_v27  ;;  %4945 = vmatprep.mubr.msk.f32.mxu0 %vm247_vm1, %v5900_v10 }
  0x9d   : > { %4722 = vmatmul.mubr.msk.f32.gmra.mrb[4].mxu1 %vm247_vm1, %v5545_v30  ;;  %4946 = vmatmul.mubr.msk.f32.gmra.mrb[20].mxu0 %vm247_vm1, %v5911_v57 }
  0x9e   : > { %4724 = vmatprep.mubr.msk.f32.mxu1 %vm247_vm1, %v5553_v32  ;;  %4948 = vmatprep.mubr.msk.f32.mxu0 %vm247_vm1, %v5914_v51 }
  0xa1   : > { %4725 = vmatmul.mubr.msk.f32.gmra.mrb[6].mxu1 %vm247_vm1, %v5569_v34  ;;  %4949 = vmatmul.mubr.msk.f32.gmra.mrb[22].mxu0 %vm247_vm1, %v5925_v47 }
  0xa2   : > { %4727 = vmatprep.mubr.msk.f32.mxu1 %vm247_vm1, %v5575_v36  ;;  %4951 = vmatprep.mubr.msk.f32.mxu0 %vm247_vm1, %v5928_v43 }
  0xa5   : > { %4728 = vmatmul.mubr.msk.f32.gmra.mrb[8].mxu1 %vm247_vm1, %v5589_v38  ;;  %4952 = vmatmul.mubr.msk.f32.gmra.mrb[24].mxu0 %vm247_vm1, %v5939_v39 }
  0xa6   : > { %4730 = vmatprep.mubr.msk.f32.mxu1 %vm247_vm1, %v5595_v40  ;;  %4954 = vmatprep.mubr.msk.f32.mxu0 %vm247_vm1, %v5942_v35 }
  0xa9   : > { %4731 = vmatmul.mubr.msk.f32.gmra.mrb[10].mxu1 %vm247_vm1, %v5609_v42  ;;  %4955 = vmatmul.mubr.msk.f32.gmra.mrb[26].mxu0 %vm247_vm1, %v5953_v62 }
  0xaa   : > { %4733 = vmatprep.mubr.msk.f32.mxu1 %vm247_vm1, %v5615_v44  ;;  %4957 = vmatprep.mubr.msk.f32.mxu0 %vm247_vm1, %v6008_v24 }
  0xad   : > { %4734 = vmatmul.mubr.msk.f32.gmra.mrb[12].mxu1 %vm247_vm1, %v5629_v46  ;;  %4958 = vmatmul.mubr.msk.f32.gmra.mrb[28].mxu0 %vm247_vm1, %v6019_v25 }
  0xae   : > { %4736 = vmatprep.mubr.msk.f32.mxu1 %vm247_vm1, %v5635_v48  ;;  %4960 = vmatprep.mubr.msk.f32.mxu0 %vm247_vm1, %v4146_v33  ;;  %v6412_v33 = vld [vmem:[#allocation10_spill] sm:$0xff] }
  0xb1   : > { %4737 = vmatmul.mubr.msk.f32.gmra.mrb[14].mxu1 %vm247_vm1, %v5649_v50  ;;  %4961 = vmatmul.mubr.msk.f32.gmra.mrb[30].mxu0 %vm247_vm1, %v4147_v61  ;;  %v6413_v61 = vld [vmem:[#allocation23_spill] sm:$0xff] }
  0xb2   : > { %4739 = vmatprep.mubr.msk.f32.mxu1 %vm247_vm1, %v5655_v52  ;;  %4965 = vmatprep.mubr.msk.f32.mxu0 %vm247_vm1, %v5403_v8  ;;  %v6395_v8 = vld [vmem:[#allocation27_spill] sm:$0xff] }
  0xb5   : > { %4740 = vmatmul.mubr.msk.f32.gmra.mrb[16].mxu1 %vm247_vm1, %v5669_v54  ;;  %4966 = vmatmul.mubr.msk.f32.vlgmr.msra.gmra.mrb[0].mxu0 %vm247_vm1, %v5418_v11  ;;  %v6396_v11 = vld [vmem:[#allocation2_spill] sm:$0xff] }
  0xb6   : > { %5014 = vmatpush3.msk.msra.mxu0 %vm344_vm0, %v5854_v37  ;;  %4742 = vmatprep.mubr.msk.f32.mxu1 %vm247_vm1, %v5673_v56  ;;  %v6410_v37 = vld [vmem:[#allocation9_spill] sm:$0xff] }
  0xb7   : > { %4968 = vmatprep.mubr.msk.f32.mxu0 %vm247_vm1, %v5424_v12  ;;  %v6397_v12 = vld [vmem:[#allocation15_spill] sm:$0xff] }
  0xb9   : > { %4743 = vmatmul.mubr.msk.f32.gmra.mrb[18].mxu1 %vm247_vm1, %v5684_v58  ;;  %4969 = vmatmul.mubr.msk.f32.gmra.mrb[2].mxu0 %vm247_vm1, %v5437_v13  ;;  %v6398_v13 = vld [vmem:[#allocation3_spill] sm:$0xff] }
  0xba   : > { %4745 = vmatprep.mubr.msk.f32.mxu1 %vm247_vm1, %v5690_v60  ;;  %4971 = vmatprep.mubr.msk.f32.mxu0 %vm247_vm1, %v5440_v14  ;;  %v6399_v14 = vld [vmem:[#allocation16_spill] sm:$0xff] }
  0xbd   : > { %4746 = vmatmul.mubr.msk.f32.gmra.mrb[20].mxu1 %vm247_vm1, %v5708_v63  ;;  %4972 = vmatmul.mubr.msk.f32.gmra.mrb[4].mxu0 %vm247_vm1, %v5451_v15  ;;  %v6400_v15 = vld [vmem:[#allocation4_spill] sm:$0xff] }
  0xbe   : > { %4748 = vmatprep.mubr.msk.f32.mxu1 %vm247_vm1, %v5716_v2  ;;  %4974 = vmatprep.mubr.msk.f32.mxu0 %vm247_vm1, %v5454_v16  ;;  %v6401_v16 = vld [vmem:[#allocation17_spill] sm:$0xff] }
  0xc1   : > { %4749 = vmatmul.mubr.msk.f32.gmra.mrb[22].mxu1 %vm247_vm1, %v5732_v4  ;;  %4975 = vmatmul.mubr.msk.f32.gmra.mrb[6].mxu0 %vm247_vm1, %v5465_v17  ;;  %v6402_v17 = vld [vmem:[#allocation5_spill] sm:$0xff] }
  0xc2   : > { %4751 = vmatprep.mubr.msk.f32.mxu1 %vm247_vm1, %v5738_v6  ;;  %4977 = vmatprep.mubr.msk.f32.mxu0 %vm247_vm1, %v5468_v18  ;;  %v6403_v18 = vld [vmem:[#allocation18_spill] sm:$0xff] }
  0xc5   : > { %4752 = vmatmul.mubr.msk.f32.gmra.mrb[24].mxu1 %vm247_vm1, %v5752_v9  ;;  %4978 = vmatmul.mubr.msk.f32.gmra.mrb[8].mxu0 %vm247_vm1, %v5479_v19  ;;  %v6404_v19 = vld [vmem:[#allocation6_spill] sm:$0xff] }
  0xc6   : > { %4754 = vmatprep.mubr.msk.f32.mxu1 %vm247_vm1, %v5758_v55  ;;  %4980 = vmatprep.mubr.msk.f32.mxu0 %vm247_vm1, %v5482_v20  ;;  %v6405_v20 = vld [vmem:[#allocation19_spill] sm:$0xff] }
  0xc9   : > { %4755 = vmatmul.mubr.msk.f32.gmra.mrb[26].mxu1 %vm247_vm1, %v5772_v53  ;;  %4981 = vmatmul.mubr.msk.f32.gmra.mrb[10].mxu0 %vm247_vm1, %v5493_v21  ;;  %v6406_v21 = vld [vmem:[#allocation7_spill] sm:$0xff] }
  0xca   : > { %4757 = vmatprep.mubr.msk.f32.mxu1 %vm247_vm1, %v5778_v49  ;;  %4983 = vmatprep.mubr.msk.f32.mxu0 %vm247_vm1, %v5496_v22  ;;  %v6408_v22 = vld [vmem:[#allocation8_spill] sm:$0xff] }
  0xcd   : > { %4758 = vmatmul.mubr.msk.f32.gmra.mrb[28].mxu1 %vm247_vm1, %v5792_v45  ;;  %4984 = vmatmul.mubr.msk.f32.gmra.mrb[12].mxu0 %vm247_vm1, %v5507_v23  ;;  %v6409_v23 = vld [vmem:[#allocation21_spill] sm:$0xff] }
  0xce   : > { %4760 = vmatprep.mubr.msk.f32.mxu1 %vm247_vm1, %v5798_v41  ;;  %4986 = vmatprep.mubr.msk.f32.mxu0 %vm247_vm1, %v5524_v26 }
  0xd1   : > { %4761 = vmatmul.mubr.msk.f32.gmra.mrb[30].mxu1 %vm247_vm1, %v6395_v8  ;;  %4987 = vmatmul.mubr.msk.f32.gmra.mrb[14].mxu0 %vm247_vm1, %v6396_v11  ;;  %v6422_v8 = vld [vmem:[#allocation30_spill] sm:$0xff] }
  0xd2   : > { %4765 = vmatprep.mubr.msk.f32.mxu1 %vm247_vm1, %v6397_v12  ;;  %4989 = vmatprep.mubr.msk.f32.mxu0 %vm247_vm1, %v6398_v13  ;;  %v6414_v12 = vld [vmem:[#allocation11_spill] sm:$0xff] }
  0xd5   : > { %4766 = vmatmul.mubr.msk.f32.vlgmr.msra.gmra.mrb[0].mxu1 %vm247_vm1, %v6399_v14  ;;  %4990 = vmatmul.mubr.msk.f32.gmra.mrb[16].mxu0 %vm247_vm1, %v6400_v15  ;;  %v6415_v14 = vld [vmem:[#allocation24_spill] sm:$0xff] }
  0xd6   : > { %5064 = vmatpush3.msk.msra.mxu1 %vm344_vm0, %v5372_v1  ;;  %4768 = vmatprep.mubr.msk.f32.mxu1 %vm247_vm1, %v6401_v16  ;;  %v6407_v1 = vld [vmem:[#allocation20_spill] sm:$0xff] }
  0xd7   : > { %4992 = vmatprep.mubr.msk.f32.mxu0 %vm247_vm1, %v6402_v17  ;;  %v6416_v16 = vld [vmem:[#allocation12_spill] sm:$0xff] }
  0xd9   : > { %4769 = vmatmul.mubr.msk.f32.gmra.mrb[2].mxu1 %vm247_vm1, %v6403_v18  ;;  %4993 = vmatmul.mubr.msk.f32.gmra.mrb[18].mxu0 %vm247_vm1, %v6404_v19  ;;  %v6417_v18 = vld [vmem:[#allocation25_spill] sm:$0xff] }
  0xda   : > { %4771 = vmatprep.mubr.msk.f32.mxu1 %vm247_vm1, %v6405_v20  ;;  %4995 = vmatprep.mubr.msk.f32.mxu0 %vm247_vm1, %v6406_v21  ;;  %v6418_v20 = vld [vmem:[#allocation13_spill] sm:$0xff] }
  0xdd   : > { %4772 = vmatmul.mubr.msk.f32.gmra.mrb[4].mxu1 %vm247_vm1, %v6407_v1  ;;  %4996 = vmatmul.mubr.msk.f32.gmra.mrb[20].mxu0 %vm247_vm1, %v6408_v22  ;;  %v6146_v1 = vld [vmem:[%s5394_s25 + $0x181] sm:$0xff] }
  0xde   : > { %4774 = vmatprep.mubr.msk.f32.mxu1 %vm247_vm1, %v6409_v23  ;;  %4998 = vmatprep.mubr.msk.f32.mxu0 %vm247_vm1, %v6410_v37  ;;  %v6419_v23 = vld [vmem:[#allocation26_spill] sm:$0xff] }
  0xe1   : > { %4775 = vmatmul.mubr.msk.f32.gmra.mrb[6].mxu1 %vm247_vm1, %v6411_v3  ;;  %4999 = vmatmul.mubr.msk.f32.gmra.mrb[22].mxu0 %vm247_vm1, %v6412_v33  ;;  %v6420_v3 = vld [vmem:[#allocation14_spill] sm:$0xff] }
  0xe2   : > { %4777 = vmatprep.mubr.msk.f32.mxu1 %vm247_vm1, %v6413_v61  ;;  %5001 = vmatprep.mubr.msk.f32.mxu0 %vm247_vm1, %v6414_v12  ;;  %v6421_v61 = vld [vmem:[#allocation28_spill] sm:$0xff] }
  0xe5   : > { %4778 = vmatmul.mubr.msk.f32.gmra.mrb[8].mxu1 %vm247_vm1, %v6415_v14  ;;  %5002 = vmatmul.mubr.msk.f32.gmra.mrb[24].mxu0 %vm247_vm1, %v6416_v16  ;;  %v6157_v14 = vld [vmem:[%s5394_s25 + $0x189] sm:$0xff] }
  0xe6   : > { %4780 = vmatprep.mubr.msk.f32.mxu1 %vm247_vm1, %v6417_v18  ;;  %5004 = vmatprep.mubr.msk.f32.mxu0 %vm247_vm1, %v6418_v20  ;;  %v4212_v18 = vld [vmem:[%s5394_s25 + $0x199] sm:$0xff] }
  0xe9   : > { %4781 = vmatmul.mubr.msk.f32.gmra.mrb[10].mxu1 %vm247_vm1, %v6419_v23  ;;  %5005 = vmatmul.mubr.msk.f32.gmra.mrb[26].mxu0 %vm247_vm1, %v6420_v3  ;;  %v4213_v23 = vld [vmem:[%s5394_s25 + $0x1a1] sm:$0xff]  ;;  %v6423_v3 = vld [vmem:[#allocation32_spill] sm:$0xff] }
  0xea   : > { %4783 = vmatprep.mubr.msk.f32.mxu1 %vm247_vm1, %v6421_v61  ;;  %5007 = vmatprep.mubr.msk.f32.mxu0 %vm247_vm1, %v6146_v1 }
  0xed   : > { %4784 = vmatmul.mubr.msk.f32.gmra.mrb[12].mxu1 %vm247_vm1, %v6422_v8  ;;  %5008 = vmatmul.mubr.msk.f32.gmra.mrb[28].mxu0 %vm247_vm1, %v6157_v14 }
  0xee   : > { %4786 = vmatprep.mubr.msk.f32.mxu1 %vm247_vm1, %v5835_v59  ;;  %5010 = vmatprep.mubr.msk.f32.mxu0 %vm247_vm1, %v4212_v18 }
  0xf1   : > { %4787 = vmatmul.mubr.msk.f32.gmra.mrb[14].mxu1 %vm247_vm1, %v6423_v3  ;;  %5011 = vmatmul.mubr.msk.f32.gmra.mrb[30].mxu0 %vm247_vm1, %v4213_v23 }
  0xf2   : > { %4789 = vmatprep.mubr.msk.f32.mxu1 %vm247_vm1, %v5849_v29  ;;  %5015 = vmatprep.mubr.msk.f32.mxu0 %vm247_vm1, %v5527_v27  ;;  %v6425_v27 = vld [vmem:[#allocation29_spill] sm:$0xff] }
  0xf3   : > { %v4278_v29 = vld [vmem:[%s5394_s25 + $0x19a] sm:$0xff] }
  0xf5   : > { %4790 = vmatmul.mubr.msk.f32.gmra.mrb[16].mxu1 %vm247_vm1, %v5865_v31  ;;  %5016 = vmatmul.mubr.msk.f32.vlgmr.msra.gmra.mrb[0].mxu0 %vm247_vm1, %v5545_v30  ;;  %v6426_v30 = vld [vmem:[#allocation14_spill] sm:$0xff]  ;;  %v6427_v31 = vld [vmem:[#allocation31_spill] sm:$0xff] }
  0xf6   : > { %4792 = vmatprep.mubr.msk.f32.mxu1 %vm247_vm1, %v5870_v0  ;;  %5018 = vmatprep.mubr.msk.f32.mxu0 %vm247_vm1, %v5553_v32  ;;  %v4279_v32 = vld [vmem:[%s5394_s25 + $0x1a2] sm:$0xff] }
  0xf9   : > { %4793 = vmatmul.mubr.msk.f32.gmra.mrb[18].mxu1 %vm247_vm1, %v5883_v28  ;;  %5019 = vmatmul.mubr.msk.f32.gmra.mrb[2].mxu0 %vm247_vm1, %v5569_v34 }
  0xfa   : > { %4795 = vmatprep.mubr.msk.f32.mxu1 %vm247_vm1, %v5886_v5  ;;  %5021 = vmatprep.mubr.msk.f32.mxu0 %vm247_vm1, %v5575_v36 }
  0xfd   : > { %4796 = vmatmul.mubr.msk.f32.gmra.mrb[20].mxu1 %vm247_vm1, %v5897_v7  ;;  %5022 = vmatmul.mubr.msk.f32.gmra.mrb[4].mxu0 %vm247_vm1, %v5589_v38 }
  0xfe   : > { %4798 = vmatprep.mubr.msk.f32.mxu1 %vm247_vm1, %v5900_v10  ;;  %5024 = vmatprep.mubr.msk.f32.mxu0 %vm247_vm1, %v5595_v40 }
 0x101   : > { %4799 = vmatmul.mubr.msk.f32.gmra.mrb[22].mxu1 %vm247_vm1, %v5911_v57  ;;  %5025 = vmatmul.mubr.msk.f32.gmra.mrb[6].mxu0 %vm247_vm1, %v5609_v42 }
 0x102   : > { %4801 = vmatprep.mubr.msk.f32.mxu1 %vm247_vm1, %v5914_v51  ;;  %5027 = vmatprep.mubr.msk.f32.mxu0 %vm247_vm1, %v5615_v44 }
 0x105   : > { %4802 = vmatmul.mubr.msk.f32.gmra.mrb[24].mxu1 %vm247_vm1, %v5925_v47  ;;  %5028 = vmatmul.mubr.msk.f32.gmra.mrb[8].mxu0 %vm247_vm1, %v5629_v46 }
 0x106   : > { %4804 = vmatprep.mubr.msk.f32.mxu1 %vm247_vm1, %v5928_v43  ;;  %5030 = vmatprep.mubr.msk.f32.mxu0 %vm247_vm1, %v5635_v48 }
 0x109   : > { %4805 = vmatmul.mubr.msk.f32.gmra.mrb[26].mxu1 %vm247_vm1, %v5939_v39  ;;  %5031 = vmatmul.mubr.msk.f32.gmra.mrb[10].mxu0 %vm247_vm1, %v5649_v50 }
 0x10a   : > { %4807 = vmatprep.mubr.msk.f32.mxu1 %vm247_vm1, %v5942_v35  ;;  %5033 = vmatprep.mubr.msk.f32.mxu0 %vm247_vm1, %v5655_v52 }
 0x10d   : > { %4808 = vmatmul.mubr.msk.f32.gmra.mrb[28].mxu1 %vm247_vm1, %v5953_v62  ;;  %5034 = vmatmul.mubr.msk.f32.gmra.mrb[12].mxu0 %vm247_vm1, %v5669_v54 }
 0x10e   : > { %4810 = vmatprep.mubr.msk.f32.mxu1 %vm247_vm1, %v6008_v24  ;;  %5036 = vmatprep.mubr.msk.f32.mxu0 %vm247_vm1, %v5673_v56 }
 0x111   : > { %4811 = vmatmul.mubr.msk.f32.gmra.mrb[30].mxu1 %vm247_vm1, %v6019_v25  ;;  %5037 = vmatmul.mubr.msk.f32.gmra.mrb[14].mxu0 %vm247_vm1, %v5684_v58 }
 0x112   : > { %4839 = vmatprep.mubr.msk.f32.mxu1 %vm247_vm1, %v5524_v26  ;;  %5039 = vmatprep.mubr.msk.f32.mxu0 %vm247_vm1, %v5690_v60  ;;  %v6424_v26 = vld [vmem:[#allocation27_spill] sm:$0xff] }
 0x115   : > { %4840 = vmatmul.mubr.msk.f32.vlgmr.msra.gmra.mrb[16].mxu1 %vm247_vm1, %v6396_v11  ;;  %5040 = vmatmul.mubr.msk.f32.gmra.mrb[16].mxu0 %vm247_vm1, %v5708_v63 }
 0x116   : > { %4842 = vmatprep.mubr.msk.f32.mxu1 %vm247_vm1, %v6398_v13  ;;  %5042 = vmatprep.mubr.msk.f32.mxu0 %vm247_vm1, %v5716_v2 }
 0x119   : > { %4843 = vmatmul.mubr.msk.f32.gmra.mrb[18].mxu1 %vm247_vm1, %v6400_v15  ;;  %5043 = vmatmul.mubr.msk.f32.gmra.mrb[18].mxu0 %vm247_vm1, %v5732_v4 }
 0x11a   : > { %4845 = vmatprep.mubr.msk.f32.mxu1 %vm247_vm1, %v6402_v17  ;;  %5045 = vmatprep.mubr.msk.f32.mxu0 %vm247_vm1, %v5738_v6 }
 0x11d   : > { %4846 = vmatmul.mubr.msk.f32.gmra.mrb[20].mxu1 %vm247_vm1, %v6404_v19  ;;  %5046 = vmatmul.mubr.msk.f32.gmra.mrb[20].mxu0 %vm247_vm1, %v5752_v9 }
 0x11e   : > { %4848 = vmatprep.mubr.msk.f32.mxu1 %vm247_vm1, %v6406_v21  ;;  %5048 = vmatprep.mubr.msk.f32.mxu0 %vm247_vm1, %v5758_v55 }
 0x121   : > { %4849 = vmatmul.mubr.msk.f32.gmra.mrb[22].mxu1 %vm247_vm1, %v6408_v22  ;;  %5049 = vmatmul.mubr.msk.f32.gmra.mrb[22].mxu0 %vm247_vm1, %v5772_v53 }
 0x122   : > { %4851 = vmatprep.mubr.msk.f32.mxu1 %vm247_vm1, %v6410_v37  ;;  %5051 = vmatprep.mubr.msk.f32.mxu0 %vm247_vm1, %v5778_v49 }
 0x125   : > { %4852 = vmatmul.mubr.msk.f32.gmra.mrb[24].mxu1 %vm247_vm1, %v6412_v33  ;;  %5052 = vmatmul.mubr.msk.f32.gmra.mrb[24].mxu0 %vm247_vm1, %v5792_v45 }
 0x126   : > { %4854 = vmatprep.mubr.msk.f32.mxu1 %vm247_vm1, %v6414_v12  ;;  %5054 = vmatprep.mubr.msk.f32.mxu0 %vm247_vm1, %v5798_v41 }
 0x129   : > { %4855 = vmatmul.mubr.msk.f32.gmra.mrb[26].mxu1 %vm247_vm1, %v6416_v16  ;;  %5055 = vmatmul.mubr.msk.f32.gmra.mrb[26].mxu0 %vm247_vm1, %v6424_v26 }
 0x12a   : > { %4857 = vmatprep.mubr.msk.f32.mxu1 %vm247_vm1, %v6418_v20  ;;  %5057 = vmatprep.mubr.msk.f32.mxu0 %vm247_vm1, %v6425_v27 }
 0x12d   : > { %4858 = vmatmul.mubr.msk.f32.gmra.mrb[28].mxu1 %vm247_vm1, %v6426_v30  ;;  %5058 = vmatmul.mubr.msk.f32.gmra.mrb[28].mxu0 %vm247_vm1, %v6427_v31 }
 0x12e   : > { %4860 = vmatprep.mubr.msk.f32.mxu1 %vm247_vm1, %v6146_v1  ;;  %5060 = vmatprep.mubr.msk.f32.mxu0 %vm247_vm1, %v4278_v29 }
 0x131   : > { %4861 = vmatmul.mubr.msk.f32.gmra.mrb[30].mxu1 %vm247_vm1, %v6157_v14  ;;  %5061 = vmatmul.mubr.msk.f32.gmra.mrb[30].mxu0 %vm247_vm1, %v4279_v32 }
 0x1a8   : > { %v4767_v34 = vpop.f32.mrb[0].mxu1 }
 0x1a9   : > { %v1487_v35 = vpop.f32.mrb[1].mxu1 }
 0x1ac   : > { %v4770_v36 = vpop.f32.mrb[2].mxu1 }
 0x1ad   : > { %v1497_v38 = vpop.f32.mrb[3].mxu1 }
 0x1b0   : > { %v4773_v39 = vpop.f32.mrb[4].mxu1 }
 0x1b1   : > { %v1507_v40 = vpop.f32.mrb[5].mxu1 }
 0x1b4   : > { %v4776_v41 = vpop.f32.mrb[6].mxu1 }
 0x1b5   : > { %v1517_v42 = vpop.f32.mrb[7].mxu1 }
 0x1b8   : > { %v4779_v43 = vpop.f32.mrb[8].mxu1 }
 0x1b9   : > { %v1527_v44 = vpop.f32.mrb[9].mxu1 }
 0x1bc   : > { %v4782_v45 = vpop.f32.mrb[10].mxu1 }
 0x1bd   : > { %v1537_v46 = vpop.f32.mrb[11].mxu1 }
 0x1c0   : > { %v4785_v47 = vpop.f32.mrb[12].mxu1 }
 0x1c1   : > { %v1547_v48 = vpop.f32.mrb[13].mxu1 }
 0x1c4   : > { %v6299_v49 = vpop.f32.mrb[14].mxu1 }
 0x1c5   : > { %v6301_v50 = vpop.f32.mrb[15].mxu1 }
 0x1c8   : > { %v5017_v51 = vpop.f32.mrb[0].mxu0 }
 0x1c9   : > { %v5065_v52 = vadd.f32 %v5017_v51, %v4767_v34  ;;  %v3438_v53 = vpop.f32.mrb[1].mxu0 }
 0x1ca   : > { %v5066_v54 = vadd.f32 %v3438_v53, %v1487_v35 }
 0x1cb   : > { %v3662_v56 = vmul.f32 %v5065_v52, %v5065_v52 }
 0x1cc   : > { %v3629_v58 = vadd.f32 %v5066_v54, %v5065_v52  ;;  %v3661_v59 = vmul.f32 %v5066_v54, %v5066_v54  ;;  %v5020_v60 = vpop.f32.mrb[2].mxu0 }
 0x1cd   : > { %v5067_v62 = vadd.f32 %v5020_v60, %v4770_v36  ;;  %v3448_v63 = vpop.f32.mrb[3].mxu0 }
 0x1ce   : > { %v3693_v0 = vadd.f32 %v3662_v56, %v3661_v59  ;;  %v5068_v2 = vadd.f32 %v3448_v63, %v1497_v38 }
 0x1cf   : > { %v3664_v10 = vmul.f32 %v5067_v62, %v5067_v62 }
 0x1d0   : > { %v3630_v4 = vadd.f32 %v5068_v2, %v3629_v58  ;;  %v3663_v5 = vmul.f32 %v5068_v2, %v5068_v2  ;;  %v5023_v6 = vpop.f32.mrb[4].mxu0 }
 0x1d1   : > { %v5069_v7 = vadd.f32 %v5023_v6, %v4773_v39  ;;  %v3458_v9 = vpop.f32.mrb[5].mxu0 }
 0x1d2   : > { %v3694_v55 = vadd.f32 %v3693_v0, %v3663_v5  ;;  %v5070_v57 = vadd.f32 %v3458_v9, %v1507_v40  ;;  %v3631_v28 = vadd.f32 %v5067_v62, %v3630_v4 }
 0x1d3   : > { %v3666_v17 = vmul.f32 %v5069_v7, %v5069_v7 }
 0x1d4   : > { %v3632_v24 = vadd.f32 %v5070_v57, %v3631_v28  ;;  %v3665_v25 = vmul.f32 %v5070_v57, %v5070_v57  ;;  %v3695_v8 = vadd.f32 %v3694_v55, %v3664_v10  ;;  %v5026_v11 = vpop.f32.mrb[6].mxu0 }
 0x1d5   : > { %v5071_v13 = vadd.f32 %v5026_v11, %v4776_v41  ;;  %v3468_v15 = vpop.f32.mrb[7].mxu0 }
 0x1d6   : > { %v3696_v19 = vadd.f32 %v3695_v8, %v3665_v25  ;;  %v5072_v21 = vadd.f32 %v3468_v15, %v1517_v42  ;;  %v3633_v22 = vadd.f32 %v5069_v7, %v3632_v24 }
 0x1d7   : > { %v3668_v3 = vmul.f32 %v5071_v13, %v5071_v13 }
 0x1d8   : > { %v3634_v37 = vadd.f32 %v5072_v21, %v3633_v22  ;;  %v3667_v33 = vmul.f32 %v5072_v21, %v5072_v21  ;;  %v3697_v12 = vadd.f32 %v3696_v19, %v3666_v17  ;;  %v5029_v16 = vpop.f32.mrb[8].mxu0 }
 0x1d9   : > { %v5073_v20 = vadd.f32 %v5029_v16, %v4779_v43  ;;  %v3478_v1 = vpop.f32.mrb[9].mxu0 }
 0x1da   : > { %v3698_v61 = vadd.f32 %v3697_v12, %v3667_v33  ;;  %v5074_v14 = vadd.f32 %v3478_v1, %v1527_v44  ;;  %v3635_v18 = vadd.f32 %v5071_v13, %v3634_v37 }
 0x1db   : > { %v3670_v32 = vmul.f32 %v5073_v20, %v5073_v20 }
 0x1dc   : > { %v3636_v23 = vadd.f32 %v5074_v14, %v3635_v18  ;;  %v3669_v26 = vmul.f32 %v5074_v14, %v5074_v14  ;;  %v3699_v27 = vadd.f32 %v3698_v61, %v3668_v3  ;;  %v5032_v29 = vpop.f32.mrb[10].mxu0 }
 0x1dd   : > { %v5075_v30 = vadd.f32 %v5032_v29, %v4782_v45  ;;  %v3488_v31 = vpop.f32.mrb[11].mxu0 }
 0x1de   : > { %v3700_v34 = vadd.f32 %v3699_v27, %v3669_v26  ;;  %v5076_v35 = vadd.f32 %v3488_v31, %v1537_v46  ;;  %v3637_v36 = vadd.f32 %v5073_v20, %v3636_v23 }
 0x1df   : > { %v3672_v51 = vmul.f32 %v5075_v30, %v5075_v30 }
 0x1e0   : > { %v3638_v38 = vadd.f32 %v5076_v35, %v3637_v36  ;;  %v3671_v39 = vmul.f32 %v5076_v35, %v5076_v35  ;;  %v3701_v40 = vadd.f32 %v3700_v34, %v3670_v32  ;;  %v5035_v41 = vpop.f32.mrb[12].mxu0 }
 0x1e1   : > { %v5077_v42 = vadd.f32 %v5035_v41, %v4785_v47  ;;  %v3498_v43 = vpop.f32.mrb[13].mxu0 }
 0x1e2   : > { %v3702_v52 = vadd.f32 %v3701_v40, %v3671_v39  ;;  %v5078_v44 = vadd.f32 %v3498_v43, %v1547_v48  ;;  %v3639_v53 = vadd.f32 %v5075_v30, %v3638_v38 }
 0x1e3   : > { %v3674_v62 = vmul.f32 %v5077_v42, %v5077_v42 }
 0x1e4   : > { %v3640_v54 = vadd.f32 %v5078_v44, %v3639_v53  ;;  %v3673_v56 = vmul.f32 %v5078_v44, %v5078_v44  ;;  %v3703_v58 = vadd.f32 %v3702_v52, %v3672_v51  ;;  %v5038_v59 = vpop.f32.mrb[14].mxu0 }
 0x1e5   : > { %v5079_v45 = vadd.f32 %v5038_v59, %v6299_v49  ;;  %v3508_v60 = vpop.f32.mrb[15].mxu0 }
 0x1e6   : > { %v3704_v46 = vadd.f32 %v3703_v58, %v3673_v56  ;;  %v5080_v63 = vadd.f32 %v3508_v60, %v6301_v50  ;;  %v3641_v0 = vadd.f32 %v5077_v42, %v3640_v54 }
 0x1e7   : > { %v3676_v10 = vmul.f32 %v5079_v45, %v5079_v45 }
 0x1e8   : > { %v3642_v2 = vadd.f32 %v5080_v63, %v3641_v0  ;;  %v3675_v4 = vmul.f32 %v5080_v63, %v5080_v63  ;;  %v3705_v47 = vadd.f32 %v3704_v46, %v3674_v62  ;;  %v4841_v5 = vpop.f32.mrb[16].mxu1  ;;  %v5041_v6 = vpop.f32.mrb[16].mxu0 }
 0x1e9   : > { %v5081_v7 = vadd.f32 %v5041_v6, %v4841_v5  ;;  %v1957_v48 = vpop.f32.mrb[17].mxu1  ;;  %v3518_v9 = vpop.f32.mrb[17].mxu0 }
 0x1ea   : > { %v3706_v55 = vadd.f32 %v3705_v47, %v3675_v4  ;;  %v5082_v57 = vadd.f32 %v3518_v9, %v1957_v48  ;;  %v3643_v28 = vadd.f32 %v5079_v45, %v3642_v2 }
 0x1eb   : > { %v3678_v17 = vmul.f32 %v5081_v7, %v5081_v7 }
 0x1ec   : > { %v3644_v24 = vadd.f32 %v5082_v57, %v3643_v28  ;;  %v3677_v49 = vmul.f32 %v5082_v57, %v5082_v57  ;;  %v3707_v25 = vadd.f32 %v3706_v55, %v3676_v10  ;;  %v4844_v8 = vpop.f32.mrb[18].mxu1  ;;  %v5044_v11 = vpop.f32.mrb[18].mxu0 }
 0x1ed   : > { %v5083_v13 = vadd.f32 %v5044_v11, %v4844_v8  ;;  %v1967_v50 = vpop.f32.mrb[19].mxu1  ;;  %v3528_v15 = vpop.f32.mrb[19].mxu0 }
 0x1ee   : > { %v3708_v19 = vadd.f32 %v3707_v25, %v3677_v49  ;;  %v5084_v21 = vadd.f32 %v3528_v15, %v1967_v50  ;;  %v3645_v22 = vadd.f32 %v5081_v7, %v3644_v24 }
 0x1ef   : > { %v3680_v14 = vmul.f32 %v5083_v13, %v5083_v13 }
 0x1f0   : > { %v3646_v37 = vadd.f32 %v5084_v21, %v3645_v22  ;;  %v3679_v33 = vmul.f32 %v5084_v21, %v5084_v21  ;;  %v3709_v12 = vadd.f32 %v3708_v19, %v3678_v17  ;;  %v4847_v16 = vpop.f32.mrb[20].mxu1  ;;  %v5047_v20 = vpop.f32.mrb[20].mxu0 }
 0x1f1   : > { %v5085_v1 = vadd.f32 %v5047_v20, %v4847_v16  ;;  %v1977_v3 = vpop.f32.mrb[21].mxu1  ;;  %v3538_v61 = vpop.f32.mrb[21].mxu0 }
 0x1f2   : > { %v3710_v18 = vadd.f32 %v3709_v12, %v3679_v33  ;;  %v5086_v23 = vadd.f32 %v3538_v61, %v1977_v3  ;;  %v3647_v26 = vadd.f32 %v5083_v13, %v3646_v37 }
 0x1f3   : > { %v3682_v38 = vmul.f32 %v5085_v1, %v5085_v1 }
 0x1f4   : > { %v3648_v27 = vadd.f32 %v5086_v23, %v3647_v26  ;;  %v3681_v29 = vmul.f32 %v5086_v23, %v5086_v23  ;;  %v3711_v30 = vadd.f32 %v3710_v18, %v3680_v14  ;;  %v4850_v31 = vpop.f32.mrb[22].mxu1  ;;  %v5050_v32 = vpop.f32.mrb[22].mxu0 }
 0x1f5   : > { %v5087_v34 = vadd.f32 %v5050_v32, %v4850_v31  ;;  %v1987_v35 = vpop.f32.mrb[23].mxu1  ;;  %v3548_v36 = vpop.f32.mrb[23].mxu0 }
 0x1f6   : > { %v3712_v39 = vadd.f32 %v3711_v30, %v3681_v29  ;;  %v5088_v40 = vadd.f32 %v3548_v36, %v1987_v35  ;;  %v3649_v41 = vadd.f32 %v5085_v1, %v3648_v27 }
 0x1f7   : > { %v3684_v58 = vmul.f32 %v5087_v34, %v5087_v34 }
 0x1f8   : > { %v3650_v42 = vadd.f32 %v5088_v40, %v3649_v41  ;;  %v3683_v43 = vmul.f32 %v5088_v40, %v5088_v40  ;;  %v3713_v51 = vadd.f32 %v3712_v39, %v3682_v38  ;;  %v4853_v52 = vpop.f32.mrb[24].mxu1  ;;  %v5053_v44 = vpop.f32.mrb[24].mxu0 }
 0x1f9   : > { %v5089_v53 = vadd.f32 %v5053_v44, %v4853_v52  ;;  %v1997_v54 = vpop.f32.mrb[25].mxu1  ;;  %v3558_v56 = vpop.f32.mrb[25].mxu0 }
 0x1fa   : > { %v3714_v59 = vadd.f32 %v3713_v51, %v3683_v43  ;;  %v5090_v45 = vadd.f32 %v3558_v56, %v1997_v54  ;;  %v3651_v60 = vadd.f32 %v5087_v34, %v3650_v42 }
 0x1fb   : > { %v3686_v6 = vmul.f32 %v5089_v53, %v5089_v53 }
 0x1fc   : > { %v3652_v62 = vadd.f32 %v5090_v45, %v3651_v60  ;;  %v3685_v46 = vmul.f32 %v5090_v45, %v5090_v45  ;;  %v3715_v63 = vadd.f32 %v3714_v59, %v3684_v58  ;;  %v4856_v0 = vpop.f32.mrb[26].mxu1  ;;  %v5056_v2 = vpop.f32.mrb[26].mxu0 }
 0x1fd   : > { %v5091_v4 = vadd.f32 %v5056_v2, %v4856_v0  ;;  %v2007_v47 = vpop.f32.mrb[27].mxu1  ;;  %v3568_v5 = vpop.f32.mrb[27].mxu0 }
 0x1fe   : > { %v3716_v7 = vadd.f32 %v3715_v63, %v3685_v46  ;;  %v5092_v48 = vadd.f32 %v3568_v5, %v2007_v47  ;;  %v3653_v9 = vadd.f32 %v5089_v53, %v3652_v62 }
 0x1ff   : > { %v3688_v11 = vmul.f32 %v5091_v4, %v5091_v4 }
 0x200   : > { %v3654_v10 = vadd.f32 %v5092_v48, %v3653_v9  ;;  %v3687_v55 = vmul.f32 %v5092_v48, %v5092_v48  ;;  %v3717_v57 = vadd.f32 %v3716_v7, %v3686_v6  ;;  %v4859_v28 = vpop.f32.mrb[28].mxu1  ;;  %v5059_v24 = vpop.f32.mrb[28].mxu0 }
 0x201   : > { %v5093_v49 = vadd.f32 %v5059_v24, %v4859_v28  ;;  %v2017_v25 = vpop.f32.mrb[29].mxu1  ;;  %v3578_v8 = vpop.f32.mrb[29].mxu0 }
 0x202   : > { %v3718_v13 = vadd.f32 %v3717_v57, %v3687_v55  ;;  %v5094_v50 = vadd.f32 %v3578_v8, %v2017_v25  ;;  %v3655_v15 = vadd.f32 %v5091_v4, %v3654_v10 }
 0x203   : > { %v3690_v20 = vmul.f32 %v5093_v49, %v5093_v49 }
 0x204   : > { %v3656_v17 = vadd.f32 %v5094_v50, %v3655_v15  ;;  %v3689_v19 = vmul.f32 %v5094_v50, %v5094_v50  ;;  %v3719_v21 = vadd.f32 %v3718_v13, %v3688_v11  ;;  %v4862_v22 = vpop.f32.mrb[30].mxu1  ;;  %v5062_v37 = vpop.f32.mrb[30].mxu0 }
 0x205   : > { %v5095_v33 = vadd.f32 %v5062_v37, %v4862_v22  ;;  %v2027_v12 = vpop.f32.mrb[31].mxu1  ;;  %v3588_v16 = vpop.f32.mrb[31].mxu0 }
 0x206   : > { %v3720_v1 = vadd.f32 %v3719_v21, %v3689_v19  ;;  %v5096_v3 = vadd.f32 %v3588_v16, %v2027_v12  ;;  %v3657_v61 = vadd.f32 %v5093_v49, %v3656_v17 }
 0x207   : > { %v3692_v26 = vmul.f32 %v5095_v33, %v5095_v33 }
 0x208   : > { %v3658_v14 = vadd.f32 %v5096_v3, %v3657_v61  ;;  %v3691_v18 = vmul.f32 %v5096_v3, %v5096_v3  ;;  %v3721_v23 = vadd.f32 %v3720_v1, %v3690_v20 }
 0x20a   : > { %v3659_v27 = vadd.f32 %v5095_v33, %v3658_v14  ;;  %v3722_v29 = vadd.f32 %v3721_v23, %v3691_v18 }
 0x20c   : > { %3660 = vst [vmem:[%s175_s14] sm:$0xff] %v3659_v27  ;;  %v3723_v30 = vadd.f32 %v3722_v29, %v3692_v26 }
 0x20e   : > { %3724 = vst [vmem:[%s179_s17] sm:$0xff] %v3723_v30 }
 0x20f PF: > { %s14_s12 = sadd.s32 1, %s5336_s12  }
 0x210   : > { %p11_p4 = scmp.ge.s32.totalorder %s14_s12, 4  }
 0x212   :  { %13 = sbr.rel (!%p11_p4) target bundleno = 1 (0x1), region = 80 }

// kernel: conv_norm_act.3
= control target key start
LH: loop header
LB: loop body
LE: loop exit
PB: predicated region body
PF: predicated region fallthrough
CT: control target
= control target key end

     0   :  { %s5401_s15 = smov 0   ;;  %s6475_s0 = inlined_call_operand.vmem [shape: f32[2,18,18,4], index: 0, kind: input, shape index: {}]   ;;  %s6476_s1 = inlined_call_operand.vmem [shape: f32[9,4,128], index: 1, kind: input, shape index: {}]   ;;  %s6477_s2 = inlined_call_operand.vmem [shape: f32[1,128], index: 2, kind: input, shape index: {}]   ;;  %s6478_s3 = inlined_call_operand.vmem [shape: f32[1,128], index: 3, kind: input, shape index: {}]   ;;  %s6479_s4 = inlined_call_operand.vmem [shape: f32[2,256,128], index: 4, kind: output, shape index: {}]  }
   0x1 LB: > { %s3844_s16 = sadd.s32 4294967295, %s5374_s15   ;;  %p3848_p0 = scmp.ge.s32.totalorder %s5374_s15, 1  ;;  %s5374_s15 = sphi %s5401_s15, %s14_s15  }
   0x2   : > { %p162_p1 = scmp.lt.s32.totalorder %s5374_s15, 3 }
   0x4   : > { %p163_p2 = pnand %p3848_p0, %p162_p1 }
   0x6   : > { %166 = sbr.rel (%p163_p2) target bundleno = 527 (0x20f), region = 36 }
   0xd   : > { %v3852_v0 = vld [vmem:[%s6476_s1 + $0x4] sm:$0xf]  ;;  %vm362_vm0 = vcmask 1043456   ;;  %v5415_v1 = vld [vmem:[%s6476_s1 + $0x10] sm:$0xf]  ;;  %p188_p3 = scmp.lt.s32.totalorder %s3844_s16, 1 }
   0xe   : > { %4651 = vmatprep.subr.msk.mxu1 %vm362_vm0, %v3852_v0  ;;  %4851 = vmatprep.subr.msk.mxu0 %vm362_vm0, %v5415_v1  ;;  %v230_v2 = vld [vmem:[%s6476_s1] sm:$0xf]  ;;  %v4117_v3 = vld [vmem:[%s6476_s1 + $0x14] sm:$0xf]  ;;  %vm265_vm1 = vcmask 31744  }
   0xf   : > { %4652 = vmatpush3.msk.msra.mxu1 %vm362_vm0, %v3852_v0  ;;  %4852 = vmatpush3.msk.msra.mxu0 %vm362_vm0, %v5415_v1  ;;  %s6590_s16 = smov (!%p188_p3, %s3844_s16), 1  ;;  %v4183_v9 = vld [vmem:[%s6476_s1 + $0x18] sm:$0xf]  ;;  %v5456_v10 = vld [vmem:[%s6476_s1 + $0x8] sm:$0xf] }
  0x10   : > { %4701 = vmatprep.subr.msk.mxu1 %vm362_vm0, %v230_v2  ;;  %4901 = vmatprep.subr.msk.mxu0 %vm362_vm0, %v4117_v3  ;;  %s5359_s25 = smul.u32 432, %s6590_s16  ;;  %v5575_v28 = vld [vmem:[%s6476_s1 + $0x1c] sm:$0xf]  ;;  %v5738_v61 = vld [vmem:[%s6476_s1 + $0xc] sm:$0xf]  ;;  %s4353_s19 = sshll.u32 %s6590_s16, 8 }
  0x11   : > { %s6371_s22 = scalar_lea.vmem %s6479_s4, %s4353_s19 }
  0x12   : > { %s5437_s28 = scalar_lea.vmem %s6475_s0, %s5359_s25 }
  0x13   : > { %v231_v4 = vld [vmem:[%s5437_s28 + $0x1] sm:$0xff]  ;;  %v4019_v5 = vld [vmem:[%s5437_s28 + $0x19] sm:$0xff]  ;;  %v232_v6 = vld [vmem:[%s5437_s28 + $0x9] sm:$0xff] }
  0x14   : > { %4653 = vmatprep.mubr.msk.f32.mxu1 %vm265_vm1, %v231_v4  ;;  %4853 = vmatprep.mubr.msk.f32.mxu0 %vm265_vm1, %v4019_v5  ;;  %v4020_v7 = vld [vmem:[%s5437_s28 + $0x21] sm:$0xff]  ;;  %v5446_v8 = vld [vmem:[%s5437_s28 + $0x31] sm:$0xff]  ;;  %v5461_v11 = vld [vmem:[%s5437_s28 + $0x39] sm:$0xff] }
  0x15   : > { %4654 = vmatmul.mubr.msk.f32.vlgmr.msra.gmra.mrb[0].mxu1 %vm265_vm1, %v232_v6  ;;  %4854 = vmatmul.mubr.msk.f32.vlgmr.msra.gmra.mrb[0].mxu0 %vm265_vm1, %v4020_v7  ;;  %v5467_v12 = vld [vmem:[%s5437_s28 + $0x49] sm:$0xff]  ;;  %v5480_v13 = vld [vmem:[%s5437_s28 + $0x51] sm:$0xff]  ;;  %v5483_v14 = vld [vmem:[%s5437_s28 + $0x61] sm:$0xff] }
  0x16   : > { %4702 = vmatpush3.msk.msra.mxu1 %vm362_vm0, %v230_v2  ;;  %4902 = vmatpush3.msk.msra.mxu0 %vm362_vm0, %v4117_v3  ;;  %v5494_v15 = vld [vmem:[%s5437_s28 + $0x69] sm:$0xff]  ;;  %v5497_v16 = vld [vmem:[%s5437_s28 + $0x79] sm:$0xff]  ;;  %v5508_v17 = vld [vmem:[%s5437_s28 + $0x81] sm:$0xff] }
  0x17   : > { %4656 = vmatprep.mubr.msk.f32.mxu1 %vm265_vm1, %v4019_v5  ;;  %4856 = vmatprep.mubr.msk.f32.mxu0 %vm265_vm1, %v5446_v8  ;;  %v5511_v18 = vld [vmem:[%s5437_s28 + $0x91] sm:$0xff]  ;;  %v5522_v19 = vld [vmem:[%s5437_s28 + $0x99] sm:$0xff]  ;;  %v5525_v20 = vld [vmem:[%s5437_s28 + $0xa9] sm:$0xff] }
  0x18   : > { %4951 = vmatprep.subr.msk.mxu0 %vm362_vm0, %v4183_v9  ;;  %4751 = vmatprep.subr.msk.mxu1 %vm362_vm0, %v5456_v10  ;;  %v5536_v21 = vld [vmem:[%s5437_s28 + $0xb1] sm:$0xff]  ;;  %v5539_v22 = vld [vmem:[%s5437_s28 + $0xc1] sm:$0xff]  ;;  %v5550_v23 = vld [vmem:[%s5437_s28 + $0xc9] sm:$0xff] }
  0x19   : > { %4657 = vmatmul.mubr.msk.f32.gmra.mrb[2].mxu1 %vm265_vm1, %v4020_v7  ;;  %4857 = vmatmul.mubr.msk.f32.gmra.mrb[2].mxu0 %vm265_vm1, %v5461_v11  ;;  %v5553_v24 = vld [vmem:[%s5437_s28 + $0x1a] sm:$0xff]  ;;  %v5564_v25 = vld [vmem:[%s5437_s28 + $0x22] sm:$0xff]  ;;  %v5570_v27 = vld [vmem:[%s5437_s28 + $0x32] sm:$0xff] }
  0x1a   : > { %4659 = vmatprep.mubr.msk.f32.mxu1 %vm265_vm1, %v5446_v8  ;;  %4859 = vmatprep.mubr.msk.f32.mxu0 %vm265_vm1, %v5467_v12  ;;  %v5567_v26 = vld [vmem:[%s5437_s28 + $0xd9] sm:$0xff]  ;;  %v5585_v29 = vld [vmem:[%s5437_s28 + $0xe1] sm:$0xff]  ;;  %v5593_v31 = vld [vmem:[%s5437_s28 + $0xf1] sm:$0xff] }
  0x1b   : > { %6525 = vst [vmem:[#allocation2_spill] sm:$0xff] %v5585_v29  ;;  %v5588_v30 = vld [vmem:[%s5437_s28 + $0x3a] sm:$0xff]  ;;  %6526 = vst [vmem:[#allocation3_spill] sm:$0xff] %v5593_v31  ;;  %v5596_v32 = vld [vmem:[%s5437_s28 + $0x4a] sm:$0xff] }
  0x1c   : > { %v5609_v33 = vld [vmem:[%s5437_s28 + $0xf9] sm:$0xff]  ;;  %v5615_v35 = vld [vmem:[%s5437_s28 + $0x109] sm:$0xff]  ;;  %v5629_v37 = vld [vmem:[%s5437_s28 + $0x111] sm:$0xff] }
  0x1d   : > { %4660 = vmatmul.mubr.msk.f32.gmra.mrb[4].mxu1 %vm265_vm1, %v5461_v11  ;;  %4860 = vmatmul.mubr.msk.f32.gmra.mrb[4].mxu0 %vm265_vm1, %v5480_v13  ;;  %6527 = vst [vmem:[#allocation4_spill] sm:$0xff] %v5609_v33  ;;  %v5612_v34 = vld [vmem:[%s5437_s28 + $0x52] sm:$0xff]  ;;  %6528 = vst [vmem:[#allocation5_spill] sm:$0xff] %v5615_v35  ;;  %v5618_v36 = vld [vmem:[%s5437_s28 + $0x62] sm:$0xff] }
  0x1e   : > { %4662 = vmatprep.mubr.msk.f32.mxu1 %vm265_vm1, %v5467_v12  ;;  %4862 = vmatprep.mubr.msk.f32.mxu0 %vm265_vm1, %v5483_v14  ;;  %6529 = vst [vmem:[#allocation6_spill] sm:$0xff] %v5629_v37  ;;  %v5632_v38 = vld [vmem:[%s5437_s28 + $0x6a] sm:$0xff]  ;;  %v5635_v39 = vld [vmem:[%s5437_s28 + $0x121] sm:$0xff]  ;;  %v5655_v43 = vld [vmem:[%s5437_s28 + $0x139] sm:$0xff] }
  0x1f   : > { %6530 = vst [vmem:[#allocation7_spill] sm:$0xff] %v5635_v39  ;;  %v5638_v40 = vld [vmem:[%s5437_s28 + $0x7a] sm:$0xff]  ;;  %v5649_v41 = vld [vmem:[%s5437_s28 + $0x129] sm:$0xff]  ;;  %6532 = vst [vmem:[#allocation9_spill] sm:$0xff] %v5655_v43 }
  0x20   : > { %6531 = vst [vmem:[#allocation8_spill] sm:$0xff] %v5649_v41  ;;  %v5652_v42 = vld [vmem:[%s5437_s28 + $0x82] sm:$0xff]  ;;  %v5658_v44 = vld [vmem:[%s5437_s28 + $0x92] sm:$0xff]  ;;  %v5672_v46 = vld [vmem:[%s5437_s28 + $0x9a] sm:$0xff] }
  0x21   : > { %4663 = vmatmul.mubr.msk.f32.gmra.mrb[6].mxu1 %vm265_vm1, %v5480_v13  ;;  %4863 = vmatmul.mubr.msk.f32.gmra.mrb[6].mxu0 %vm265_vm1, %v5494_v15  ;;  %v5669_v45 = vld [vmem:[%s5437_s28 + $0x141] sm:$0xff]  ;;  %v5675_v47 = vld [vmem:[%s5437_s28 + $0x151] sm:$0xff]  ;;  %v5689_v49 = vld [vmem:[%s5437_s28 + $0x159] sm:$0xff] }
  0x22   : > { %4665 = vmatprep.mubr.msk.f32.mxu1 %vm265_vm1, %v5483_v14  ;;  %4865 = vmatprep.mubr.msk.f32.mxu0 %vm265_vm1, %v5497_v16  ;;  %6533 = vst [vmem:[#allocation10_spill] sm:$0xff] %v5669_v45  ;;  %6534 = vst [vmem:[#allocation11_spill] sm:$0xff] %v5675_v47  ;;  %v5678_v48 = vld [vmem:[%s5437_s28 + $0xaa] sm:$0xff]  ;;  %v5692_v50 = vld [vmem:[%s5437_s28 + $0xb2] sm:$0xff] }
  0x23   : > { %6535 = vst [vmem:[#allocation12_spill] sm:$0xff] %v5689_v49  ;;  %v5695_v51 = vld [vmem:[%s5437_s28 + $0x169] sm:$0xff]  ;;  %v5709_v53 = vld [vmem:[%s5437_s28 + $0x171] sm:$0xff]  ;;  %v198_v55 = vld [vmem:[%s5437_s28] sm:$0xff] }
  0x24   : > { %6536 = vst [vmem:[#allocation13_spill] sm:$0xff] %v5695_v51  ;;  %v5698_v52 = vld [vmem:[%s5437_s28 + $0xc2] sm:$0xff]  ;;  %6537 = vst [vmem:[#allocation14_spill] sm:$0xff] %v5709_v53  ;;  %v5712_v54 = vld [vmem:[%s5437_s28 + $0xca] sm:$0xff] }
  0x25   : > { %4666 = vmatmul.mubr.msk.f32.gmra.mrb[8].mxu1 %vm265_vm1, %v5494_v15  ;;  %4866 = vmatmul.mubr.msk.f32.gmra.mrb[8].mxu0 %vm265_vm1, %v5508_v17  ;;  %v5716_v56 = vld [vmem:[%s5437_s28 + $0xda] sm:$0xff]  ;;  %v199_v57 = vld [vmem:[%s5437_s28 + $0x8] sm:$0xff]  ;;  %v5733_v60 = vld [vmem:[%s5437_s28 + $0xf2] sm:$0xff] }
  0x26   : > { %4668 = vmatprep.mubr.msk.f32.mxu1 %vm265_vm1, %v5497_v16  ;;  %4868 = vmatprep.mubr.msk.f32.mxu0 %vm265_vm1, %v5511_v18  ;;  %v5727_v58 = vld [vmem:[%s5437_s28 + $0xe2] sm:$0xff]  ;;  %v5730_v59 = vld [vmem:[%s5437_s28 + $0x18] sm:$0xff]  ;;  %v5756_v0 = vld [vmem:[%s5437_s28 + $0x30] sm:$0xff] }
  0x27   : > { %6538 = vst [vmem:[#allocation15_spill] sm:$0xff] %v5730_v59  ;;  %v5748_v62 = vld [vmem:[%s5437_s28 + $0x20] sm:$0xff]  ;;  %6540 = vst [vmem:[#allocation17_spill] sm:$0xff] %v5756_v0  ;;  %v5759_v2 = vld [vmem:[%s5437_s28 + $0x10a] sm:$0xff] }
  0x28   : > { %6539 = vst [vmem:[#allocation16_spill] sm:$0xff] %v5748_v62  ;;  %v5751_v63 = vld [vmem:[%s5437_s28 + $0xfa] sm:$0xff]  ;;  %v5775_v4 = vld [vmem:[%s5437_s28 + $0x112] sm:$0xff]  ;;  %v5778_v5 = vld [vmem:[%s5437_s28 + $0x48] sm:$0xff] }
  0x29   : > { %4669 = vmatmul.mubr.msk.f32.gmra.mrb[10].mxu1 %vm265_vm1, %v5508_v17  ;;  %4869 = vmatmul.mubr.msk.f32.gmra.mrb[10].mxu0 %vm265_vm1, %v5522_v19  ;;  %v5772_v3 = vld [vmem:[%s5437_s28 + $0x38] sm:$0xff]  ;;  %6542 = vst [vmem:[#allocation19_spill] sm:$0xff] %v5778_v5  ;;  %v5781_v6 = vld [vmem:[%s5437_s28 + $0x122] sm:$0xff]  ;;  %v5792_v7 = vld [vmem:[%s5437_s28 + $0x50] sm:$0xff] }
  0x2a   : > { %4671 = vmatprep.mubr.msk.f32.mxu1 %vm265_vm1, %v5511_v18  ;;  %4871 = vmatprep.mubr.msk.f32.mxu0 %vm265_vm1, %v5525_v20  ;;  %6541 = vst [vmem:[#allocation18_spill] sm:$0xff] %v5772_v3  ;;  %6543 = vst [vmem:[#allocation20_spill] sm:$0xff] %v5792_v7 }
  0x2d   : > { %4672 = vmatmul.mubr.msk.f32.gmra.mrb[12].mxu1 %vm265_vm1, %v5522_v19  ;;  %4872 = vmatmul.mubr.msk.f32.gmra.mrb[12].mxu0 %vm265_vm1, %v5536_v21 }
  0x2e   : > { %4674 = vmatprep.mubr.msk.f32.mxu1 %vm265_vm1, %v5525_v20  ;;  %4874 = vmatprep.mubr.msk.f32.mxu0 %vm265_vm1, %v5539_v22 }
  0x31   : > { %4675 = vmatmul.mubr.msk.f32.gmra.mrb[14].mxu1 %vm265_vm1, %v5536_v21  ;;  %4875 = vmatmul.mubr.msk.f32.gmra.mrb[14].mxu0 %vm265_vm1, %v5550_v23 }
  0x32   : > { %4677 = vmatprep.mubr.msk.f32.mxu1 %vm265_vm1, %v5539_v22  ;;  %4903 = vmatprep.mubr.msk.f32.mxu0 %vm265_vm1, %v5553_v24 }
  0x35   : > { %4678 = vmatmul.mubr.msk.f32.gmra.mrb[16].mxu1 %vm265_vm1, %v5550_v23  ;;  %4904 = vmatmul.mubr.msk.f32.vlgmr.msra.gmra.mrb[0].mxu0 %vm265_vm1, %v5564_v25 }
  0x36   : > { %4952 = vmatpush3.msk.msra.mxu0 %vm362_vm0, %v4183_v9  ;;  %4680 = vmatprep.mubr.msk.f32.mxu1 %vm265_vm1, %v5567_v26  ;;  %v5795_v9 = vld [vmem:[%s5437_s28 + $0x12a] sm:$0xff] }
  0x37   : > { %4906 = vmatprep.mubr.msk.f32.mxu0 %vm265_vm1, %v5570_v27  ;;  %5001 = vmatprep.subr.msk.mxu0 %vm362_vm0, %v5575_v28 }
  0x39   : > { %4681 = vmatmul.mubr.msk.f32.gmra.mrb[18].mxu1 %vm265_vm1, %v5585_v29  ;;  %4907 = vmatmul.mubr.msk.f32.gmra.mrb[2].mxu0 %vm265_vm1, %v5588_v30  ;;  %v5892_v29 = vld [vmem:[%s5437_s28 + $0xd8] sm:$0xff] }
  0x3a   : > { %4683 = vmatprep.mubr.msk.f32.mxu1 %vm265_vm1, %v5593_v31  ;;  %4909 = vmatprep.mubr.msk.f32.mxu0 %vm265_vm1, %v5596_v32  ;;  %v5875_v31 = vld [vmem:[%s5437_s28 + $0x18a] sm:$0xff] }
  0x3b   : > { %6554 = vst [vmem:[#allocation31_spill] sm:$0xff] %v5875_v31 }
  0x3d   : > { %4684 = vmatmul.mubr.msk.f32.gmra.mrb[20].mxu1 %vm265_vm1, %v5609_v33  ;;  %4910 = vmatmul.mubr.msk.f32.gmra.mrb[4].mxu0 %vm265_vm1, %v5612_v34  ;;  %v5861_v33 = vld [vmem:[%s5437_s28 + $0x182] sm:$0xff] }
  0x3e   : > { %4686 = vmatprep.mubr.msk.f32.mxu1 %vm265_vm1, %v5615_v35  ;;  %4912 = vmatprep.mubr.msk.f32.mxu0 %vm265_vm1, %v5618_v36  ;;  %v5858_v35 = vld [vmem:[%s5437_s28 + $0xa8] sm:$0xff]  ;;  %6552 = vst [vmem:[#allocation29_spill] sm:$0xff] %v5861_v33 }
  0x3f   : > { %6551 = vst [vmem:[#allocation28_spill] sm:$0xff] %v5858_v35 }
  0x41   : > { %4687 = vmatmul.mubr.msk.f32.gmra.mrb[22].mxu1 %vm265_vm1, %v5629_v37  ;;  %4913 = vmatmul.mubr.msk.f32.gmra.mrb[6].mxu0 %vm265_vm1, %v5632_v38  ;;  %v5855_v37 = vld [vmem:[%s5437_s28 + $0x172] sm:$0xff] }
  0x42   : > { %4689 = vmatprep.mubr.msk.f32.mxu1 %vm265_vm1, %v5635_v39  ;;  %4915 = vmatprep.mubr.msk.f32.mxu0 %vm265_vm1, %v5638_v40  ;;  %v5852_v39 = vld [vmem:[%s5437_s28 + $0x98] sm:$0xff]  ;;  %6550 = vst [vmem:[#allocation27_spill] sm:$0xff] %v5855_v37 }
  0x43   : > { %6549 = vst [vmem:[#allocation26_spill] sm:$0xff] %v5852_v39 }
  0x45   : > { %4690 = vmatmul.mubr.msk.f32.gmra.mrb[24].mxu1 %vm265_vm1, %v5649_v41  ;;  %4916 = vmatmul.mubr.msk.f32.gmra.mrb[8].mxu0 %vm265_vm1, %v5652_v42  ;;  %v5841_v41 = vld [vmem:[%s5437_s28 + $0x16a] sm:$0xff] }
  0x46   : > { %4692 = vmatprep.mubr.msk.f32.mxu1 %vm265_vm1, %v5655_v43  ;;  %4918 = vmatprep.mubr.msk.f32.mxu0 %vm265_vm1, %v5658_v44  ;;  %v5838_v43 = vld [vmem:[%s5437_s28 + $0x90] sm:$0xff] }
  0x47   : > { %6548 = vst [vmem:[#allocation25_spill] sm:$0xff] %v5838_v43 }
  0x49   : > { %4693 = vmatmul.mubr.msk.f32.gmra.mrb[26].mxu1 %vm265_vm1, %v5669_v45  ;;  %4919 = vmatmul.mubr.msk.f32.gmra.mrb[10].mxu0 %vm265_vm1, %v5672_v46  ;;  %v5835_v45 = vld [vmem:[%s5437_s28 + $0x15a] sm:$0xff] }
  0x4a   : > { %4695 = vmatprep.mubr.msk.f32.mxu1 %vm265_vm1, %v5675_v47  ;;  %4921 = vmatprep.mubr.msk.f32.mxu0 %vm265_vm1, %v5678_v48  ;;  %v5832_v47 = vld [vmem:[%s5437_s28 + $0x80] sm:$0xff] }
  0x4b   : > { %6547 = vst [vmem:[#allocation24_spill] sm:$0xff] %v5832_v47 }
  0x4d   : > { %4696 = vmatmul.mubr.msk.f32.gmra.mrb[28].mxu1 %vm265_vm1, %v5689_v49  ;;  %4922 = vmatmul.mubr.msk.f32.gmra.mrb[12].mxu0 %vm265_vm1, %v5692_v50  ;;  %v5821_v49 = vld [vmem:[%s5437_s28 + $0x152] sm:$0xff] }
  0x4e   : > { %4698 = vmatprep.mubr.msk.f32.mxu1 %vm265_vm1, %v5695_v51  ;;  %4924 = vmatprep.mubr.msk.f32.mxu0 %vm265_vm1, %v5698_v52  ;;  %v5818_v51 = vld [vmem:[%s5437_s28 + $0x78] sm:$0xff] }
  0x4f   : > { %6546 = vst [vmem:[#allocation23_spill] sm:$0xff] %v5818_v51 }
  0x51   : > { %4699 = vmatmul.mubr.msk.f32.gmra.mrb[30].mxu1 %vm265_vm1, %v5709_v53  ;;  %4925 = vmatmul.mubr.msk.f32.gmra.mrb[14].mxu0 %vm265_vm1, %v5712_v54  ;;  %v5815_v53 = vld [vmem:[%s5437_s28 + $0x142] sm:$0xff] }
  0x52   : > { %4703 = vmatprep.mubr.msk.f32.mxu1 %vm265_vm1, %v198_v55  ;;  %4927 = vmatprep.mubr.msk.f32.mxu0 %vm265_vm1, %v5716_v56  ;;  %v5801_v55 = vld [vmem:[%s5437_s28 + $0x13a] sm:$0xff] }
  0x55   : > { %4704 = vmatmul.mubr.msk.f32.vlgmr.msra.gmra.mrb[0].mxu1 %vm265_vm1, %v199_v57  ;;  %4928 = vmatmul.mubr.msk.f32.gmra.mrb[16].mxu0 %vm265_vm1, %v5727_v58  ;;  %v5812_v57 = vld [vmem:[%s5437_s28 + $0x68] sm:$0xff] }
  0x56   : > { %4752 = vmatpush3.msk.msra.mxu1 %vm362_vm0, %v5456_v10  ;;  %4706 = vmatprep.mubr.msk.f32.mxu1 %vm265_vm1, %v5730_v59  ;;  %v5798_v10 = vld [vmem:[%s5437_s28 + $0x60] sm:$0xff]  ;;  %6545 = vst [vmem:[#allocation22_spill] sm:$0xff] %v5812_v57 }
  0x57   : > { %4930 = vmatprep.mubr.msk.f32.mxu0 %vm265_vm1, %v5733_v60  ;;  %4801 = vmatprep.subr.msk.mxu1 %vm362_vm0, %v5738_v61  ;;  %6544 = vst [vmem:[#allocation21_spill] sm:$0xff] %v5798_v10  ;;  %v5878_v59 = vld [vmem:[%s5437_s28 + $0xc0] sm:$0xff] }
  0x59   : > { %4707 = vmatmul.mubr.msk.f32.gmra.mrb[2].mxu1 %vm265_vm1, %v5748_v62  ;;  %4931 = vmatmul.mubr.msk.f32.gmra.mrb[18].mxu0 %vm265_vm1, %v5751_v63  ;;  %v5872_v62 = vld [vmem:[%s5437_s28 + $0xb0] sm:$0xff] }
  0x5a   : > { %4709 = vmatprep.mubr.msk.f32.mxu1 %vm265_vm1, %v5756_v0  ;;  %4933 = vmatprep.mubr.msk.f32.mxu0 %vm265_vm1, %v5759_v2  ;;  %6553 = vst [vmem:[#allocation30_spill] sm:$0xff] %v5872_v62 }
  0x5d   : > { %4710 = vmatmul.mubr.msk.f32.gmra.mrb[4].mxu1 %vm265_vm1, %v5772_v3  ;;  %4934 = vmatmul.mubr.msk.f32.gmra.mrb[20].mxu0 %vm265_vm1, %v5775_v4 }
  0x5e   : > { %4712 = vmatprep.mubr.msk.f32.mxu1 %vm265_vm1, %v5778_v5  ;;  %4936 = vmatprep.mubr.msk.f32.mxu0 %vm265_vm1, %v5781_v6 }
  0x61   : > { %4713 = vmatmul.mubr.msk.f32.gmra.mrb[6].mxu1 %vm265_vm1, %v5792_v7  ;;  %4937 = vmatmul.mubr.msk.f32.gmra.mrb[22].mxu0 %vm265_vm1, %v5795_v9 }
  0x62   : > { %4715 = vmatprep.mubr.msk.f32.mxu1 %vm265_vm1, %v5798_v10  ;;  %4939 = vmatprep.mubr.msk.f32.mxu0 %vm265_vm1, %v5801_v55 }
  0x65   : > { %4716 = vmatmul.mubr.msk.f32.gmra.mrb[8].mxu1 %vm265_vm1, %v5812_v57  ;;  %4940 = vmatmul.mubr.msk.f32.gmra.mrb[24].mxu0 %vm265_vm1, %v5815_v53 }
  0x66   : > { %4718 = vmatprep.mubr.msk.f32.mxu1 %vm265_vm1, %v5818_v51  ;;  %4942 = vmatprep.mubr.msk.f32.mxu0 %vm265_vm1, %v5821_v49 }
  0x69   : > { %4719 = vmatmul.mubr.msk.f32.gmra.mrb[10].mxu1 %vm265_vm1, %v5832_v47  ;;  %4943 = vmatmul.mubr.msk.f32.gmra.mrb[26].mxu0 %vm265_vm1, %v5835_v45 }
  0x6a   : > { %4721 = vmatprep.mubr.msk.f32.mxu1 %vm265_vm1, %v5838_v43  ;;  %4945 = vmatprep.mubr.msk.f32.mxu0 %vm265_vm1, %v5841_v41 }
  0x6d   : > { %4722 = vmatmul.mubr.msk.f32.gmra.mrb[12].mxu1 %vm265_vm1, %v5852_v39  ;;  %4946 = vmatmul.mubr.msk.f32.gmra.mrb[28].mxu0 %vm265_vm1, %v5855_v37  ;;  %v5897_v37 = vld [vmem:[%s6476_s1 + $0x20] sm:$0xf] }
  0x6e   : > { %4724 = vmatprep.mubr.msk.f32.mxu1 %vm265_vm1, %v5858_v35  ;;  %4948 = vmatprep.mubr.msk.f32.mxu0 %vm265_vm1, %v5861_v33  ;;  %v5889_v33 = vld [vmem:[%s5437_s28 + $0xc8] sm:$0xff] }
  0x6f   : > { %6555 = vst [vmem:[#allocation32_spill] sm:$0xff] %v5889_v33 }
  0x71   : > { %4725 = vmatmul.mubr.msk.f32.gmra.mrb[14].mxu1 %vm265_vm1, %v5872_v62  ;;  %4949 = vmatmul.mubr.msk.f32.gmra.mrb[30].mxu0 %vm265_vm1, %v5875_v31  ;;  %v5908_v31 = vld [vmem:[%s5437_s28 + $0xe0] sm:$0xff] }
  0x72   : > { %4727 = vmatprep.mubr.msk.f32.mxu1 %vm265_vm1, %v5878_v59  ;;  %4953 = vmatprep.mubr.msk.f32.mxu0 %vm265_vm1, %v5756_v0  ;;  %v5913_v0 = vld [vmem:[%s5437_s28 + $0xf0] sm:$0xff] }
  0x75   : > { %4728 = vmatmul.mubr.msk.f32.gmra.mrb[16].mxu1 %vm265_vm1, %v5889_v33  ;;  %4954 = vmatmul.mubr.msk.f32.vlgmr.msra.gmra.mrb[0].mxu0 %vm265_vm1, %v5772_v3  ;;  %v915_v3 = vld [vmem:[%s5437_s28 + $0x2] sm:$0xff] }
  0x76   : > { %5002 = vmatpush3.msk.msra.mxu0 %vm362_vm0, %v5575_v28  ;;  %4730 = vmatprep.mubr.msk.f32.mxu1 %vm265_vm1, %v5892_v29  ;;  %v5926_v28 = vld [vmem:[%s5437_s28 + $0xf8] sm:$0xff] }
  0x77   : > { %4956 = vmatprep.mubr.msk.f32.mxu0 %vm265_vm1, %v5778_v5  ;;  %5051 = vmatprep.subr.msk.mxu0 %vm362_vm0, %v5897_v37  ;;  %v5929_v5 = vld [vmem:[%s5437_s28 + $0x108] sm:$0xff] }
  0x79   : > { %4731 = vmatmul.mubr.msk.f32.gmra.mrb[18].mxu1 %vm265_vm1, %v5908_v31  ;;  %4957 = vmatmul.mubr.msk.f32.gmra.mrb[2].mxu0 %vm265_vm1, %v5792_v7  ;;  %v5940_v7 = vld [vmem:[%s5437_s28 + $0x110] sm:$0xff] }
  0x7a   : > { %4733 = vmatprep.mubr.msk.f32.mxu1 %vm265_vm1, %v5913_v0  ;;  %4959 = vmatprep.mubr.msk.f32.mxu0 %vm265_vm1, %v5798_v10  ;;  %v5943_v10 = vld [vmem:[%s5437_s28 + $0x120] sm:$0xff] }
  0x7d   : > { %4734 = vmatmul.mubr.msk.f32.gmra.mrb[20].mxu1 %vm265_vm1, %v5926_v28  ;;  %4960 = vmatmul.mubr.msk.f32.gmra.mrb[4].mxu0 %vm265_vm1, %v5812_v57  ;;  %v5954_v57 = vld [vmem:[%s5437_s28 + $0x128] sm:$0xff] }
  0x7e   : > { %4736 = vmatprep.mubr.msk.f32.mxu1 %vm265_vm1, %v5929_v5  ;;  %4962 = vmatprep.mubr.msk.f32.mxu0 %vm265_vm1, %v5818_v51  ;;  %v5957_v51 = vld [vmem:[%s5437_s28 + $0x138] sm:$0xff] }
  0x81   : > { %4737 = vmatmul.mubr.msk.f32.gmra.mrb[22].mxu1 %vm265_vm1, %v5940_v7  ;;  %4963 = vmatmul.mubr.msk.f32.gmra.mrb[6].mxu0 %vm265_vm1, %v5832_v47  ;;  %v5968_v47 = vld [vmem:[%s5437_s28 + $0x140] sm:$0xff] }
  0x82   : > { %4739 = vmatprep.mubr.msk.f32.mxu1 %vm265_vm1, %v5943_v10  ;;  %4965 = vmatprep.mubr.msk.f32.mxu0 %vm265_vm1, %v5838_v43  ;;  %v5971_v43 = vld [vmem:[%s5437_s28 + $0x150] sm:$0xff] }
  0x85   : > { %4740 = vmatmul.mubr.msk.f32.gmra.mrb[24].mxu1 %vm265_vm1, %v5954_v57  ;;  %4966 = vmatmul.mubr.msk.f32.gmra.mrb[8].mxu0 %vm265_vm1, %v5852_v39  ;;  %v5982_v39 = vld [vmem:[%s5437_s28 + $0x158] sm:$0xff] }
  0x86   : > { %4742 = vmatprep.mubr.msk.f32.mxu1 %vm265_vm1, %v5957_v51  ;;  %4968 = vmatprep.mubr.msk.f32.mxu0 %vm265_vm1, %v5858_v35  ;;  %v5985_v35 = vld [vmem:[%s5437_s28 + $0x168] sm:$0xff] }
  0x89   : > { %4743 = vmatmul.mubr.msk.f32.gmra.mrb[26].mxu1 %vm265_vm1, %v5968_v47  ;;  %4969 = vmatmul.mubr.msk.f32.gmra.mrb[10].mxu0 %vm265_vm1, %v5872_v62  ;;  %v5996_v62 = vld [vmem:[%s5437_s28 + $0x170] sm:$0xff] }
  0x8a   : > { %4745 = vmatprep.mubr.msk.f32.mxu1 %vm265_vm1, %v5971_v43  ;;  %4971 = vmatprep.mubr.msk.f32.mxu0 %vm265_vm1, %v5878_v59 }
  0x8d   : > { %4746 = vmatmul.mubr.msk.f32.gmra.mrb[28].mxu1 %vm265_vm1, %v5982_v39  ;;  %4972 = vmatmul.mubr.msk.f32.gmra.mrb[12].mxu0 %vm265_vm1, %v5889_v33  ;;  %v916_v33 = vld [vmem:[%s5437_s28 + $0xa] sm:$0xff] }
  0x8e   : > { %4748 = vmatprep.mubr.msk.f32.mxu1 %vm265_vm1, %v5985_v35  ;;  %4974 = vmatprep.mubr.msk.f32.mxu0 %vm265_vm1, %v5892_v29 }
  0x91   : > { %4749 = vmatmul.mubr.msk.f32.gmra.mrb[30].mxu1 %vm265_vm1, %v5996_v62  ;;  %4975 = vmatmul.mubr.msk.f32.gmra.mrb[14].mxu0 %vm265_vm1, %v5908_v31 }
  0x92   : > { %4753 = vmatprep.mubr.msk.f32.mxu1 %vm265_vm1, %v915_v3  ;;  %4977 = vmatprep.mubr.msk.f32.mxu0 %vm265_vm1, %v5913_v0  ;;  %v6572_v3 = vld [vmem:[#allocation22_spill] sm:$0xff] }
  0x95   : > { %4754 = vmatmul.mubr.msk.f32.vlgmr.msra.gmra.mrb[0].mxu1 %vm265_vm1, %v916_v33  ;;  %4978 = vmatmul.mubr.msk.f32.gmra.mrb[16].mxu0 %vm265_vm1, %v5926_v28  ;;  %v4181_v33 = vld [vmem:[%s5437_s28 + $0x198] sm:$0xff] }
  0x96   : > { %4802 = vmatpush3.msk.msra.mxu1 %vm362_vm0, %v5738_v61  ;;  %4756 = vmatprep.mubr.msk.f32.mxu1 %vm265_vm1, %v5553_v24  ;;  %v6051_v24 = vld [vmem:[%s5437_s28 + $0x180] sm:$0xff] }
  0x97   : > { %4980 = vmatprep.mubr.msk.f32.mxu0 %vm265_vm1, %v5929_v5  ;;  %5101 = vmatprep.subr.msk.mxu1 %vm362_vm0, %v5415_v1  ;;  %v4182_v61 = vld [vmem:[%s5437_s28 + $0x1a0] sm:$0xff] }
  0x99   : > { %4757 = vmatmul.mubr.msk.f32.gmra.mrb[2].mxu1 %vm265_vm1, %v5564_v25  ;;  %4981 = vmatmul.mubr.msk.f32.gmra.mrb[18].mxu0 %vm265_vm1, %v5940_v7  ;;  %v6062_v25 = vld [vmem:[%s5437_s28 + $0x188] sm:$0xff] }
  0x9a   : > { %4759 = vmatprep.mubr.msk.f32.mxu1 %vm265_vm1, %v5570_v27  ;;  %4983 = vmatprep.mubr.msk.f32.mxu0 %vm265_vm1, %v5943_v10 }
  0x9d   : > { %4760 = vmatmul.mubr.msk.f32.gmra.mrb[4].mxu1 %vm265_vm1, %v5588_v30  ;;  %4984 = vmatmul.mubr.msk.f32.gmra.mrb[20].mxu0 %vm265_vm1, %v5954_v57 }
  0x9e   : > { %4762 = vmatprep.mubr.msk.f32.mxu1 %vm265_vm1, %v5596_v32  ;;  %4986 = vmatprep.mubr.msk.f32.mxu0 %vm265_vm1, %v5957_v51 }
  0xa1   : > { %4763 = vmatmul.mubr.msk.f32.gmra.mrb[6].mxu1 %vm265_vm1, %v5612_v34  ;;  %4987 = vmatmul.mubr.msk.f32.gmra.mrb[22].mxu0 %vm265_vm1, %v5968_v47 }
  0xa2   : > { %4765 = vmatprep.mubr.msk.f32.mxu1 %vm265_vm1, %v5618_v36  ;;  %4989 = vmatprep.mubr.msk.f32.mxu0 %vm265_vm1, %v5971_v43 }
  0xa5   : > { %4766 = vmatmul.mubr.msk.f32.gmra.mrb[8].mxu1 %vm265_vm1, %v5632_v38  ;;  %4990 = vmatmul.mubr.msk.f32.gmra.mrb[24].mxu0 %vm265_vm1, %v5982_v39 }
  0xa6   : > { %4768 = vmatprep.mubr.msk.f32.mxu1 %vm265_vm1, %v5638_v40  ;;  %4992 = vmatprep.mubr.msk.f32.mxu0 %vm265_vm1, %v5985_v35 }
  0xa9   : > { %4769 = vmatmul.mubr.msk.f32.gmra.mrb[10].mxu1 %vm265_vm1, %v5652_v42  ;;  %4993 = vmatmul.mubr.msk.f32.gmra.mrb[26].mxu0 %vm265_vm1, %v5996_v62 }
  0xaa   : > { %4771 = vmatprep.mubr.msk.f32.mxu1 %vm265_vm1, %v5658_v44  ;;  %4995 = vmatprep.mubr.msk.f32.mxu0 %vm265_vm1, %v6051_v24 }
  0xad   : > { %4772 = vmatmul.mubr.msk.f32.gmra.mrb[12].mxu1 %vm265_vm1, %v5672_v46  ;;  %4996 = vmatmul.mubr.msk.f32.gmra.mrb[28].mxu0 %vm265_vm1, %v6062_v25 }
  0xae   : > { %4774 = vmatprep.mubr.msk.f32.mxu1 %vm265_vm1, %v5678_v48  ;;  %4998 = vmatprep.mubr.msk.f32.mxu0 %vm265_vm1, %v4181_v33  ;;  %v6573_v33 = vld [vmem:[#allocation10_spill] sm:$0xff] }
  0xb1   : > { %4775 = vmatmul.mubr.msk.f32.gmra.mrb[14].mxu1 %vm265_vm1, %v5692_v50  ;;  %4999 = vmatmul.mubr.msk.f32.gmra.mrb[30].mxu0 %vm265_vm1, %v4182_v61  ;;  %v6574_v61 = vld [vmem:[#allocation23_spill] sm:$0xff] }
  0xb2   : > { %4777 = vmatprep.mubr.msk.f32.mxu1 %vm265_vm1, %v5698_v52  ;;  %5003 = vmatprep.mubr.msk.f32.mxu0 %vm265_vm1, %v5446_v8  ;;  %v6556_v8 = vld [vmem:[#allocation27_spill] sm:$0xff] }
  0xb5   : > { %4778 = vmatmul.mubr.msk.f32.gmra.mrb[16].mxu1 %vm265_vm1, %v5712_v54  ;;  %5004 = vmatmul.mubr.msk.f32.vlgmr.msra.gmra.mrb[0].mxu0 %vm265_vm1, %v5461_v11  ;;  %v6557_v11 = vld [vmem:[#allocation2_spill] sm:$0xff] }
  0xb6   : > { %5052 = vmatpush3.msk.msra.mxu0 %vm362_vm0, %v5897_v37  ;;  %4780 = vmatprep.mubr.msk.f32.mxu1 %vm265_vm1, %v5716_v56  ;;  %v6571_v37 = vld [vmem:[#allocation9_spill] sm:$0xff] }
  0xb7   : > { %5006 = vmatprep.mubr.msk.f32.mxu0 %vm265_vm1, %v5467_v12  ;;  %v6558_v12 = vld [vmem:[#allocation15_spill] sm:$0xff] }
  0xb9   : > { %4781 = vmatmul.mubr.msk.f32.gmra.mrb[18].mxu1 %vm265_vm1, %v5727_v58  ;;  %5007 = vmatmul.mubr.msk.f32.gmra.mrb[2].mxu0 %vm265_vm1, %v5480_v13  ;;  %v6559_v13 = vld [vmem:[#allocation3_spill] sm:$0xff] }
  0xba   : > { %4783 = vmatprep.mubr.msk.f32.mxu1 %vm265_vm1, %v5733_v60  ;;  %5009 = vmatprep.mubr.msk.f32.mxu0 %vm265_vm1, %v5483_v14  ;;  %v6560_v14 = vld [vmem:[#allocation16_spill] sm:$0xff] }
  0xbd   : > { %4784 = vmatmul.mubr.msk.f32.gmra.mrb[20].mxu1 %vm265_vm1, %v5751_v63  ;;  %5010 = vmatmul.mubr.msk.f32.gmra.mrb[4].mxu0 %vm265_vm1, %v5494_v15  ;;  %v6561_v15 = vld [vmem:[#allocation4_spill] sm:$0xff] }
  0xbe   : > { %4786 = vmatprep.mubr.msk.f32.mxu1 %vm265_vm1, %v5759_v2  ;;  %5012 = vmatprep.mubr.msk.f32.mxu0 %vm265_vm1, %v5497_v16  ;;  %v6562_v16 = vld [vmem:[#allocation17_spill] sm:$0xff] }
  0xc1   : > { %4787 = vmatmul.mubr.msk.f32.gmra.mrb[22].mxu1 %vm265_vm1, %v5775_v4  ;;  %5013 = vmatmul.mubr.msk.f32.gmra.mrb[6].mxu0 %vm265_vm1, %v5508_v17  ;;  %v6563_v17 = vld [vmem:[#allocation5_spill] sm:$0xff] }
  0xc2   : > { %4789 = vmatprep.mubr.msk.f32.mxu1 %vm265_vm1, %v5781_v6  ;;  %5015 = vmatprep.mubr.msk.f32.mxu0 %vm265_vm1, %v5511_v18  ;;  %v6564_v18 = vld [vmem:[#allocation18_spill] sm:$0xff] }
  0xc5   : > { %4790 = vmatmul.mubr.msk.f32.gmra.mrb[24].mxu1 %vm265_vm1, %v5795_v9  ;;  %5016 = vmatmul.mubr.msk.f32.gmra.mrb[8].mxu0 %vm265_vm1, %v5522_v19  ;;  %v6565_v19 = vld [vmem:[#allocation6_spill] sm:$0xff] }
  0xc6   : > { %4792 = vmatprep.mubr.msk.f32.mxu1 %vm265_vm1, %v5801_v55  ;;  %5018 = vmatprep.mubr.msk.f32.mxu0 %vm265_vm1, %v5525_v20  ;;  %v6566_v20 = vld [vmem:[#allocation19_spill] sm:$0xff] }
  0xc9   : > { %4793 = vmatmul.mubr.msk.f32.gmra.mrb[26].mxu1 %vm265_vm1, %v5815_v53  ;;  %5019 = vmatmul.mubr.msk.f32.gmra.mrb[10].mxu0 %vm265_vm1, %v5536_v21  ;;  %v6567_v21 = vld [vmem:[#allocation7_spill] sm:$0xff] }
  0xca   : > { %4795 = vmatprep.mubr.msk.f32.mxu1 %vm265_vm1, %v5821_v49  ;;  %5021 = vmatprep.mubr.msk.f32.mxu0 %vm265_vm1, %v5539_v22  ;;  %v6569_v22 = vld [vmem:[#allocation8_spill] sm:$0xff] }
  0xcd   : > { %4796 = vmatmul.mubr.msk.f32.gmra.mrb[28].mxu1 %vm265_vm1, %v5835_v45  ;;  %5022 = vmatmul.mubr.msk.f32.gmra.mrb[12].mxu0 %vm265_vm1, %v5550_v23  ;;  %v6570_v23 = vld [vmem:[#allocation21_spill] sm:$0xff] }
  0xce   : > { %4798 = vmatprep.mubr.msk.f32.mxu1 %vm265_vm1, %v5841_v41  ;;  %5024 = vmatprep.mubr.msk.f32.mxu0 %vm265_vm1, %v5567_v26 }
  0xd1   : > { %4799 = vmatmul.mubr.msk.f32.gmra.mrb[30].mxu1 %vm265_vm1, %v6556_v8  ;;  %5025 = vmatmul.mubr.msk.f32.gmra.mrb[14].mxu0 %vm265_vm1, %v6557_v11  ;;  %v6583_v8 = vld [vmem:[#allocation30_spill] sm:$0xff] }
  0xd2   : > { %4803 = vmatprep.mubr.msk.f32.mxu1 %vm265_vm1, %v6558_v12  ;;  %5027 = vmatprep.mubr.msk.f32.mxu0 %vm265_vm1, %v6559_v13  ;;  %v6575_v12 = vld [vmem:[#allocation11_spill] sm:$0xff] }
  0xd5   : > { %4804 = vmatmul.mubr.msk.f32.vlgmr.msra.gmra.mrb[0].mxu1 %vm265_vm1, %v6560_v14  ;;  %5028 = vmatmul.mubr.msk.f32.gmra.mrb[16].mxu0 %vm265_vm1, %v6561_v15  ;;  %v6576_v14 = vld [vmem:[#allocation24_spill] sm:$0xff] }
  0xd6   : > { %5102 = vmatpush3.msk.msra.mxu1 %vm362_vm0, %v5415_v1  ;;  %4806 = vmatprep.mubr.msk.f32.mxu1 %vm265_vm1, %v6562_v16  ;;  %v6568_v1 = vld [vmem:[#allocation20_spill] sm:$0xff] }
  0xd7   : > { %5030 = vmatprep.mubr.msk.f32.mxu0 %vm265_vm1, %v6563_v17  ;;  %v6577_v16 = vld [vmem:[#allocation12_spill] sm:$0xff] }
  0xd9   : > { %4807 = vmatmul.mubr.msk.f32.gmra.mrb[2].mxu1 %vm265_vm1, %v6564_v18  ;;  %5031 = vmatmul.mubr.msk.f32.gmra.mrb[18].mxu0 %vm265_vm1, %v6565_v19  ;;  %v6578_v18 = vld [vmem:[#allocation25_spill] sm:$0xff] }
  0xda   : > { %4809 = vmatprep.mubr.msk.f32.mxu1 %vm265_vm1, %v6566_v20  ;;  %5033 = vmatprep.mubr.msk.f32.mxu0 %vm265_vm1, %v6567_v21  ;;  %v6579_v20 = vld [vmem:[#allocation13_spill] sm:$0xff] }
  0xdd   : > { %4810 = vmatmul.mubr.msk.f32.gmra.mrb[4].mxu1 %vm265_vm1, %v6568_v1  ;;  %5034 = vmatmul.mubr.msk.f32.gmra.mrb[20].mxu0 %vm265_vm1, %v6569_v22  ;;  %v6189_v1 = vld [vmem:[%s5437_s28 + $0x181] sm:$0xff] }
  0xde   : > { %4812 = vmatprep.mubr.msk.f32.mxu1 %vm265_vm1, %v6570_v23  ;;  %5036 = vmatprep.mubr.msk.f32.mxu0 %vm265_vm1, %v6571_v37  ;;  %v6580_v23 = vld [vmem:[#allocation26_spill] sm:$0xff] }
  0xe1   : > { %4813 = vmatmul.mubr.msk.f32.gmra.mrb[6].mxu1 %vm265_vm1, %v6572_v3  ;;  %5037 = vmatmul.mubr.msk.f32.gmra.mrb[22].mxu0 %vm265_vm1, %v6573_v33  ;;  %v6581_v3 = vld [vmem:[#allocation14_spill] sm:$0xff] }
  0xe2   : > { %4815 = vmatprep.mubr.msk.f32.mxu1 %vm265_vm1, %v6574_v61  ;;  %5039 = vmatprep.mubr.msk.f32.mxu0 %vm265_vm1, %v6575_v12  ;;  %v6582_v61 = vld [vmem:[#allocation28_spill] sm:$0xff] }
  0xe5   : > { %4816 = vmatmul.mubr.msk.f32.gmra.mrb[8].mxu1 %vm265_vm1, %v6576_v14  ;;  %5040 = vmatmul.mubr.msk.f32.gmra.mrb[24].mxu0 %vm265_vm1, %v6577_v16  ;;  %v6200_v14 = vld [vmem:[%s5437_s28 + $0x189] sm:$0xff] }
  0xe6   : > { %4818 = vmatprep.mubr.msk.f32.mxu1 %vm265_vm1, %v6578_v18  ;;  %5042 = vmatprep.mubr.msk.f32.mxu0 %vm265_vm1, %v6579_v20  ;;  %v4247_v18 = vld [vmem:[%s5437_s28 + $0x199] sm:$0xff] }
  0xe9   : > { %4819 = vmatmul.mubr.msk.f32.gmra.mrb[10].mxu1 %vm265_vm1, %v6580_v23  ;;  %5043 = vmatmul.mubr.msk.f32.gmra.mrb[26].mxu0 %vm265_vm1, %v6581_v3  ;;  %v4248_v23 = vld [vmem:[%s5437_s28 + $0x1a1] sm:$0xff]  ;;  %v6584_v3 = vld [vmem:[#allocation32_spill] sm:$0xff] }
  0xea   : > { %4821 = vmatprep.mubr.msk.f32.mxu1 %vm265_vm1, %v6582_v61  ;;  %5045 = vmatprep.mubr.msk.f32.mxu0 %vm265_vm1, %v6189_v1 }
  0xed   : > { %4822 = vmatmul.mubr.msk.f32.gmra.mrb[12].mxu1 %vm265_vm1, %v6583_v8  ;;  %5046 = vmatmul.mubr.msk.f32.gmra.mrb[28].mxu0 %vm265_vm1, %v6200_v14 }
  0xee   : > { %4824 = vmatprep.mubr.msk.f32.mxu1 %vm265_vm1, %v5878_v59  ;;  %5048 = vmatprep.mubr.msk.f32.mxu0 %vm265_vm1, %v4247_v18 }
  0xf1   : > { %4825 = vmatmul.mubr.msk.f32.gmra.mrb[14].mxu1 %vm265_vm1, %v6584_v3  ;;  %5049 = vmatmul.mubr.msk.f32.gmra.mrb[30].mxu0 %vm265_vm1, %v4248_v23 }
  0xf2   : > { %4827 = vmatprep.mubr.msk.f32.mxu1 %vm265_vm1, %v5892_v29  ;;  %5053 = vmatprep.mubr.msk.f32.mxu0 %vm265_vm1, %v5570_v27  ;;  %v6586_v27 = vld [vmem:[#allocation29_spill] sm:$0xff] }
  0xf3   : > { %v4313_v29 = vld [vmem:[%s5437_s28 + $0x19a] sm:$0xff] }
  0xf5   : > { %4828 = vmatmul.mubr.msk.f32.gmra.mrb[16].mxu1 %vm265_vm1, %v5908_v31  ;;  %5054 = vmatmul.mubr.msk.f32.vlgmr.msra.gmra.mrb[0].mxu0 %vm265_vm1, %v5588_v30  ;;  %v6587_v30 = vld [vmem:[#allocation14_spill] sm:$0xff]  ;;  %v6588_v31 = vld [vmem:[#allocation31_spill] sm:$0xff] }
  0xf6   : > { %4830 = vmatprep.mubr.msk.f32.mxu1 %vm265_vm1, %v5913_v0  ;;  %5056 = vmatprep.mubr.msk.f32.mxu0 %vm265_vm1, %v5596_v32  ;;  %v4314_v32 = vld [vmem:[%s5437_s28 + $0x1a2] sm:$0xff] }
  0xf9   : > { %4831 = vmatmul.mubr.msk.f32.gmra.mrb[18].mxu1 %vm265_vm1, %v5926_v28  ;;  %5057 = vmatmul.mubr.msk.f32.gmra.mrb[2].mxu0 %vm265_vm1, %v5612_v34 }
  0xfa   : > { %4833 = vmatprep.mubr.msk.f32.mxu1 %vm265_vm1, %v5929_v5  ;;  %5059 = vmatprep.mubr.msk.f32.mxu0 %vm265_vm1, %v5618_v36 }
  0xfd   : > { %4834 = vmatmul.mubr.msk.f32.gmra.mrb[20].mxu1 %vm265_vm1, %v5940_v7  ;;  %5060 = vmatmul.mubr.msk.f32.gmra.mrb[4].mxu0 %vm265_vm1, %v5632_v38 }
  0xfe   : > { %4836 = vmatprep.mubr.msk.f32.mxu1 %vm265_vm1, %v5943_v10  ;;  %5062 = vmatprep.mubr.msk.f32.mxu0 %vm265_vm1, %v5638_v40 }
 0x101   : > { %4837 = vmatmul.mubr.msk.f32.gmra.mrb[22].mxu1 %vm265_vm1, %v5954_v57  ;;  %5063 = vmatmul.mubr.msk.f32.gmra.mrb[6].mxu0 %vm265_vm1, %v5652_v42 }
 0x102   : > { %4839 = vmatprep.mubr.msk.f32.mxu1 %vm265_vm1, %v5957_v51  ;;  %5065 = vmatprep.mubr.msk.f32.mxu0 %vm265_vm1, %v5658_v44 }
 0x105   : > { %4840 = vmatmul.mubr.msk.f32.gmra.mrb[24].mxu1 %vm265_vm1, %v5968_v47  ;;  %5066 = vmatmul.mubr.msk.f32.gmra.mrb[8].mxu0 %vm265_vm1, %v5672_v46 }
 0x106   : > { %4842 = vmatprep.mubr.msk.f32.mxu1 %vm265_vm1, %v5971_v43  ;;  %5068 = vmatprep.mubr.msk.f32.mxu0 %vm265_vm1, %v5678_v48 }
 0x109   : > { %4843 = vmatmul.mubr.msk.f32.gmra.mrb[26].mxu1 %vm265_vm1, %v5982_v39  ;;  %5069 = vmatmul.mubr.msk.f32.gmra.mrb[10].mxu0 %vm265_vm1, %v5692_v50 }
 0x10a   : > { %4845 = vmatprep.mubr.msk.f32.mxu1 %vm265_vm1, %v5985_v35  ;;  %5071 = vmatprep.mubr.msk.f32.mxu0 %vm265_vm1, %v5698_v52  ;;  %v6357_v52 = vld [vmem:[%s6477_s2] ss:$0 sm:$0xff] }
 0x10d   : > { %4846 = vmatmul.mubr.msk.f32.gmra.mrb[28].mxu1 %vm265_vm1, %v5996_v62  ;;  %5072 = vmatmul.mubr.msk.f32.gmra.mrb[12].mxu0 %vm265_vm1, %v5712_v54 }
 0x10e   : > { %4848 = vmatprep.mubr.msk.f32.mxu1 %vm265_vm1, %v6051_v24  ;;  %5074 = vmatprep.mubr.msk.f32.mxu0 %vm265_vm1, %v5716_v56  ;;  %v6362_v56 = vld [vmem:[%s6478_s3] ss:$0 sm:$0xff] }
 0x111   : > { %4849 = vmatmul.mubr.msk.f32.gmra.mrb[30].mxu1 %vm265_vm1, %v6062_v25  ;;  %5075 = vmatmul.mubr.msk.f32.gmra.mrb[14].mxu0 %vm265_vm1, %v5727_v58 }
 0x112   : > { %4877 = vmatprep.mubr.msk.f32.mxu1 %vm265_vm1, %v5567_v26  ;;  %5077 = vmatprep.mubr.msk.f32.mxu0 %vm265_vm1, %v5733_v60  ;;  %v6585_v26 = vld [vmem:[#allocation27_spill] sm:$0xff] }
 0x115   : > { %4878 = vmatmul.mubr.msk.f32.vlgmr.msra.gmra.mrb[16].mxu1 %vm265_vm1, %v6557_v11  ;;  %5078 = vmatmul.mubr.msk.f32.gmra.mrb[16].mxu0 %vm265_vm1, %v5751_v63 }
 0x116   : > { %4880 = vmatprep.mubr.msk.f32.mxu1 %vm265_vm1, %v6559_v13  ;;  %5080 = vmatprep.mubr.msk.f32.mxu0 %vm265_vm1, %v5759_v2 }
 0x119   : > { %4881 = vmatmul.mubr.msk.f32.gmra.mrb[18].mxu1 %vm265_vm1, %v6561_v15  ;;  %5081 = vmatmul.mubr.msk.f32.gmra.mrb[18].mxu0 %vm265_vm1, %v5775_v4 }
 0x11a   : > { %4883 = vmatprep.mubr.msk.f32.mxu1 %vm265_vm1, %v6563_v17  ;;  %5083 = vmatprep.mubr.msk.f32.mxu0 %vm265_vm1, %v5781_v6 }
 0x11d   : > { %4884 = vmatmul.mubr.msk.f32.gmra.mrb[20].mxu1 %vm265_vm1, %v6565_v19  ;;  %5084 = vmatmul.mubr.msk.f32.gmra.mrb[20].mxu0 %vm265_vm1, %v5795_v9 }
 0x11e   : > { %4886 = vmatprep.mubr.msk.f32.mxu1 %vm265_vm1, %v6567_v21  ;;  %5086 = vmatprep.mubr.msk.f32.mxu0 %vm265_vm1, %v5801_v55 }
 0x121   : > { %4887 = vmatmul.mubr.msk.f32.gmra.mrb[22].mxu1 %vm265_vm1, %v6569_v22  ;;  %5087 = vmatmul.mubr.msk.f32.gmra.mrb[22].mxu0 %vm265_vm1, %v5815_v53 }
 0x122   : > { %4889 = vmatprep.mubr.msk.f32.mxu1 %vm265_vm1, %v6571_v37  ;;  %5089 = vmatprep.mubr.msk.f32.mxu0 %vm265_vm1, %v5821_v49 }
 0x125   : > { %4890 = vmatmul.mubr.msk.f32.gmra.mrb[24].mxu1 %vm265_vm1, %v6573_v33  ;;  %5090 = vmatmul.mubr.msk.f32.gmra.mrb[24].mxu0 %vm265_vm1, %v5835_v45 }
 0x126   : > { %4892 = vmatprep.mubr.msk.f32.mxu1 %vm265_vm1, %v6575_v12  ;;  %5092 = vmatprep.mubr.msk.f32.mxu0 %vm265_vm1, %v5841_v41 }
 0x129   : > { %4893 = vmatmul.mubr.msk.f32.gmra.mrb[26].mxu1 %vm265_vm1, %v6577_v16  ;;  %5093 = vmatmul.mubr.msk.f32.gmra.mrb[26].mxu0 %vm265_vm1, %v6585_v26 }
 0x12a   : > { %4895 = vmatprep.mubr.msk.f32.mxu1 %vm265_vm1, %v6579_v20  ;;  %5095 = vmatprep.mubr.msk.f32.mxu0 %vm265_vm1, %v6586_v27 }
 0x12d   : > { %4896 = vmatmul.mubr.msk.f32.gmra.mrb[28].mxu1 %vm265_vm1, %v6587_v30  ;;  %5096 = vmatmul.mubr.msk.f32.gmra.mrb[28].mxu0 %vm265_vm1, %v6588_v31 }
 0x12e   : > { %4898 = vmatprep.mubr.msk.f32.mxu1 %vm265_vm1, %v6189_v1  ;;  %5098 = vmatprep.mubr.msk.f32.mxu0 %vm265_vm1, %v4313_v29 }
 0x131   : > { %4899 = vmatmul.mubr.msk.f32.gmra.mrb[30].mxu1 %vm265_vm1, %v6200_v14  ;;  %5099 = vmatmul.mubr.msk.f32.gmra.mrb[30].mxu0 %vm265_vm1, %v4314_v32 }
 0x1a8   : > { %v4805_v34 = vpop.f32.mrb[0].mxu1 }
 0x1a9   : > { %v1505_v35 = vpop.f32.mrb[1].mxu1 }
 0x1ac   : > { %v4808_v36 = vpop.f32.mrb[2].mxu1 }
 0x1ad   : > { %v1515_v38 = vpop.f32.mrb[3].mxu1 }
 0x1b0   : > { %v4811_v39 = vpop.f32.mrb[4].mxu1 }
 0x1b1   : > { %v1525_v40 = vpop.f32.mrb[5].mxu1 }
 0x1b4   : > { %v4814_v41 = vpop.f32.mrb[6].mxu1 }
 0x1b5   : > { %v1535_v42 = vpop.f32.mrb[7].mxu1 }
 0x1b8   : > { %v4817_v43 = vpop.f32.mrb[8].mxu1 }
 0x1b9   : > { %v1545_v44 = vpop.f32.mrb[9].mxu1 }
 0x1bc   : > { %v6342_v45 = vpop.f32.mrb[10].mxu1 }
 0x1bd   : > { %v6344_v46 = vpop.f32.mrb[11].mxu1 }
 0x1c0   : > { %v6346_v47 = vpop.f32.mrb[12].mxu1 }
 0x1c1   : > { %v6348_v48 = vpop.f32.mrb[13].mxu1 }
 0x1c4   : > { %v6350_v49 = vpop.f32.mrb[14].mxu1 }
 0x1c5   : > { %v6352_v50 = vpop.f32.mrb[15].mxu1 }
 0x1c8   : > { %v5055_v51 = vpop.f32.mrb[0].mxu0 }
 0x1c9   : > { %v5103_v53 = vadd.f32 %v5055_v51, %v4805_v34  ;;  %v3456_v54 = vpop.f32.mrb[1].mxu0 }
 0x1ca   : > { %v5104_v58 = vadd.f32 %v3456_v54, %v1505_v35 }
 0x1cb   : > { %v3655_v59 = vmul.f32 %v5103_v53, %v6357_v52 }
 0x1cc   : > { %v3654_v60 = vmul.f32 %v5104_v58, %v6357_v52  ;;  %v5058_v62 = vpop.f32.mrb[2].mxu0 }
 0x1cd   : > { %v3694_v63 = vadd.f32 %v6362_v56, %v3655_v59  ;;  %v5105_v0 = vadd.f32 %v5058_v62, %v4808_v36  ;;  %v3466_v2 = vpop.f32.mrb[3].mxu0 }
 0x1ce   : > { %v3693_v4 = vadd.f32 %v6362_v56, %v3654_v60  ;;  %v5106_v5 = vadd.f32 %v3466_v2, %v1515_v38 }
 0x1cf   : > { %v3726_v6 = vmax.f32 %v3694_v63, 0.0  ;;  %v3657_v7 = vmul.f32 %v5105_v0, %v6357_v52 }
 0x1d0   : > { %v3725_v9 = vmax.f32 %v3693_v4, 0.0  ;;  %v3656_v10 = vmul.f32 %v5106_v5, %v6357_v52  ;;  %v5061_v55 = vpop.f32.mrb[4].mxu0 }
 0x1d1   : > { %3758 = vst [vmem:[%s6371_s22 + $0x8] sm:$0xff] %v3726_v6  ;;  %v3696_v57 = vadd.f32 %v6362_v56, %v3657_v7  ;;  %v5107_v28 = vadd.f32 %v5061_v55, %v4811_v39  ;;  %v3476_v24 = vpop.f32.mrb[5].mxu0 }
 0x1d2   : > { %3757 = vst [vmem:[%s6371_s22] sm:$0xff] %v3725_v9  ;;  %v3695_v25 = vadd.f32 %v6362_v56, %v3656_v10  ;;  %v5108_v8 = vadd.f32 %v3476_v24, %v1525_v40 }
 0x1d3   : > { %v3728_v11 = vmax.f32 %v3696_v57, 0.0  ;;  %v3659_v13 = vmul.f32 %v5107_v28, %v6357_v52 }
 0x1d4   : > { %v3727_v15 = vmax.f32 %v3695_v25, 0.0  ;;  %v3658_v17 = vmul.f32 %v5108_v8, %v6357_v52  ;;  %v5064_v19 = vpop.f32.mrb[6].mxu0 }
 0x1d5   : > { %3760 = vst [vmem:[%s6371_s22 + $0x18] sm:$0xff] %v3728_v11  ;;  %v3698_v21 = vadd.f32 %v6362_v56, %v3659_v13  ;;  %v5109_v22 = vadd.f32 %v5064_v19, %v4814_v41  ;;  %v3486_v37 = vpop.f32.mrb[7].mxu0 }
 0x1d6   : > { %3759 = vst [vmem:[%s6371_s22 + $0x10] sm:$0xff] %v3727_v15  ;;  %v3697_v33 = vadd.f32 %v6362_v56, %v3658_v17  ;;  %v5110_v12 = vadd.f32 %v3486_v37, %v1535_v42 }
 0x1d7   : > { %v3730_v16 = vmax.f32 %v3698_v21, 0.0  ;;  %v3661_v20 = vmul.f32 %v5109_v22, %v6357_v52 }
 0x1d8   : > { %v3729_v1 = vmax.f32 %v3697_v33, 0.0  ;;  %v3660_v3 = vmul.f32 %v5110_v12, %v6357_v52  ;;  %v5067_v61 = vpop.f32.mrb[8].mxu0 }
 0x1d9   : > { %3762 = vst [vmem:[%s6371_s22 + $0x28] sm:$0xff] %v3730_v16  ;;  %v3700_v14 = vadd.f32 %v6362_v56, %v3661_v20  ;;  %v5111_v18 = vadd.f32 %v5067_v61, %v4817_v43  ;;  %v3496_v23 = vpop.f32.mrb[9].mxu0 }
 0x1da   : > { %3761 = vst [vmem:[%s6371_s22 + $0x20] sm:$0xff] %v3729_v1  ;;  %v3699_v26 = vadd.f32 %v6362_v56, %v3660_v3  ;;  %v5112_v27 = vadd.f32 %v3496_v23, %v1545_v44 }
 0x1db   : > { %v3732_v29 = vmax.f32 %v3700_v14, 0.0  ;;  %v3663_v30 = vmul.f32 %v5111_v18, %v6357_v52 }
 0x1dc   : > { %v3731_v31 = vmax.f32 %v3699_v26, 0.0  ;;  %v3662_v32 = vmul.f32 %v5112_v27, %v6357_v52  ;;  %v5070_v34 = vpop.f32.mrb[10].mxu0 }
 0x1dd   : > { %3764 = vst [vmem:[%s6371_s22 + $0x38] sm:$0xff] %v3732_v29  ;;  %v3702_v35 = vadd.f32 %v6362_v56, %v3663_v30  ;;  %v5113_v36 = vadd.f32 %v5070_v34, %v6342_v45  ;;  %v3506_v38 = vpop.f32.mrb[11].mxu0 }
 0x1de   : > { %3763 = vst [vmem:[%s6371_s22 + $0x30] sm:$0xff] %v3731_v31  ;;  %v3701_v39 = vadd.f32 %v6362_v56, %v3662_v32  ;;  %v5114_v40 = vadd.f32 %v3506_v38, %v6344_v46 }
 0x1df   : > { %v3734_v41 = vmax.f32 %v3702_v35, 0.0  ;;  %v3665_v42 = vmul.f32 %v5113_v36, %v6357_v52 }
 0x1e0   : > { %v3733_v43 = vmax.f32 %v3701_v39, 0.0  ;;  %v3664_v44 = vmul.f32 %v5114_v40, %v6357_v52  ;;  %v5073_v51 = vpop.f32.mrb[12].mxu0 }
 0x1e1   : > { %3766 = vst [vmem:[%s6371_s22 + $0x48] sm:$0xff] %v3734_v41  ;;  %v3704_v53 = vadd.f32 %v6362_v56, %v3665_v42  ;;  %v5115_v45 = vadd.f32 %v5073_v51, %v6346_v47  ;;  %v3516_v54 = vpop.f32.mrb[13].mxu0 }
 0x1e2   : > { %3765 = vst [vmem:[%s6371_s22 + $0x40] sm:$0xff] %v3733_v43  ;;  %v3703_v58 = vadd.f32 %v6362_v56, %v3664_v44  ;;  %v5116_v46 = vadd.f32 %v3516_v54, %v6348_v48 }
 0x1e3   : > { %v3736_v59 = vmax.f32 %v3704_v53, 0.0  ;;  %v3667_v60 = vmul.f32 %v5115_v45, %v6357_v52 }
 0x1e4   : > { %v3735_v62 = vmax.f32 %v3703_v58, 0.0  ;;  %v3666_v63 = vmul.f32 %v5116_v46, %v6357_v52  ;;  %v5076_v0 = vpop.f32.mrb[14].mxu0 }
 0x1e5   : > { %3768 = vst [vmem:[%s6371_s22 + $0x58] sm:$0xff] %v3736_v59  ;;  %v3706_v2 = vadd.f32 %v6362_v56, %v3667_v60  ;;  %v5117_v4 = vadd.f32 %v5076_v0, %v6350_v49  ;;  %v3526_v47 = vpop.f32.mrb[15].mxu0 }
 0x1e6   : > { %3767 = vst [vmem:[%s6371_s22 + $0x50] sm:$0xff] %v3735_v62  ;;  %v3705_v5 = vadd.f32 %v6362_v56, %v3666_v63  ;;  %v5118_v48 = vadd.f32 %v3526_v47, %v6352_v50 }
 0x1e7   : > { %v3738_v6 = vmax.f32 %v3706_v2, 0.0  ;;  %v3669_v7 = vmul.f32 %v5117_v4, %v6357_v52 }
 0x1e8   : > { %v3737_v9 = vmax.f32 %v3705_v5, 0.0  ;;  %v3668_v10 = vmul.f32 %v5118_v48, %v6357_v52  ;;  %v4879_v55 = vpop.f32.mrb[16].mxu1  ;;  %v5079_v57 = vpop.f32.mrb[16].mxu0 }
 0x1e9   : > { %3770 = vst [vmem:[%s6371_s22 + $0x68] sm:$0xff] %v3738_v6  ;;  %v3708_v28 = vadd.f32 %v6362_v56, %v3669_v7  ;;  %v5119_v49 = vadd.f32 %v5079_v57, %v4879_v55  ;;  %v1975_v24 = vpop.f32.mrb[17].mxu1  ;;  %v3536_v25 = vpop.f32.mrb[17].mxu0 }
 0x1ea   : > { %3769 = vst [vmem:[%s6371_s22 + $0x60] sm:$0xff] %v3737_v9  ;;  %v3707_v8 = vadd.f32 %v6362_v56, %v3668_v10  ;;  %v5120_v50 = vadd.f32 %v3536_v25, %v1975_v24 }
 0x1eb   : > { %v3740_v11 = vmax.f32 %v3708_v28, 0.0  ;;  %v3671_v13 = vmul.f32 %v5119_v49, %v6357_v52 }
 0x1ec   : > { %v3739_v15 = vmax.f32 %v3707_v8, 0.0  ;;  %v3670_v17 = vmul.f32 %v5120_v50, %v6357_v52  ;;  %v4882_v19 = vpop.f32.mrb[18].mxu1  ;;  %v5082_v21 = vpop.f32.mrb[18].mxu0 }
 0x1ed   : > { %3772 = vst [vmem:[%s6371_s22 + $0x78] sm:$0xff] %v3740_v11  ;;  %v3710_v22 = vadd.f32 %v6362_v56, %v3671_v13  ;;  %v5121_v37 = vadd.f32 %v5082_v21, %v4882_v19  ;;  %v1985_v33 = vpop.f32.mrb[19].mxu1  ;;  %v3546_v12 = vpop.f32.mrb[19].mxu0 }
 0x1ee   : > { %3771 = vst [vmem:[%s6371_s22 + $0x70] sm:$0xff] %v3739_v15  ;;  %v3709_v16 = vadd.f32 %v6362_v56, %v3670_v17  ;;  %v5122_v20 = vadd.f32 %v3546_v12, %v1985_v33 }
 0x1ef   : > { %v3742_v1 = vmax.f32 %v3710_v22, 0.0  ;;  %v3673_v3 = vmul.f32 %v5121_v37, %v6357_v52 }
 0x1f0   : > { %v3741_v61 = vmax.f32 %v3709_v16, 0.0  ;;  %v3672_v14 = vmul.f32 %v5122_v20, %v6357_v52  ;;  %v4885_v18 = vpop.f32.mrb[20].mxu1  ;;  %v5085_v23 = vpop.f32.mrb[20].mxu0 }
 0x1f1   : > { %3774 = vst [vmem:[%s6371_s22 + $0x88] sm:$0xff] %v3742_v1  ;;  %v3712_v26 = vadd.f32 %v6362_v56, %v3673_v3  ;;  %v5123_v27 = vadd.f32 %v5085_v23, %v4885_v18  ;;  %v1995_v29 = vpop.f32.mrb[21].mxu1  ;;  %v3556_v30 = vpop.f32.mrb[21].mxu0 }
 0x1f2   : > { %3773 = vst [vmem:[%s6371_s22 + $0x80] sm:$0xff] %v3741_v61  ;;  %v3711_v31 = vadd.f32 %v6362_v56, %v3672_v14  ;;  %v5124_v32 = vadd.f32 %v3556_v30, %v1995_v29 }
 0x1f3   : > { %v3744_v34 = vmax.f32 %v3712_v26, 0.0  ;;  %v3675_v35 = vmul.f32 %v5123_v27, %v6357_v52 }
 0x1f4   : > { %v3743_v36 = vmax.f32 %v3711_v31, 0.0  ;;  %v3674_v38 = vmul.f32 %v5124_v32, %v6357_v52  ;;  %v4888_v39 = vpop.f32.mrb[22].mxu1  ;;  %v5088_v40 = vpop.f32.mrb[22].mxu0 }
 0x1f5   : > { %3776 = vst [vmem:[%s6371_s22 + $0x98] sm:$0xff] %v3744_v34  ;;  %v3714_v41 = vadd.f32 %v6362_v56, %v3675_v35  ;;  %v5125_v42 = vadd.f32 %v5088_v40, %v4888_v39  ;;  %v2005_v43 = vpop.f32.mrb[23].mxu1  ;;  %v3566_v44 = vpop.f32.mrb[23].mxu0 }
 0x1f6   : > { %3775 = vst [vmem:[%s6371_s22 + $0x90] sm:$0xff] %v3743_v36  ;;  %v3713_v51 = vadd.f32 %v6362_v56, %v3674_v38  ;;  %v5126_v53 = vadd.f32 %v3566_v44, %v2005_v43 }
 0x1f7   : > { %v3746_v45 = vmax.f32 %v3714_v41, 0.0  ;;  %v3677_v54 = vmul.f32 %v5125_v42, %v6357_v52 }
 0x1f8   : > { %v3745_v58 = vmax.f32 %v3713_v51, 0.0  ;;  %v3676_v46 = vmul.f32 %v5126_v53, %v6357_v52  ;;  %v4891_v59 = vpop.f32.mrb[24].mxu1  ;;  %v5091_v60 = vpop.f32.mrb[24].mxu0 }
 0x1f9   : > { %3778 = vst [vmem:[%s6371_s22 + $0xa8] sm:$0xff] %v3746_v45  ;;  %v3716_v62 = vadd.f32 %v6362_v56, %v3677_v54  ;;  %v5127_v63 = vadd.f32 %v5091_v60, %v4891_v59  ;;  %v2015_v0 = vpop.f32.mrb[25].mxu1  ;;  %v3576_v2 = vpop.f32.mrb[25].mxu0 }
 0x1fa   : > { %3777 = vst [vmem:[%s6371_s22 + $0xa0] sm:$0xff] %v3745_v58  ;;  %v3715_v4 = vadd.f32 %v6362_v56, %v3676_v46  ;;  %v5128_v47 = vadd.f32 %v3576_v2, %v2015_v0 }
 0x1fb   : > { %v3748_v5 = vmax.f32 %v3716_v62, 0.0  ;;  %v3679_v48 = vmul.f32 %v5127_v63, %v6357_v52 }
 0x1fc   : > { %v3747_v6 = vmax.f32 %v3715_v4, 0.0  ;;  %v3678_v7 = vmul.f32 %v5128_v47, %v6357_v52  ;;  %v4894_v9 = vpop.f32.mrb[26].mxu1  ;;  %v5094_v10 = vpop.f32.mrb[26].mxu0 }
 0x1fd   : > { %3780 = vst [vmem:[%s6371_s22 + $0xb8] sm:$0xff] %v3748_v5  ;;  %v3718_v55 = vadd.f32 %v6362_v56, %v3679_v48  ;;  %v5129_v57 = vadd.f32 %v5094_v10, %v4894_v9  ;;  %v2025_v28 = vpop.f32.mrb[27].mxu1  ;;  %v3586_v49 = vpop.f32.mrb[27].mxu0 }
 0x1fe   : > { %3779 = vst [vmem:[%s6371_s22 + $0xb0] sm:$0xff] %v3747_v6  ;;  %v3717_v24 = vadd.f32 %v6362_v56, %v3678_v7  ;;  %v5130_v25 = vadd.f32 %v3586_v49, %v2025_v28 }
 0x1ff   : > { %v3750_v8 = vmax.f32 %v3718_v55, 0.0  ;;  %v3681_v50 = vmul.f32 %v5129_v57, %v6357_v52 }
 0x200   : > { %v3749_v11 = vmax.f32 %v3717_v24, 0.0  ;;  %v3680_v13 = vmul.f32 %v5130_v25, %v6357_v52  ;;  %v4897_v15 = vpop.f32.mrb[28].mxu1  ;;  %v5097_v17 = vpop.f32.mrb[28].mxu0 }
 0x201   : > { %3782 = vst [vmem:[%s6371_s22 + $0xc8] sm:$0xff] %v3750_v8  ;;  %v3720_v19 = vadd.f32 %v6362_v56, %v3681_v50  ;;  %v5131_v21 = vadd.f32 %v5097_v17, %v4897_v15  ;;  %v2035_v22 = vpop.f32.mrb[29].mxu1  ;;  %v3596_v37 = vpop.f32.mrb[29].mxu0 }
 0x202   : > { %3781 = vst [vmem:[%s6371_s22 + $0xc0] sm:$0xff] %v3749_v11  ;;  %v3719_v33 = vadd.f32 %v6362_v56, %v3680_v13  ;;  %v5132_v12 = vadd.f32 %v3596_v37, %v2035_v22 }
 0x203   : > { %v3752_v16 = vmax.f32 %v3720_v19, 0.0  ;;  %v3683_v20 = vmul.f32 %v5131_v21, %v6357_v52 }
 0x204   : > { %v3751_v1 = vmax.f32 %v3719_v33, 0.0  ;;  %v3682_v3 = vmul.f32 %v5132_v12, %v6357_v52  ;;  %v4900_v61 = vpop.f32.mrb[30].mxu1  ;;  %v5100_v14 = vpop.f32.mrb[30].mxu0 }
 0x205   : > { %3784 = vst [vmem:[%s6371_s22 + $0xd8] sm:$0xff] %v3752_v16  ;;  %v3722_v18 = vadd.f32 %v6362_v56, %v3683_v20  ;;  %v5133_v23 = vadd.f32 %v5100_v14, %v4900_v61  ;;  %v2045_v26 = vpop.f32.mrb[31].mxu1  ;;  %v3606_v27 = vpop.f32.mrb[31].mxu0 }
 0x206   : > { %3783 = vst [vmem:[%s6371_s22 + $0xd0] sm:$0xff] %v3751_v1  ;;  %v3721_v29 = vadd.f32 %v6362_v56, %v3682_v3  ;;  %v5134_v30 = vadd.f32 %v3606_v27, %v2045_v26 }
 0x207   : > { %v3754_v31 = vmax.f32 %v3722_v18, 0.0  ;;  %v3685_v32 = vmul.f32 %v5133_v23, %v6357_v52 }
 0x208   : > { %v3753_v34 = vmax.f32 %v3721_v29, 0.0  ;;  %v3684_v35 = vmul.f32 %v5134_v30, %v6357_v52 }
 0x209   : > { %3786 = vst [vmem:[%s6371_s22 + $0xe8] sm:$0xff] %v3754_v31  ;;  %v3724_v36 = vadd.f32 %v6362_v56, %v3685_v32 }
 0x20a   : > { %3785 = vst [vmem:[%s6371_s22 + $0xe0] sm:$0xff] %v3753_v34  ;;  %v3723_v38 = vadd.f32 %v6362_v56, %v3684_v35 }
 0x20b   : > { %v3756_v39 = vmax.f32 %v3724_v36, 0.0 }
 0x20c   : > { %v3755_v40 = vmax.f32 %v3723_v38, 0.0 }
 0x20d   : > { %3788 = vst [vmem:[%s6371_s22 + $0xf8] sm:$0xff] %v3756_v39 }
 0x20e   : > { %3787 = vst [vmem:[%s6371_s22 + $0xf0] sm:$0xff] %v3755_v40 }
 0x20f PF: > { %s14_s15 = sadd.s32 1, %s5374_s15  }
 0x210   : > { %p11_p4 = scmp.ge.s32.totalorder %s14_s15, 4  }
 0x212   :  { %13 = sbr.rel (!%p11_p4) target bundleno = 1 (0x1), region = 76 }

</bundles_post_ra>
